<compile_context>
chip_gen: v5e
topology: v5e:2x2
jax: 0.10.0
libtpu: 0.0.40
codegen_flags: <defaults>
</compile_context>

<pallas_src>
import functools

import jax
import jax.numpy as jnp
from jax.experimental import pallas as pl
from jax.experimental.pallas import tpu as pltpu

D_MODEL = 32
NHEAD = 4
DIM_FF = 64
NUM_LAYERS = 2
LN_EPS = 1e-5


def _layer_norm(x, g, b):
    # x: (N, D); g, b: (1, D)
    mu = jnp.mean(x, axis=-1, keepdims=True)
    var = jnp.mean((x - mu) ** 2, axis=-1, keepdims=True)
    return (x - mu) * jax.lax.rsqrt(var + LN_EPS) * g + b


def _decoder_kernel(num_layers, nhead, batch, t_len, s_len, apply_norm,
                    tgt_ref, mem_ref, qp_ref, pos_ref,
                    sa_w_ref, sa_b_ref, sa_ow_ref, sa_ob_ref,
                    ca_w_ref, ca_b_ref, ca_ow_ref, ca_ob_ref,
                    ln1_g_ref, ln1_b_ref, ln2_g_ref, ln2_b_ref,
                    ln3_g_ref, ln3_b_ref,
                    w1_ref, b1_ref, w2_ref, b2_ref,
                    fn_g_ref, fn_b_ref,
                    inter_ref, final_ref):
    f32 = jnp.float32
    d = tgt_ref.shape[-1]
    dh = d // nhead
    scale = 1.0 / float(dh) ** 0.5
    B, T, S = batch, t_len, s_len

    # Flatten batch into the matmul M dimension (rows are b-major).
    x = tgt_ref[...].astype(f32).reshape(B * T, d)
    qp = qp_ref[...].astype(f32).reshape(B * T, d)
    mem = mem_ref[...].astype(f32).reshape(B * S, d)
    mem_k = mem + pos_ref[...].astype(f32).reshape(B * S, d)   # hoisted out of layer loop

    def split_heads(y, L):
        # (B*L, D) -> (H*B, L, dh); leading index = h*B + b.
        return jnp.concatenate(
            [y[:, h * dh:(h + 1) * dh].reshape(B, L, dh) for h in range(nhead)],
            axis=0)

    def merge_heads(o, L):
        # (H*B, L, dh) -> (B*L, D) with head blocks contiguous along the lane dim.
        return jnp.concatenate(
            [o[h * B:(h + 1) * B].reshape(B * L, dh) for h in range(nhead)],
            axis=-1)

    def attend(q, k, v, Lq, Lk, ow, ob):
        # q: (B*Lq, D); k, v: (B*Lk, D); ow: (D, D) pre-transposed; ob: (1, D)
        qh = split_heads(q, Lq)              # (H*B, Lq, dh)
        kh = split_heads(k, Lk)              # (H*B, Lk, dh)
        vh = split_heads(v, Lk)
        s = jnp.einsum('bqd,bkd->bqk', qh, kh,
                       preferred_element_type=f32) * scale
        s = s - jnp.max(s, axis=-1, keepdims=True)
        p = jnp.exp(s)
        p = p / jnp.sum(p, axis=-1, keepdims=True)
        o = jnp.einsum('bqk,bkd->bqd', p, vh, preferred_element_type=f32)
        o = merge_heads(o, Lq)               # (B*Lq, D)
        return jnp.dot(o, ow, preferred_element_type=f32) + ob

    for l in range(num_layers):              # static unrolled layer loop (weights resident)
        sa_w = sa_w_ref[l]                   # (D, 3D) pre-transposed
        sa_b = sa_b_ref[l]                   # (1, 3D)
        ca_w = ca_w_ref[l]
        ca_b = ca_b_ref[l]

        # --- self-attention: q and k share the same input -> packed (D, 2D) matmul
        q_in = x + qp
        qk = jnp.dot(q_in, sa_w[:, :2 * d], preferred_element_type=f32) + sa_b[:, :2 * d]
        v = jnp.dot(x, sa_w[:, 2 * d:], preferred_element_type=f32) + sa_b[:, 2 * d:]
        sa = attend(qk[:, :d], qk[:, d:], v, T, T, sa_ow_ref[l], sa_ob_ref[l])
        x = _layer_norm(x + sa, ln1_g_ref[l], ln1_b_ref[l])

        # --- cross-attention: q from decoder (+query_pos), k from memory(+pos), v from memory
        cq = jnp.dot(x + qp, ca_w[:, :d], preferred_element_type=f32) + ca_b[:, :d]
        ck = jnp.dot(mem_k, ca_w[:, d:2 * d], preferred_element_type=f32) + ca_b[:, d:2 * d]
        cv = jnp.dot(mem, ca_w[:, 2 * d:], preferred_element_type=f32) + ca_b[:, 2 * d:]
        ca = attend(cq, ck, cv, T, S, ca_ow_ref[l], ca_ob_ref[l])
        x = _layer_norm(x + ca, ln2_g_ref[l], ln2_b_ref[l])

        # --- feed-forward (ReLU)
        h1 = jnp.maximum(
            jnp.dot(x, w1_ref[l], preferred_element_type=f32) + b1_ref[l], 0.0)
        ff = jnp.dot(h1, w2_ref[l], preferred_element_type=f32) + b2_ref[l]
        x = _layer_norm(x + ff, ln3_g_ref[l], ln3_b_ref[l])

        # normed intermediate output for this layer
        xn = _layer_norm(x, fn_g_ref[...], fn_b_ref[...]) if apply_norm else x
        inter_ref[l] = xn.reshape(B, T, d).astype(inter_ref.dtype)

    x_fin = _layer_norm(x, fn_g_ref[...], fn_b_ref[...]) if apply_norm else x
    final_ref[...] = x_fin.reshape(B, T, d).astype(final_ref.dtype)


def _prep_params(layer_params):
    """Stack per-layer params over a leading L axis; pre-transpose matmul weights."""
    def stk(key, transpose=False):
        ws = [jnp.asarray(p[key], jnp.float32) for p in layer_params]
        if transpose:
            ws = [w.T for w in ws]
        return jnp.stack(ws)

    return [
        stk("sa_w", True), stk("sa_b"), stk("sa_ow", True), stk("sa_ob"),
        stk("ca_w", True), stk("ca_b"), stk("ca_ow", True), stk("ca_ob"),
        stk("ln1_g"), stk("ln1_b"), stk("ln2_g"), stk("ln2_b"),
        stk("ln3_g"), stk("ln3_b"),
        stk("w1", True), stk("b1"), stk("w2", True), stk("b2"),
    ]


def transformer_decoder(tgt, memory, layer_params, norm_params=None,
                        pos=None, query_pos=None, return_intermediate=False,
                        nhead=NHEAD):
    """tgt: (T, B, D), memory: (S, B, D) — PyTorch/DETR layout."""
    T, B, D = tgt.shape
    S = memory.shape[0]
    L = len(layer_params)

    if pos is None:
        pos = jnp.zeros_like(memory)
    if query_pos is None:
        query_pos = jnp.zeros_like(tgt)
    if return_intermediate:
        assert norm_params is not None

    # Tiny layout transposes to batch-major (plain XLA ops); all heavy work is fused below.
    tgt_b = jnp.transpose(tgt, (1, 0, 2))
    mem_b = jnp.transpose(memory, (1, 0, 2))
    qp_b = jnp.transpose(query_pos, (1, 0, 2))
    pos_b = jnp.transpose(pos, (1, 0, 2))

    weights = _prep_params(layer_params)
    apply_norm = norm_params is not None
    if apply_norm:
        fn_g, fn_b = norm_params
        fn_g = jnp.asarray(fn_g, jnp.float32).reshape(1, D)
        fn_b = jnp.asarray(fn_b, jnp.float32).reshape(1, D)
    else:
        fn_g = jnp.ones((1, D), jnp.float32)
        fn_b = jnp.zeros((1, D), jnp.float32)

    inputs = [tgt_b, mem_b, qp_b, pos_b] + weights + [fn_g, fn_b]

    def full_spec(arr):
        nd = arr.ndim
        return pl.BlockSpec(arr.shape, lambda i, _n=nd: (0,) * _n)

    in_specs = [full_spec(a) for a in inputs]
    out_shape = (jax.ShapeDtypeStruct((L, B, T, D), tgt.dtype),
                 jax.ShapeDtypeStruct((B, T, D), tgt.dtype))
    out_specs = (pl.BlockSpec((L, B, T, D), lambda i: (0, 0, 0, 0)),
                 pl.BlockSpec((B, T, D), lambda i: (0, 0, 0)))

    kernel = functools.partial(_decoder_kernel, L, nhead, B, T, S, apply_norm)
    inter, final = pl.pallas_call(
        kernel,
        out_shape=out_shape,
        grid=(1,),                       # single grid step: weights DMA'd once, no per-step overhead
        in_specs=in_specs,
        out_specs=out_specs,
        compiler_params=pltpu.CompilerParams(
            dimension_semantics=("arbitrary",)),   # tiny workload: keep on one TensorCore (v7x)
    )(*inputs)

    if return_intermediate:
        return jnp.transpose(inter, (0, 2, 1, 3))   # (L, T, B, D)
    return jnp.transpose(final, (1, 0, 2))[None]    # (1, T, B, D)


def init_layer_params(key, d_model=D_MODEL, dim_ff=DIM_FF):
    ks = jax.random.split(key, 6)
    std = 0.02
    f32 = jnp.float32
    return {
        "sa_w": jax.random.normal(ks[0], (3 * d_model, d_model), f32) * std,
        "sa_b": jnp.zeros((1, 3 * d_model), f32),
        "sa_ow": jax.random.normal(ks[1], (d_model, d_model), f32) * std,
        "sa_ob": jnp.zeros((1, d_model), f32),
        "ca_w": jax.random.normal(ks[2], (3 * d_model, d_model), f32) * std,
        "ca_b": jnp.zeros((1, 3 * d_model), f32),
        "ca_ow": jax.random.normal(ks[3], (d_model, d_model), f32) * std,
        "ca_ob": jnp.zeros((1, d_model), f32),
        "ln1_g": jnp.ones((1, d_model), f32), "ln1_b": jnp.zeros((1, d_model), f32),
        "ln2_g": jnp.ones((1, d_model), f32), "ln2_b": jnp.zeros((1, d_model), f32),
        "ln3_g": jnp.ones((1, d_model), f32), "ln3_b": jnp.zeros((1, d_model), f32),
        "w1": jax.random.normal(ks[4], (dim_ff, d_model), f32) * std,
        "b1": jnp.zeros((1, dim_ff), f32),
        "w2": jax.random.normal(ks[5], (d_model, dim_ff), f32) * std,
        "b2": jnp.zeros((1, d_model), f32),
    }


if __name__ == "__main__":
    T, S, B = 8, 16, 2        # num_queries, memory length (H*W), batch
    key = jax.random.PRNGKey(0)
    k_tgt, k_mem, k_qp, k_pos, k_par = jax.random.split(key, 5)

    tgt = jax.random.normal(k_tgt, (T, B, D_MODEL), jnp.float32)
    memory = jax.random.normal(k_mem, (S, B, D_MODEL), jnp.float32)
    query_pos = jax.random.normal(k_qp, (T, B, D_MODEL), jnp.float32)
    pos = jax.random.normal(k_pos, (S, B, D_MODEL), jnp.float32)

    layer_keys = jax.random.split(k_par, NUM_LAYERS)
    layer_params = [init_layer_params(k) for k in layer_keys]
    norm_params = (jnp.ones((1, D_MODEL), jnp.float32),
                   jnp.zeros((1, D_MODEL), jnp.float32))

    out = transformer_decoder(tgt, memory, layer_params, norm_params,
                              pos=pos, query_pos=query_pos,
                              return_intermediate=True)
    out = jax.block_until_ready(out)
    assert out.shape == (NUM_LAYERS, T, B, D_MODEL), out.shape
    assert jnp.all(jnp.isfinite(out))

    # also exercise the return_intermediate=False path
    out2 = jax.block_until_ready(
        transformer_decoder(tgt, memory, layer_params, norm_params,
                            pos=pos, query_pos=query_pos,
                            return_intermediate=False))
    assert out2.shape == (1, T, B, D_MODEL), out2.shape
    assert jnp.all(jnp.isfinite(out2))

    print("KERNEL_OK")
</pallas_src>

<mosaic_0001>
module attributes {stable_mosaic.version = 11 : i64} {
  func.func @_decoder_kernel(%arg0: i32, %arg1: memref<2x8x32xf32, #tpu.memory_space<vmem>>, %arg2: memref<2x16x32xf32, #tpu.memory_space<vmem>>, %arg3: memref<2x8x32xf32, #tpu.memory_space<vmem>>, %arg4: memref<2x16x32xf32, #tpu.memory_space<vmem>>, %arg5: memref<2x32x96xf32, #tpu.memory_space<vmem>>, %arg6: memref<2x1x96xf32, #tpu.memory_space<vmem>>, %arg7: memref<2x32x32xf32, #tpu.memory_space<vmem>>, %arg8: memref<2x1x32xf32, #tpu.memory_space<vmem>>, %arg9: memref<2x32x96xf32, #tpu.memory_space<vmem>>, %arg10: memref<2x1x96xf32, #tpu.memory_space<vmem>>, %arg11: memref<2x32x32xf32, #tpu.memory_space<vmem>>, %arg12: memref<2x1x32xf32, #tpu.memory_space<vmem>>, %arg13: memref<2x1x32xf32, #tpu.memory_space<vmem>>, %arg14: memref<2x1x32xf32, #tpu.memory_space<vmem>>, %arg15: memref<2x1x32xf32, #tpu.memory_space<vmem>>, %arg16: memref<2x1x32xf32, #tpu.memory_space<vmem>>, %arg17: memref<2x1x32xf32, #tpu.memory_space<vmem>>, %arg18: memref<2x1x32xf32, #tpu.memory_space<vmem>>, %arg19: memref<2x32x64xf32, #tpu.memory_space<vmem>>, %arg20: memref<2x1x64xf32, #tpu.memory_space<vmem>>, %arg21: memref<2x64x32xf32, #tpu.memory_space<vmem>>, %arg22: memref<2x1x32xf32, #tpu.memory_space<vmem>>, %arg23: memref<1x32xf32, #tpu.memory_space<vmem>>, %arg24: memref<1x32xf32, #tpu.memory_space<vmem>>, %arg25: memref<2x2x8x32xf32, #tpu.memory_space<vmem>>, %arg26: memref<2x8x32xf32, #tpu.memory_space<vmem>>) attributes {dimension_semantics = [#tpu.dimension_semantics<arbitrary>], iteration_bounds = array<i64: 1>, scalar_prefetch = 0 : i64, scratch_operands = 0 : i64, tpu.core_type = #tpu.core_type<tc>, window_params = [{pipeline_mode = #tpu.pipeline_mode<synchronous>, transform_indices = @transform_0, window_bounds = array<i64: 2, 8, 32>}, {pipeline_mode = #tpu.pipeline_mode<synchronous>, transform_indices = @transform_1, window_bounds = array<i64: 2, 16, 32>}, {pipeline_mode = #tpu.pipeline_mode<synchronous>, transform_indices = @transform_2, window_bounds = array<i64: 2, 8, 32>}, {pipeline_mode = #tpu.pipeline_mode<synchronous>, transform_indices = @transform_3, window_bounds = array<i64: 2, 16, 32>}, {pipeline_mode = #tpu.pipeline_mode<synchronous>, transform_indices = @transform_4, window_bounds = array<i64: 2, 32, 96>}, {pipeline_mode = #tpu.pipeline_mode<synchronous>, transform_indices = @transform_5, window_bounds = array<i64: 2, 1, 96>}, {pipeline_mode = #tpu.pipeline_mode<synchronous>, transform_indices = @transform_6, window_bounds = array<i64: 2, 32, 32>}, {pipeline_mode = #tpu.pipeline_mode<synchronous>, transform_indices = @transform_7, window_bounds = array<i64: 2, 1, 32>}, {pipeline_mode = #tpu.pipeline_mode<synchronous>, transform_indices = @transform_8, window_bounds = array<i64: 2, 32, 96>}, {pipeline_mode = #tpu.pipeline_mode<synchronous>, transform_indices = @transform_9, window_bounds = array<i64: 2, 1, 96>}, {pipeline_mode = #tpu.pipeline_mode<synchronous>, transform_indices = @transform_10, window_bounds = array<i64: 2, 32, 32>}, {pipeline_mode = #tpu.pipeline_mode<synchronous>, transform_indices = @transform_11, window_bounds = array<i64: 2, 1, 32>}, {pipeline_mode = #tpu.pipeline_mode<synchronous>, transform_indices = @transform_12, window_bounds = array<i64: 2, 1, 32>}, {pipeline_mode = #tpu.pipeline_mode<synchronous>, transform_indices = @transform_13, window_bounds = array<i64: 2, 1, 32>}, {pipeline_mode = #tpu.pipeline_mode<synchronous>, transform_indices = @transform_14, window_bounds = array<i64: 2, 1, 32>}, {pipeline_mode = #tpu.pipeline_mode<synchronous>, transform_indices = @transform_15, window_bounds = array<i64: 2, 1, 32>}, {pipeline_mode = #tpu.pipeline_mode<synchronous>, transform_indices = @transform_16, window_bounds = array<i64: 2, 1, 32>}, {pipeline_mode = #tpu.pipeline_mode<synchronous>, transform_indices = @transform_17, window_bounds = array<i64: 2, 1, 32>}, {pipeline_mode = #tpu.pipeline_mode<synchronous>, transform_indices = @transform_18, window_bounds = array<i64: 2, 32, 64>}, {pipeline_mode = #tpu.pipeline_mode<synchronous>, transform_indices = @transform_19, window_bounds = array<i64: 2, 1, 64>}, {pipeline_mode = #tpu.pipeline_mode<synchronous>, transform_indices = @transform_20, window_bounds = array<i64: 2, 64, 32>}, {pipeline_mode = #tpu.pipeline_mode<synchronous>, transform_indices = @transform_21, window_bounds = array<i64: 2, 1, 32>}, {pipeline_mode = #tpu.pipeline_mode<synchronous>, transform_indices = @transform_22, window_bounds = array<i64: 1, 32>}, {pipeline_mode = #tpu.pipeline_mode<synchronous>, transform_indices = @transform_23, window_bounds = array<i64: 1, 32>}, {pipeline_mode = #tpu.pipeline_mode<synchronous>, transform_indices = @transform_24, window_bounds = array<i64: 2, 2, 8, 32>}, {pipeline_mode = #tpu.pipeline_mode<synchronous>, transform_indices = @transform_25, window_bounds = array<i64: 2, 8, 32>}]} {
    %c0 = arith.constant 0 : index
    %c0_0 = arith.constant 0 : index
    %c0_1 = arith.constant 0 : index
    %0 = vector.load %arg1[%c0, %c0_0, %c0_1] : memref<2x8x32xf32, #tpu.memory_space<vmem>>, vector<2x8x32xf32>
    %1 = vector.shape_cast %0 : vector<2x8x32xf32> to vector<16x32xf32>
    %c0_2 = arith.constant 0 : index
    %c0_3 = arith.constant 0 : index
    %c0_4 = arith.constant 0 : index
    %2 = vector.load %arg3[%c0_2, %c0_3, %c0_4] : memref<2x8x32xf32, #tpu.memory_space<vmem>>, vector<2x8x32xf32>
    %3 = vector.shape_cast %2 : vector<2x8x32xf32> to vector<16x32xf32>
    %c0_5 = arith.constant 0 : index
    %c0_6 = arith.constant 0 : index
    %c0_7 = arith.constant 0 : index
    %4 = vector.load %arg2[%c0_5, %c0_6, %c0_7] : memref<2x16x32xf32, #tpu.memory_space<vmem>>, vector<2x16x32xf32>
    %5 = vector.shape_cast %4 : vector<2x16x32xf32> to vector<32x32xf32>
    %c0_8 = arith.constant 0 : index
    %c0_9 = arith.constant 0 : index
    %c0_10 = arith.constant 0 : index
    %6 = vector.load %arg4[%c0_8, %c0_9, %c0_10] : memref<2x16x32xf32, #tpu.memory_space<vmem>>, vector<2x16x32xf32>
    %7 = vector.shape_cast %6 : vector<2x16x32xf32> to vector<32x32xf32>
    %8 = arith.addf %5, %7 : vector<32x32xf32>
    %c0_11 = arith.constant 0 : index
    %c0_12 = arith.constant 0 : index
    %c0_13 = arith.constant 0 : index
    %9 = vector.load %arg5[%c0_11, %c0_12, %c0_13] : memref<2x32x96xf32, #tpu.memory_space<vmem>>, vector<1x32x96xf32>
    %10 = vector.shape_cast %9 : vector<1x32x96xf32> to vector<32x96xf32>
    %c0_14 = arith.constant 0 : index
    %c0_15 = arith.constant 0 : index
    %c0_16 = arith.constant 0 : index
    %11 = vector.load %arg6[%c0_14, %c0_15, %c0_16] : memref<2x1x96xf32, #tpu.memory_space<vmem>>, vector<1x1x96xf32>
    %12 = vector.shape_cast %11 : vector<1x1x96xf32> to vector<1x96xf32>
    %c0_17 = arith.constant 0 : index
    %c0_18 = arith.constant 0 : index
    %c0_19 = arith.constant 0 : index
    %13 = vector.load %arg9[%c0_17, %c0_18, %c0_19] : memref<2x32x96xf32, #tpu.memory_space<vmem>>, vector<1x32x96xf32>
    %14 = vector.shape_cast %13 : vector<1x32x96xf32> to vector<32x96xf32>
    %c0_20 = arith.constant 0 : index
    %c0_21 = arith.constant 0 : index
    %c0_22 = arith.constant 0 : index
    %15 = vector.load %arg10[%c0_20, %c0_21, %c0_22] : memref<2x1x96xf32, #tpu.memory_space<vmem>>, vector<1x1x96xf32>
    %16 = vector.shape_cast %15 : vector<1x1x96xf32> to vector<1x96xf32>
    %17 = arith.addf %1, %3 : vector<16x32xf32>
    %18 = vector.extract_strided_slice %10 {offsets = [0, 0], sizes = [32, 64], strides = [1, 1]} : vector<32x96xf32> to vector<32x64xf32>
    %cst = arith.constant dense<0.000000e+00> : vector<16x64xf32>
    %19 = tpu.matmul %17, %18, %cst {dimension_numbers = #tpu.dot_dimension_numbers<[1], [0], [0], [1], [0, 0, 1, 1], [], []>} : vector<16x32xf32>, vector<32x64xf32>, vector<16x64xf32> -> vector<16x64xf32>
    %20 = vector.extract_strided_slice %12 {offsets = [0, 0], sizes = [1, 64], strides = [1, 1]} : vector<1x96xf32> to vector<1x64xf32>
    %21 = vector.broadcast %20 : vector<1x64xf32> to vector<16x64xf32>
    %22 = arith.addf %19, %21 : vector<16x64xf32>
    %23 = vector.extract_strided_slice %10 {offsets = [0, 64], sizes = [32, 32], strides = [1, 1]} : vector<32x96xf32> to vector<32x32xf32>
    %cst_23 = arith.constant dense<0.000000e+00> : vector<16x32xf32>
    %24 = tpu.matmul %1, %23, %cst_23 {dimension_numbers = #tpu.dot_dimension_numbers<[1], [0], [0], [1], [0, 0, 1, 1], [], []>} : vector<16x32xf32>, vector<32x32xf32>, vector<16x32xf32> -> vector<16x32xf32>
    %25 = vector.extract_strided_slice %12 {offsets = [0, 64], sizes = [1, 32], strides = [1, 1]} : vector<1x96xf32> to vector<1x32xf32>
    %26 = vector.broadcast %25 : vector<1x32xf32> to vector<16x32xf32>
    %27 = arith.addf %24, %26 : vector<16x32xf32>
    %28 = vector.extract_strided_slice %22 {offsets = [0, 0], sizes = [16, 32], strides = [1, 1]} : vector<16x64xf32> to vector<16x32xf32>
    %29 = vector.extract_strided_slice %22 {offsets = [0, 32], sizes = [16, 32], strides = [1, 1]} : vector<16x64xf32> to vector<16x32xf32>
    %c0_24 = arith.constant 0 : index
    %c0_25 = arith.constant 0 : index
    %c0_26 = arith.constant 0 : index
    %30 = vector.load %arg7[%c0_24, %c0_25, %c0_26] : memref<2x32x32xf32, #tpu.memory_space<vmem>>, vector<1x32x32xf32>
    %31 = vector.shape_cast %30 : vector<1x32x32xf32> to vector<32x32xf32>
    %c0_27 = arith.constant 0 : index
    %c0_28 = arith.constant 0 : index
    %c0_29 = arith.constant 0 : index
    %32 = vector.load %arg8[%c0_27, %c0_28, %c0_29] : memref<2x1x32xf32, #tpu.memory_space<vmem>>, vector<1x1x32xf32>
    %33 = vector.shape_cast %32 : vector<1x1x32xf32> to vector<1x32xf32>
    %34 = vector.extract_strided_slice %28 {offsets = [0, 0], sizes = [16, 8], strides = [1, 1]} : vector<16x32xf32> to vector<16x8xf32>
    %35 = vector.shape_cast %34 : vector<16x8xf32> to vector<2x8x8xf32>
    %36 = vector.extract_strided_slice %28 {offsets = [0, 8], sizes = [16, 8], strides = [1, 1]} : vector<16x32xf32> to vector<16x8xf32>
    %37 = vector.shape_cast %36 : vector<16x8xf32> to vector<2x8x8xf32>
    %38 = vector.extract_strided_slice %28 {offsets = [0, 16], sizes = [16, 8], strides = [1, 1]} : vector<16x32xf32> to vector<16x8xf32>
    %39 = vector.shape_cast %38 : vector<16x8xf32> to vector<2x8x8xf32>
    %40 = vector.extract_strided_slice %28 {offsets = [0, 24], sizes = [16, 8], strides = [1, 1]} : vector<16x32xf32> to vector<16x8xf32>
    %41 = vector.shape_cast %40 : vector<16x8xf32> to vector<2x8x8xf32>
    %42 = tpu.concatenate %35, %37, %39, %41 in 0 : vector<2x8x8xf32>, vector<2x8x8xf32>, vector<2x8x8xf32>, vector<2x8x8xf32> -> vector<8x8x8xf32>
    %43 = vector.extract_strided_slice %29 {offsets = [0, 0], sizes = [16, 8], strides = [1, 1]} : vector<16x32xf32> to vector<16x8xf32>
    %44 = vector.shape_cast %43 : vector<16x8xf32> to vector<2x8x8xf32>
    %45 = vector.extract_strided_slice %29 {offsets = [0, 8], sizes = [16, 8], strides = [1, 1]} : vector<16x32xf32> to vector<16x8xf32>
    %46 = vector.shape_cast %45 : vector<16x8xf32> to vector<2x8x8xf32>
    %47 = vector.extract_strided_slice %29 {offsets = [0, 16], sizes = [16, 8], strides = [1, 1]} : vector<16x32xf32> to vector<16x8xf32>
    %48 = vector.shape_cast %47 : vector<16x8xf32> to vector<2x8x8xf32>
    %49 = vector.extract_strided_slice %29 {offsets = [0, 24], sizes = [16, 8], strides = [1, 1]} : vector<16x32xf32> to vector<16x8xf32>
    %50 = vector.shape_cast %49 : vector<16x8xf32> to vector<2x8x8xf32>
    %51 = tpu.concatenate %44, %46, %48, %50 in 0 : vector<2x8x8xf32>, vector<2x8x8xf32>, vector<2x8x8xf32>, vector<2x8x8xf32> -> vector<8x8x8xf32>
    %52 = vector.extract_strided_slice %27 {offsets = [0, 0], sizes = [16, 8], strides = [1, 1]} : vector<16x32xf32> to vector<16x8xf32>
    %53 = vector.shape_cast %52 : vector<16x8xf32> to vector<2x8x8xf32>
    %54 = vector.extract_strided_slice %27 {offsets = [0, 8], sizes = [16, 8], strides = [1, 1]} : vector<16x32xf32> to vector<16x8xf32>
    %55 = vector.shape_cast %54 : vector<16x8xf32> to vector<2x8x8xf32>
    %56 = vector.extract_strided_slice %27 {offsets = [0, 16], sizes = [16, 8], strides = [1, 1]} : vector<16x32xf32> to vector<16x8xf32>
    %57 = vector.shape_cast %56 : vector<16x8xf32> to vector<2x8x8xf32>
    %58 = vector.extract_strided_slice %27 {offsets = [0, 24], sizes = [16, 8], strides = [1, 1]} : vector<16x32xf32> to vector<16x8xf32>
    %59 = vector.shape_cast %58 : vector<16x8xf32> to vector<2x8x8xf32>
    %60 = tpu.concatenate %53, %55, %57, %59 in 0 : vector<2x8x8xf32>, vector<2x8x8xf32>, vector<2x8x8xf32>, vector<2x8x8xf32> -> vector<8x8x8xf32>
    "tpu.trace_start"() <{level = 10 : i32, message = "bqd,bkd->bqk"}> : () -> ()
    %cst_30 = arith.constant dense<0.000000e+00> : vector<8x8x8xf32>
    %61 = tpu.matmul %42, %51, %cst_30 {dimension_numbers = #tpu.dot_dimension_numbers<[2], [2], [1], [1], [0, 0, 0, 1, 1, 1], [0], [0]>} : vector<8x8x8xf32>, vector<8x8x8xf32>, vector<8x8x8xf32> -> vector<8x8x8xf32>
    "tpu.trace_stop"() : () -> ()
    %cst_31 = arith.constant 0.353553385 : f32
    %62 = vector.broadcast %cst_31 : f32 to vector<8x8x8xf32>
    %63 = arith.mulf %61, %62 : vector<8x8x8xf32>
    %cst_32 = arith.constant dense<0xFF800000> : vector<8x8xf32>
    %64 = vector.multi_reduction <maximumf>, %63, %cst_32 [2] : vector<8x8x8xf32> to vector<8x8xf32>
    %65 = vector.shape_cast %64 : vector<8x8xf32> to vector<8x8x1xf32>
    %66 = vector.broadcast %65 : vector<8x8x1xf32> to vector<8x8x8xf32>
    %67 = arith.subf %63, %66 : vector<8x8x8xf32>
    %68 = math.exp %67 : vector<8x8x8xf32>
    %cst_33 = arith.constant dense<0.000000e+00> : vector<8x8xf32>
    %69 = vector.multi_reduction <add>, %68, %cst_33 [2] : vector<8x8x8xf32> to vector<8x8xf32>
    %70 = vector.shape_cast %69 : vector<8x8xf32> to vector<8x8x1xf32>
    %71 = vector.broadcast %70 : vector<8x8x1xf32> to vector<8x8x8xf32>
    %72 = arith.divf %68, %71 : vector<8x8x8xf32>
    "tpu.trace_start"() <{level = 10 : i32, message = "bqk,bkd->bqd"}> : () -> ()
    %cst_34 = arith.constant dense<0.000000e+00> : vector<8x8x8xf32>
    %73 = tpu.matmul %72, %60, %cst_34 {dimension_numbers = #tpu.dot_dimension_numbers<[2], [1], [1], [2], [0, 0, 0, 1, 1, 2], [0], [0]>} : vector<8x8x8xf32>, vector<8x8x8xf32>, vector<8x8x8xf32> -> vector<8x8x8xf32>
    "tpu.trace_stop"() : () -> ()
    %74 = vector.extract_strided_slice %73 {offsets = [0, 0, 0], sizes = [2, 8, 8], strides = [1, 1, 1]} : vector<8x8x8xf32> to vector<2x8x8xf32>
    %75 = vector.shape_cast %74 : vector<2x8x8xf32> to vector<16x8xf32>
    %76 = vector.extract_strided_slice %73 {offsets = [2, 0, 0], sizes = [2, 8, 8], strides = [1, 1, 1]} : vector<8x8x8xf32> to vector<2x8x8xf32>
    %77 = vector.shape_cast %76 : vector<2x8x8xf32> to vector<16x8xf32>
    %78 = vector.extract_strided_slice %73 {offsets = [4, 0, 0], sizes = [2, 8, 8], strides = [1, 1, 1]} : vector<8x8x8xf32> to vector<2x8x8xf32>
    %79 = vector.shape_cast %78 : vector<2x8x8xf32> to vector<16x8xf32>
    %80 = vector.extract_strided_slice %73 {offsets = [6, 0, 0], sizes = [2, 8, 8], strides = [1, 1, 1]} : vector<8x8x8xf32> to vector<2x8x8xf32>
    %81 = vector.shape_cast %80 : vector<2x8x8xf32> to vector<16x8xf32>
    %82 = tpu.concatenate %75, %77, %79, %81 in 1 : vector<16x8xf32>, vector<16x8xf32>, vector<16x8xf32>, vector<16x8xf32> -> vector<16x32xf32>
    %cst_35 = arith.constant dense<0.000000e+00> : vector<16x32xf32>
    %83 = tpu.matmul %82, %31, %cst_35 {dimension_numbers = #tpu.dot_dimension_numbers<[1], [0], [0], [1], [0, 0, 1, 1], [], []>} : vector<16x32xf32>, vector<32x32xf32>, vector<16x32xf32> -> vector<16x32xf32>
    %84 = vector.broadcast %33 : vector<1x32xf32> to vector<16x32xf32>
    %85 = arith.addf %83, %84 : vector<16x32xf32>
    %86 = arith.addf %1, %85 : vector<16x32xf32>
    %c0_36 = arith.constant 0 : index
    %c0_37 = arith.constant 0 : index
    %c0_38 = arith.constant 0 : index
    %87 = vector.load %arg13[%c0_36, %c0_37, %c0_38] : memref<2x1x32xf32, #tpu.memory_space<vmem>>, vector<1x1x32xf32>
    %88 = vector.shape_cast %87 : vector<1x1x32xf32> to vector<1x32xf32>
    %c0_39 = arith.constant 0 : index
    %c0_40 = arith.constant 0 : index
    %c0_41 = arith.constant 0 : index
    %89 = vector.load %arg14[%c0_39, %c0_40, %c0_41] : memref<2x1x32xf32, #tpu.memory_space<vmem>>, vector<1x1x32xf32>
    %90 = vector.shape_cast %89 : vector<1x1x32xf32> to vector<1x32xf32>
    %cst_42 = arith.constant dense<0.000000e+00> : vector<16xf32>
    %91 = vector.multi_reduction <add>, %86, %cst_42 [1] : vector<16x32xf32> to vector<16xf32>
    %92 = vector.shape_cast %91 : vector<16xf32> to vector<16x1xf32>
    %cst_43 = arith.constant 3.200000e+01 : f32
    %93 = vector.broadcast %cst_43 : f32 to vector<16x1xf32>
    %94 = arith.divf %92, %93 : vector<16x1xf32>
    %95 = vector.broadcast %94 : vector<16x1xf32> to vector<16x32xf32>
    %96 = arith.subf %86, %95 : vector<16x32xf32>
    %97 = arith.mulf %96, %96 : vector<16x32xf32>
    %cst_44 = arith.constant dense<0.000000e+00> : vector<16xf32>
    %98 = vector.multi_reduction <add>, %97, %cst_44 [1] : vector<16x32xf32> to vector<16xf32>
    %99 = vector.shape_cast %98 : vector<16xf32> to vector<16x1xf32>
    %cst_45 = arith.constant 3.200000e+01 : f32
    %100 = vector.broadcast %cst_45 : f32 to vector<16x1xf32>
    %101 = arith.divf %99, %100 : vector<16x1xf32>
    %102 = vector.broadcast %94 : vector<16x1xf32> to vector<16x32xf32>
    %103 = arith.subf %86, %102 : vector<16x32xf32>
    %cst_46 = arith.constant 9.99999974E-6 : f32
    %104 = vector.broadcast %cst_46 : f32 to vector<16x1xf32>
    %105 = arith.addf %101, %104 : vector<16x1xf32>
    %106 = math.rsqrt %105 : vector<16x1xf32>
    %107 = vector.broadcast %106 : vector<16x1xf32> to vector<16x32xf32>
    %108 = arith.mulf %103, %107 : vector<16x32xf32>
    %109 = vector.broadcast %88 : vector<1x32xf32> to vector<16x32xf32>
    %110 = arith.mulf %108, %109 : vector<16x32xf32>
    %111 = vector.broadcast %90 : vector<1x32xf32> to vector<16x32xf32>
    %112 = arith.addf %110, %111 : vector<16x32xf32>
    %113 = arith.addf %112, %3 : vector<16x32xf32>
    %114 = vector.extract_strided_slice %14 {offsets = [0, 0], sizes = [32, 32], strides = [1, 1]} : vector<32x96xf32> to vector<32x32xf32>
    %cst_47 = arith.constant dense<0.000000e+00> : vector<16x32xf32>
    %115 = tpu.matmul %113, %114, %cst_47 {dimension_numbers = #tpu.dot_dimension_numbers<[1], [0], [0], [1], [0, 0, 1, 1], [], []>} : vector<16x32xf32>, vector<32x32xf32>, vector<16x32xf32> -> vector<16x32xf32>
    %116 = vector.extract_strided_slice %16 {offsets = [0, 0], sizes = [1, 32], strides = [1, 1]} : vector<1x96xf32> to vector<1x32xf32>
    %117 = vector.broadcast %116 : vector<1x32xf32> to vector<16x32xf32>
    %118 = arith.addf %115, %117 : vector<16x32xf32>
    %119 = vector.extract_strided_slice %14 {offsets = [0, 32], sizes = [32, 32], strides = [1, 1]} : vector<32x96xf32> to vector<32x32xf32>
    %cst_48 = arith.constant dense<0.000000e+00> : vector<32x32xf32>
    %120 = tpu.matmul %8, %119, %cst_48 {dimension_numbers = #tpu.dot_dimension_numbers<[1], [0], [0], [1], [0, 0, 1, 1], [], []>} : vector<32x32xf32>, vector<32x32xf32>, vector<32x32xf32> -> vector<32x32xf32>
    %121 = vector.extract_strided_slice %16 {offsets = [0, 32], sizes = [1, 32], strides = [1, 1]} : vector<1x96xf32> to vector<1x32xf32>
    %122 = vector.broadcast %121 : vector<1x32xf32> to vector<32x32xf32>
    %123 = arith.addf %120, %122 : vector<32x32xf32>
    %124 = vector.extract_strided_slice %14 {offsets = [0, 64], sizes = [32, 32], strides = [1, 1]} : vector<32x96xf32> to vector<32x32xf32>
    %cst_49 = arith.constant dense<0.000000e+00> : vector<32x32xf32>
    %125 = tpu.matmul %5, %124, %cst_49 {dimension_numbers = #tpu.dot_dimension_numbers<[1], [0], [0], [1], [0, 0, 1, 1], [], []>} : vector<32x32xf32>, vector<32x32xf32>, vector<32x32xf32> -> vector<32x32xf32>
    %126 = vector.extract_strided_slice %16 {offsets = [0, 64], sizes = [1, 32], strides = [1, 1]} : vector<1x96xf32> to vector<1x32xf32>
    %127 = vector.broadcast %126 : vector<1x32xf32> to vector<32x32xf32>
    %128 = arith.addf %125, %127 : vector<32x32xf32>
    %c0_50 = arith.constant 0 : index
    %c0_51 = arith.constant 0 : index
    %c0_52 = arith.constant 0 : index
    %129 = vector.load %arg11[%c0_50, %c0_51, %c0_52] : memref<2x32x32xf32, #tpu.memory_space<vmem>>, vector<1x32x32xf32>
    %130 = vector.shape_cast %129 : vector<1x32x32xf32> to vector<32x32xf32>
    %c0_53 = arith.constant 0 : index
    %c0_54 = arith.constant 0 : index
    %c0_55 = arith.constant 0 : index
    %131 = vector.load %arg12[%c0_53, %c0_54, %c0_55] : memref<2x1x32xf32, #tpu.memory_space<vmem>>, vector<1x1x32xf32>
    %132 = vector.shape_cast %131 : vector<1x1x32xf32> to vector<1x32xf32>
    %133 = vector.extract_strided_slice %118 {offsets = [0, 0], sizes = [16, 8], strides = [1, 1]} : vector<16x32xf32> to vector<16x8xf32>
    %134 = vector.shape_cast %133 : vector<16x8xf32> to vector<2x8x8xf32>
    %135 = vector.extract_strided_slice %118 {offsets = [0, 8], sizes = [16, 8], strides = [1, 1]} : vector<16x32xf32> to vector<16x8xf32>
    %136 = vector.shape_cast %135 : vector<16x8xf32> to vector<2x8x8xf32>
    %137 = vector.extract_strided_slice %118 {offsets = [0, 16], sizes = [16, 8], strides = [1, 1]} : vector<16x32xf32> to vector<16x8xf32>
    %138 = vector.shape_cast %137 : vector<16x8xf32> to vector<2x8x8xf32>
    %139 = vector.extract_strided_slice %118 {offsets = [0, 24], sizes = [16, 8], strides = [1, 1]} : vector<16x32xf32> to vector<16x8xf32>
    %140 = vector.shape_cast %139 : vector<16x8xf32> to vector<2x8x8xf32>
    %141 = tpu.concatenate %134, %136, %138, %140 in 0 : vector<2x8x8xf32>, vector<2x8x8xf32>, vector<2x8x8xf32>, vector<2x8x8xf32> -> vector<8x8x8xf32>
    %142 = vector.extract_strided_slice %123 {offsets = [0, 0], sizes = [32, 8], strides = [1, 1]} : vector<32x32xf32> to vector<32x8xf32>
    %143 = vector.shape_cast %142 : vector<32x8xf32> to vector<2x16x8xf32>
    %144 = vector.extract_strided_slice %123 {offsets = [0, 8], sizes = [32, 8], strides = [1, 1]} : vector<32x32xf32> to vector<32x8xf32>
    %145 = vector.shape_cast %144 : vector<32x8xf32> to vector<2x16x8xf32>
    %146 = vector.extract_strided_slice %123 {offsets = [0, 16], sizes = [32, 8], strides = [1, 1]} : vector<32x32xf32> to vector<32x8xf32>
    %147 = vector.shape_cast %146 : vector<32x8xf32> to vector<2x16x8xf32>
    %148 = vector.extract_strided_slice %123 {offsets = [0, 24], sizes = [32, 8], strides = [1, 1]} : vector<32x32xf32> to vector<32x8xf32>
    %149 = vector.shape_cast %148 : vector<32x8xf32> to vector<2x16x8xf32>
    %150 = tpu.concatenate %143, %145, %147, %149 in 0 : vector<2x16x8xf32>, vector<2x16x8xf32>, vector<2x16x8xf32>, vector<2x16x8xf32> -> vector<8x16x8xf32>
    %151 = vector.extract_strided_slice %128 {offsets = [0, 0], sizes = [32, 8], strides = [1, 1]} : vector<32x32xf32> to vector<32x8xf32>
    %152 = vector.shape_cast %151 : vector<32x8xf32> to vector<2x16x8xf32>
    %153 = vector.extract_strided_slice %128 {offsets = [0, 8], sizes = [32, 8], strides = [1, 1]} : vector<32x32xf32> to vector<32x8xf32>
    %154 = vector.shape_cast %153 : vector<32x8xf32> to vector<2x16x8xf32>
    %155 = vector.extract_strided_slice %128 {offsets = [0, 16], sizes = [32, 8], strides = [1, 1]} : vector<32x32xf32> to vector<32x8xf32>
    %156 = vector.shape_cast %155 : vector<32x8xf32> to vector<2x16x8xf32>
    %157 = vector.extract_strided_slice %128 {offsets = [0, 24], sizes = [32, 8], strides = [1, 1]} : vector<32x32xf32> to vector<32x8xf32>
    %158 = vector.shape_cast %157 : vector<32x8xf32> to vector<2x16x8xf32>
    %159 = tpu.concatenate %152, %154, %156, %158 in 0 : vector<2x16x8xf32>, vector<2x16x8xf32>, vector<2x16x8xf32>, vector<2x16x8xf32> -> vector<8x16x8xf32>
    "tpu.trace_start"() <{level = 10 : i32, message = "bqd,bkd->bqk"}> : () -> ()
    %cst_56 = arith.constant dense<0.000000e+00> : vector<8x8x16xf32>
    %160 = tpu.matmul %141, %150, %cst_56 {dimension_numbers = #tpu.dot_dimension_numbers<[2], [2], [1], [1], [0, 0, 0, 1, 1, 1], [0], [0]>} : vector<8x8x8xf32>, vector<8x16x8xf32>, vector<8x8x16xf32> -> vector<8x8x16xf32>
    "tpu.trace_stop"() : () -> ()
    %cst_57 = arith.constant 0.353553385 : f32
    %161 = vector.broadcast %cst_57 : f32 to vector<8x8x16xf32>
    %162 = arith.mulf %160, %161 : vector<8x8x16xf32>
    %cst_58 = arith.constant dense<0xFF800000> : vector<8x8xf32>
    %163 = vector.multi_reduction <maximumf>, %162, %cst_58 [2] : vector<8x8x16xf32> to vector<8x8xf32>
    %164 = vector.shape_cast %163 : vector<8x8xf32> to vector<8x8x1xf32>
    %165 = vector.broadcast %164 : vector<8x8x1xf32> to vector<8x8x16xf32>
    %166 = arith.subf %162, %165 : vector<8x8x16xf32>
    %167 = math.exp %166 : vector<8x8x16xf32>
    %cst_59 = arith.constant dense<0.000000e+00> : vector<8x8xf32>
    %168 = vector.multi_reduction <add>, %167, %cst_59 [2] : vector<8x8x16xf32> to vector<8x8xf32>
    %169 = vector.shape_cast %168 : vector<8x8xf32> to vector<8x8x1xf32>
    %170 = vector.broadcast %169 : vector<8x8x1xf32> to vector<8x8x16xf32>
    %171 = arith.divf %167, %170 : vector<8x8x16xf32>
    "tpu.trace_start"() <{level = 10 : i32, message = "bqk,bkd->bqd"}> : () -> ()
    %cst_60 = arith.constant dense<0.000000e+00> : vector<8x8x8xf32>
    %172 = tpu.matmul %171, %159, %cst_60 {dimension_numbers = #tpu.dot_dimension_numbers<[2], [1], [1], [2], [0, 0, 0, 1, 1, 2], [0], [0]>} : vector<8x8x16xf32>, vector<8x16x8xf32>, vector<8x8x8xf32> -> vector<8x8x8xf32>
    "tpu.trace_stop"() : () -> ()
    %173 = vector.extract_strided_slice %172 {offsets = [0, 0, 0], sizes = [2, 8, 8], strides = [1, 1, 1]} : vector<8x8x8xf32> to vector<2x8x8xf32>
    %174 = vector.shape_cast %173 : vector<2x8x8xf32> to vector<16x8xf32>
    %175 = vector.extract_strided_slice %172 {offsets = [2, 0, 0], sizes = [2, 8, 8], strides = [1, 1, 1]} : vector<8x8x8xf32> to vector<2x8x8xf32>
    %176 = vector.shape_cast %175 : vector<2x8x8xf32> to vector<16x8xf32>
    %177 = vector.extract_strided_slice %172 {offsets = [4, 0, 0], sizes = [2, 8, 8], strides = [1, 1, 1]} : vector<8x8x8xf32> to vector<2x8x8xf32>
    %178 = vector.shape_cast %177 : vector<2x8x8xf32> to vector<16x8xf32>
    %179 = vector.extract_strided_slice %172 {offsets = [6, 0, 0], sizes = [2, 8, 8], strides = [1, 1, 1]} : vector<8x8x8xf32> to vector<2x8x8xf32>
    %180 = vector.shape_cast %179 : vector<2x8x8xf32> to vector<16x8xf32>
    %181 = tpu.concatenate %174, %176, %178, %180 in 1 : vector<16x8xf32>, vector<16x8xf32>, vector<16x8xf32>, vector<16x8xf32> -> vector<16x32xf32>
    %cst_61 = arith.constant dense<0.000000e+00> : vector<16x32xf32>
    %182 = tpu.matmul %181, %130, %cst_61 {dimension_numbers = #tpu.dot_dimension_numbers<[1], [0], [0], [1], [0, 0, 1, 1], [], []>} : vector<16x32xf32>, vector<32x32xf32>, vector<16x32xf32> -> vector<16x32xf32>
    %183 = vector.broadcast %132 : vector<1x32xf32> to vector<16x32xf32>
    %184 = arith.addf %182, %183 : vector<16x32xf32>
    %185 = arith.addf %112, %184 : vector<16x32xf32>
    %c0_62 = arith.constant 0 : index
    %c0_63 = arith.constant 0 : index
    %c0_64 = arith.constant 0 : index
    %186 = vector.load %arg15[%c0_62, %c0_63, %c0_64] : memref<2x1x32xf32, #tpu.memory_space<vmem>>, vector<1x1x32xf32>
    %187 = vector.shape_cast %186 : vector<1x1x32xf32> to vector<1x32xf32>
    %c0_65 = arith.constant 0 : index
    %c0_66 = arith.constant 0 : index
    %c0_67 = arith.constant 0 : index
    %188 = vector.load %arg16[%c0_65, %c0_66, %c0_67] : memref<2x1x32xf32, #tpu.memory_space<vmem>>, vector<1x1x32xf32>
    %189 = vector.shape_cast %188 : vector<1x1x32xf32> to vector<1x32xf32>
    %cst_68 = arith.constant dense<0.000000e+00> : vector<16xf32>
    %190 = vector.multi_reduction <add>, %185, %cst_68 [1] : vector<16x32xf32> to vector<16xf32>
    %191 = vector.shape_cast %190 : vector<16xf32> to vector<16x1xf32>
    %cst_69 = arith.constant 3.200000e+01 : f32
    %192 = vector.broadcast %cst_69 : f32 to vector<16x1xf32>
    %193 = arith.divf %191, %192 : vector<16x1xf32>
    %194 = vector.broadcast %193 : vector<16x1xf32> to vector<16x32xf32>
    %195 = arith.subf %185, %194 : vector<16x32xf32>
    %196 = arith.mulf %195, %195 : vector<16x32xf32>
    %cst_70 = arith.constant dense<0.000000e+00> : vector<16xf32>
    %197 = vector.multi_reduction <add>, %196, %cst_70 [1] : vector<16x32xf32> to vector<16xf32>
    %198 = vector.shape_cast %197 : vector<16xf32> to vector<16x1xf32>
    %cst_71 = arith.constant 3.200000e+01 : f32
    %199 = vector.broadcast %cst_71 : f32 to vector<16x1xf32>
    %200 = arith.divf %198, %199 : vector<16x1xf32>
    %201 = vector.broadcast %193 : vector<16x1xf32> to vector<16x32xf32>
    %202 = arith.subf %185, %201 : vector<16x32xf32>
    %cst_72 = arith.constant 9.99999974E-6 : f32
    %203 = vector.broadcast %cst_72 : f32 to vector<16x1xf32>
    %204 = arith.addf %200, %203 : vector<16x1xf32>
    %205 = math.rsqrt %204 : vector<16x1xf32>
    %206 = vector.broadcast %205 : vector<16x1xf32> to vector<16x32xf32>
    %207 = arith.mulf %202, %206 : vector<16x32xf32>
    %208 = vector.broadcast %187 : vector<1x32xf32> to vector<16x32xf32>
    %209 = arith.mulf %207, %208 : vector<16x32xf32>
    %210 = vector.broadcast %189 : vector<1x32xf32> to vector<16x32xf32>
    %211 = arith.addf %209, %210 : vector<16x32xf32>
    %c0_73 = arith.constant 0 : index
    %c0_74 = arith.constant 0 : index
    %c0_75 = arith.constant 0 : index
    %212 = vector.load %arg19[%c0_73, %c0_74, %c0_75] : memref<2x32x64xf32, #tpu.memory_space<vmem>>, vector<1x32x64xf32>
    %213 = vector.shape_cast %212 : vector<1x32x64xf32> to vector<32x64xf32>
    %cst_76 = arith.constant dense<0.000000e+00> : vector<16x64xf32>
    %214 = tpu.matmul %211, %213, %cst_76 {dimension_numbers = #tpu.dot_dimension_numbers<[1], [0], [0], [1], [0, 0, 1, 1], [], []>} : vector<16x32xf32>, vector<32x64xf32>, vector<16x64xf32> -> vector<16x64xf32>
    %c0_77 = arith.constant 0 : index
    %c0_78 = arith.constant 0 : index
    %c0_79 = arith.constant 0 : index
    %215 = vector.load %arg20[%c0_77, %c0_78, %c0_79] : memref<2x1x64xf32, #tpu.memory_space<vmem>>, vector<1x1x64xf32>
    %216 = vector.shape_cast %215 : vector<1x1x64xf32> to vector<1x64xf32>
    %217 = vector.broadcast %216 : vector<1x64xf32> to vector<16x64xf32>
    %218 = arith.addf %214, %217 : vector<16x64xf32>
    %cst_80 = arith.constant 0.000000e+00 : f32
    %219 = vector.broadcast %cst_80 : f32 to vector<16x64xf32>
    %220 = arith.maximumf %218, %219 : vector<16x64xf32>
    %c0_81 = arith.constant 0 : index
    %c0_82 = arith.constant 0 : index
    %c0_83 = arith.constant 0 : index
    %221 = vector.load %arg21[%c0_81, %c0_82, %c0_83] : memref<2x64x32xf32, #tpu.memory_space<vmem>>, vector<1x64x32xf32>
    %222 = vector.shape_cast %221 : vector<1x64x32xf32> to vector<64x32xf32>
    %cst_84 = arith.constant dense<0.000000e+00> : vector<16x32xf32>
    %223 = tpu.matmul %220, %222, %cst_84 {dimension_numbers = #tpu.dot_dimension_numbers<[1], [0], [0], [1], [0, 0, 1, 1], [], []>} : vector<16x64xf32>, vector<64x32xf32>, vector<16x32xf32> -> vector<16x32xf32>
    %c0_85 = arith.constant 0 : index
    %c0_86 = arith.constant 0 : index
    %c0_87 = arith.constant 0 : index
    %224 = vector.load %arg22[%c0_85, %c0_86, %c0_87] : memref<2x1x32xf32, #tpu.memory_space<vmem>>, vector<1x1x32xf32>
    %225 = vector.shape_cast %224 : vector<1x1x32xf32> to vector<1x32xf32>
    %226 = vector.broadcast %225 : vector<1x32xf32> to vector<16x32xf32>
    %227 = arith.addf %223, %226 : vector<16x32xf32>
    %228 = arith.addf %211, %227 : vector<16x32xf32>
    %c0_88 = arith.constant 0 : index
    %c0_89 = arith.constant 0 : index
    %c0_90 = arith.constant 0 : index
    %229 = vector.load %arg17[%c0_88, %c0_89, %c0_90] : memref<2x1x32xf32, #tpu.memory_space<vmem>>, vector<1x1x32xf32>
    %230 = vector.shape_cast %229 : vector<1x1x32xf32> to vector<1x32xf32>
    %c0_91 = arith.constant 0 : index
    %c0_92 = arith.constant 0 : index
    %c0_93 = arith.constant 0 : index
    %231 = vector.load %arg18[%c0_91, %c0_92, %c0_93] : memref<2x1x32xf32, #tpu.memory_space<vmem>>, vector<1x1x32xf32>
    %232 = vector.shape_cast %231 : vector<1x1x32xf32> to vector<1x32xf32>
    %cst_94 = arith.constant dense<0.000000e+00> : vector<16xf32>
    %233 = vector.multi_reduction <add>, %228, %cst_94 [1] : vector<16x32xf32> to vector<16xf32>
    %234 = vector.shape_cast %233 : vector<16xf32> to vector<16x1xf32>
    %cst_95 = arith.constant 3.200000e+01 : f32
    %235 = vector.broadcast %cst_95 : f32 to vector<16x1xf32>
    %236 = arith.divf %234, %235 : vector<16x1xf32>
    %237 = vector.broadcast %236 : vector<16x1xf32> to vector<16x32xf32>
    %238 = arith.subf %228, %237 : vector<16x32xf32>
    %239 = arith.mulf %238, %238 : vector<16x32xf32>
    %cst_96 = arith.constant dense<0.000000e+00> : vector<16xf32>
    %240 = vector.multi_reduction <add>, %239, %cst_96 [1] : vector<16x32xf32> to vector<16xf32>
    %241 = vector.shape_cast %240 : vector<16xf32> to vector<16x1xf32>
    %cst_97 = arith.constant 3.200000e+01 : f32
    %242 = vector.broadcast %cst_97 : f32 to vector<16x1xf32>
    %243 = arith.divf %241, %242 : vector<16x1xf32>
    %244 = vector.broadcast %236 : vector<16x1xf32> to vector<16x32xf32>
    %245 = arith.subf %228, %244 : vector<16x32xf32>
    %cst_98 = arith.constant 9.99999974E-6 : f32
    %246 = vector.broadcast %cst_98 : f32 to vector<16x1xf32>
    %247 = arith.addf %243, %246 : vector<16x1xf32>
    %248 = math.rsqrt %247 : vector<16x1xf32>
    %249 = vector.broadcast %248 : vector<16x1xf32> to vector<16x32xf32>
    %250 = arith.mulf %245, %249 : vector<16x32xf32>
    %251 = vector.broadcast %230 : vector<1x32xf32> to vector<16x32xf32>
    %252 = arith.mulf %250, %251 : vector<16x32xf32>
    %253 = vector.broadcast %232 : vector<1x32xf32> to vector<16x32xf32>
    %254 = arith.addf %252, %253 : vector<16x32xf32>
    %c0_99 = arith.constant 0 : index
    %c0_100 = arith.constant 0 : index
    %255 = vector.load %arg23[%c0_99, %c0_100] : memref<1x32xf32, #tpu.memory_space<vmem>>, vector<1x32xf32>
    %c0_101 = arith.constant 0 : index
    %c0_102 = arith.constant 0 : index
    %256 = vector.load %arg24[%c0_101, %c0_102] : memref<1x32xf32, #tpu.memory_space<vmem>>, vector<1x32xf32>
    %cst_103 = arith.constant dense<0.000000e+00> : vector<16xf32>
    %257 = vector.multi_reduction <add>, %254, %cst_103 [1] : vector<16x32xf32> to vector<16xf32>
    %258 = vector.shape_cast %257 : vector<16xf32> to vector<16x1xf32>
    %cst_104 = arith.constant 3.200000e+01 : f32
    %259 = vector.broadcast %cst_104 : f32 to vector<16x1xf32>
    %260 = arith.divf %258, %259 : vector<16x1xf32>
    %261 = vector.broadcast %260 : vector<16x1xf32> to vector<16x32xf32>
    %262 = arith.subf %254, %261 : vector<16x32xf32>
    %263 = arith.mulf %262, %262 : vector<16x32xf32>
    %cst_105 = arith.constant dense<0.000000e+00> : vector<16xf32>
    %264 = vector.multi_reduction <add>, %263, %cst_105 [1] : vector<16x32xf32> to vector<16xf32>
    %265 = vector.shape_cast %264 : vector<16xf32> to vector<16x1xf32>
    %cst_106 = arith.constant 3.200000e+01 : f32
    %266 = vector.broadcast %cst_106 : f32 to vector<16x1xf32>
    %267 = arith.divf %265, %266 : vector<16x1xf32>
    %268 = vector.broadcast %260 : vector<16x1xf32> to vector<16x32xf32>
    %269 = arith.subf %254, %268 : vector<16x32xf32>
    %cst_107 = arith.constant 9.99999974E-6 : f32
    %270 = vector.broadcast %cst_107 : f32 to vector<16x1xf32>
    %271 = arith.addf %267, %270 : vector<16x1xf32>
    %272 = math.rsqrt %271 : vector<16x1xf32>
    %273 = vector.broadcast %272 : vector<16x1xf32> to vector<16x32xf32>
    %274 = arith.mulf %269, %273 : vector<16x32xf32>
    %275 = vector.broadcast %255 : vector<1x32xf32> to vector<16x32xf32>
    %276 = arith.mulf %274, %275 : vector<16x32xf32>
    %277 = vector.broadcast %256 : vector<1x32xf32> to vector<16x32xf32>
    %278 = arith.addf %276, %277 : vector<16x32xf32>
    %279 = vector.shape_cast %278 : vector<16x32xf32> to vector<2x8x32xf32>
    %c0_108 = arith.constant 0 : index
    %c0_109 = arith.constant 0 : index
    %c0_110 = arith.constant 0 : index
    %c0_111 = arith.constant 0 : index
    %280 = vector.load %arg25[%c0_108, %c0_109, %c0_110, %c0_111] : memref<2x2x8x32xf32, #tpu.memory_space<vmem>>, vector<1x2x8x32xf32>
    %281 = vector.shape_cast %280 : vector<1x2x8x32xf32> to vector<2x8x32xf32>
    %282 = vector.shape_cast %279 : vector<2x8x32xf32> to vector<1x2x8x32xf32>
    tpu.vector_store %arg25[%c0_108, %c0_109, %c0_110, %c0_111], %282 {strides = array<i32>} : memref<2x2x8x32xf32, #tpu.memory_space<vmem>>, vector<1x2x8x32xf32>,
    %c1 = arith.constant 1 : index
    %c0_112 = arith.constant 0 : index
    %c0_113 = arith.constant 0 : index
    %283 = vector.load %arg5[%c1, %c0_112, %c0_113] : memref<2x32x96xf32, #tpu.memory_space<vmem>>, vector<1x32x96xf32>
    %284 = vector.shape_cast %283 : vector<1x32x96xf32> to vector<32x96xf32>
    %c1_114 = arith.constant 1 : index
    %c0_115 = arith.constant 0 : index
    %c0_116 = arith.constant 0 : index
    %285 = vector.load %arg6[%c1_114, %c0_115, %c0_116] : memref<2x1x96xf32, #tpu.memory_space<vmem>>, vector<1x1x96xf32>
    %286 = vector.shape_cast %285 : vector<1x1x96xf32> to vector<1x96xf32>
    %c1_117 = arith.constant 1 : index
    %c0_118 = arith.constant 0 : index
    %c0_119 = arith.constant 0 : index
    %287 = vector.load %arg9[%c1_117, %c0_118, %c0_119] : memref<2x32x96xf32, #tpu.memory_space<vmem>>, vector<1x32x96xf32>
    %288 = vector.shape_cast %287 : vector<1x32x96xf32> to vector<32x96xf32>
    %c1_120 = arith.constant 1 : index
    %c0_121 = arith.constant 0 : index
    %c0_122 = arith.constant 0 : index
    %289 = vector.load %arg10[%c1_120, %c0_121, %c0_122] : memref<2x1x96xf32, #tpu.memory_space<vmem>>, vector<1x1x96xf32>
    %290 = vector.shape_cast %289 : vector<1x1x96xf32> to vector<1x96xf32>
    %291 = arith.addf %254, %3 : vector<16x32xf32>
    %292 = vector.extract_strided_slice %284 {offsets = [0, 0], sizes = [32, 64], strides = [1, 1]} : vector<32x96xf32> to vector<32x64xf32>
    %cst_123 = arith.constant dense<0.000000e+00> : vector<16x64xf32>
    %293 = tpu.matmul %291, %292, %cst_123 {dimension_numbers = #tpu.dot_dimension_numbers<[1], [0], [0], [1], [0, 0, 1, 1], [], []>} : vector<16x32xf32>, vector<32x64xf32>, vector<16x64xf32> -> vector<16x64xf32>
    %294 = vector.extract_strided_slice %286 {offsets = [0, 0], sizes = [1, 64], strides = [1, 1]} : vector<1x96xf32> to vector<1x64xf32>
    %295 = vector.broadcast %294 : vector<1x64xf32> to vector<16x64xf32>
    %296 = arith.addf %293, %295 : vector<16x64xf32>
    %297 = vector.extract_strided_slice %284 {offsets = [0, 64], sizes = [32, 32], strides = [1, 1]} : vector<32x96xf32> to vector<32x32xf32>
    %cst_124 = arith.constant dense<0.000000e+00> : vector<16x32xf32>
    %298 = tpu.matmul %254, %297, %cst_124 {dimension_numbers = #tpu.dot_dimension_numbers<[1], [0], [0], [1], [0, 0, 1, 1], [], []>} : vector<16x32xf32>, vector<32x32xf32>, vector<16x32xf32> -> vector<16x32xf32>
    %299 = vector.extract_strided_slice %286 {offsets = [0, 64], sizes = [1, 32], strides = [1, 1]} : vector<1x96xf32> to vector<1x32xf32>
    %300 = vector.broadcast %299 : vector<1x32xf32> to vector<16x32xf32>
    %301 = arith.addf %298, %300 : vector<16x32xf32>
    %302 = vector.extract_strided_slice %296 {offsets = [0, 0], sizes = [16, 32], strides = [1, 1]} : vector<16x64xf32> to vector<16x32xf32>
    %303 = vector.extract_strided_slice %296 {offsets = [0, 32], sizes = [16, 32], strides = [1, 1]} : vector<16x64xf32> to vector<16x32xf32>
    %c1_125 = arith.constant 1 : index
    %c0_126 = arith.constant 0 : index
    %c0_127 = arith.constant 0 : index
    %304 = vector.load %arg7[%c1_125, %c0_126, %c0_127] : memref<2x32x32xf32, #tpu.memory_space<vmem>>, vector<1x32x32xf32>
    %305 = vector.shape_cast %304 : vector<1x32x32xf32> to vector<32x32xf32>
    %c1_128 = arith.constant 1 : index
    %c0_129 = arith.constant 0 : index
    %c0_130 = arith.constant 0 : index
    %306 = vector.load %arg8[%c1_128, %c0_129, %c0_130] : memref<2x1x32xf32, #tpu.memory_space<vmem>>, vector<1x1x32xf32>
    %307 = vector.shape_cast %306 : vector<1x1x32xf32> to vector<1x32xf32>
    %308 = vector.extract_strided_slice %302 {offsets = [0, 0], sizes = [16, 8], strides = [1, 1]} : vector<16x32xf32> to vector<16x8xf32>
    %309 = vector.shape_cast %308 : vector<16x8xf32> to vector<2x8x8xf32>
    %310 = vector.extract_strided_slice %302 {offsets = [0, 8], sizes = [16, 8], strides = [1, 1]} : vector<16x32xf32> to vector<16x8xf32>
    %311 = vector.shape_cast %310 : vector<16x8xf32> to vector<2x8x8xf32>
    %312 = vector.extract_strided_slice %302 {offsets = [0, 16], sizes = [16, 8], strides = [1, 1]} : vector<16x32xf32> to vector<16x8xf32>
    %313 = vector.shape_cast %312 : vector<16x8xf32> to vector<2x8x8xf32>
    %314 = vector.extract_strided_slice %302 {offsets = [0, 24], sizes = [16, 8], strides = [1, 1]} : vector<16x32xf32> to vector<16x8xf32>
    %315 = vector.shape_cast %314 : vector<16x8xf32> to vector<2x8x8xf32>
    %316 = tpu.concatenate %309, %311, %313, %315 in 0 : vector<2x8x8xf32>, vector<2x8x8xf32>, vector<2x8x8xf32>, vector<2x8x8xf32> -> vector<8x8x8xf32>
    %317 = vector.extract_strided_slice %303 {offsets = [0, 0], sizes = [16, 8], strides = [1, 1]} : vector<16x32xf32> to vector<16x8xf32>
    %318 = vector.shape_cast %317 : vector<16x8xf32> to vector<2x8x8xf32>
    %319 = vector.extract_strided_slice %303 {offsets = [0, 8], sizes = [16, 8], strides = [1, 1]} : vector<16x32xf32> to vector<16x8xf32>
    %320 = vector.shape_cast %319 : vector<16x8xf32> to vector<2x8x8xf32>
    %321 = vector.extract_strided_slice %303 {offsets = [0, 16], sizes = [16, 8], strides = [1, 1]} : vector<16x32xf32> to vector<16x8xf32>
    %322 = vector.shape_cast %321 : vector<16x8xf32> to vector<2x8x8xf32>
    %323 = vector.extract_strided_slice %303 {offsets = [0, 24], sizes = [16, 8], strides = [1, 1]} : vector<16x32xf32> to vector<16x8xf32>
    %324 = vector.shape_cast %323 : vector<16x8xf32> to vector<2x8x8xf32>
    %325 = tpu.concatenate %318, %320, %322, %324 in 0 : vector<2x8x8xf32>, vector<2x8x8xf32>, vector<2x8x8xf32>, vector<2x8x8xf32> -> vector<8x8x8xf32>
    %326 = vector.extract_strided_slice %301 {offsets = [0, 0], sizes = [16, 8], strides = [1, 1]} : vector<16x32xf32> to vector<16x8xf32>
    %327 = vector.shape_cast %326 : vector<16x8xf32> to vector<2x8x8xf32>
    %328 = vector.extract_strided_slice %301 {offsets = [0, 8], sizes = [16, 8], strides = [1, 1]} : vector<16x32xf32> to vector<16x8xf32>
    %329 = vector.shape_cast %328 : vector<16x8xf32> to vector<2x8x8xf32>
    %330 = vector.extract_strided_slice %301 {offsets = [0, 16], sizes = [16, 8], strides = [1, 1]} : vector<16x32xf32> to vector<16x8xf32>
    %331 = vector.shape_cast %330 : vector<16x8xf32> to vector<2x8x8xf32>
    %332 = vector.extract_strided_slice %301 {offsets = [0, 24], sizes = [16, 8], strides = [1, 1]} : vector<16x32xf32> to vector<16x8xf32>
    %333 = vector.shape_cast %332 : vector<16x8xf32> to vector<2x8x8xf32>
    %334 = tpu.concatenate %327, %329, %331, %333 in 0 : vector<2x8x8xf32>, vector<2x8x8xf32>, vector<2x8x8xf32>, vector<2x8x8xf32> -> vector<8x8x8xf32>
    "tpu.trace_start"() <{level = 10 : i32, message = "bqd,bkd->bqk"}> : () -> ()
    %cst_131 = arith.constant dense<0.000000e+00> : vector<8x8x8xf32>
    %335 = tpu.matmul %316, %325, %cst_131 {dimension_numbers = #tpu.dot_dimension_numbers<[2], [2], [1], [1], [0, 0, 0, 1, 1, 1], [0], [0]>} : vector<8x8x8xf32>, vector<8x8x8xf32>, vector<8x8x8xf32> -> vector<8x8x8xf32>
    "tpu.trace_stop"() : () -> ()
    %cst_132 = arith.constant 0.353553385 : f32
    %336 = vector.broadcast %cst_132 : f32 to vector<8x8x8xf32>
    %337 = arith.mulf %335, %336 : vector<8x8x8xf32>
    %cst_133 = arith.constant dense<0xFF800000> : vector<8x8xf32>
    %338 = vector.multi_reduction <maximumf>, %337, %cst_133 [2] : vector<8x8x8xf32> to vector<8x8xf32>
    %339 = vector.shape_cast %338 : vector<8x8xf32> to vector<8x8x1xf32>
    %340 = vector.broadcast %339 : vector<8x8x1xf32> to vector<8x8x8xf32>
    %341 = arith.subf %337, %340 : vector<8x8x8xf32>
    %342 = math.exp %341 : vector<8x8x8xf32>
    %cst_134 = arith.constant dense<0.000000e+00> : vector<8x8xf32>
    %343 = vector.multi_reduction <add>, %342, %cst_134 [2] : vector<8x8x8xf32> to vector<8x8xf32>
    %344 = vector.shape_cast %343 : vector<8x8xf32> to vector<8x8x1xf32>
    %345 = vector.broadcast %344 : vector<8x8x1xf32> to vector<8x8x8xf32>
    %346 = arith.divf %342, %345 : vector<8x8x8xf32>
    "tpu.trace_start"() <{level = 10 : i32, message = "bqk,bkd->bqd"}> : () -> ()
    %cst_135 = arith.constant dense<0.000000e+00> : vector<8x8x8xf32>
    %347 = tpu.matmul %346, %334, %cst_135 {dimension_numbers = #tpu.dot_dimension_numbers<[2], [1], [1], [2], [0, 0, 0, 1, 1, 2], [0], [0]>} : vector<8x8x8xf32>, vector<8x8x8xf32>, vector<8x8x8xf32> -> vector<8x8x8xf32>
    "tpu.trace_stop"() : () -> ()
    %348 = vector.extract_strided_slice %347 {offsets = [0, 0, 0], sizes = [2, 8, 8], strides = [1, 1, 1]} : vector<8x8x8xf32> to vector<2x8x8xf32>
    %349 = vector.shape_cast %348 : vector<2x8x8xf32> to vector<16x8xf32>
    %350 = vector.extract_strided_slice %347 {offsets = [2, 0, 0], sizes = [2, 8, 8], strides = [1, 1, 1]} : vector<8x8x8xf32> to vector<2x8x8xf32>
    %351 = vector.shape_cast %350 : vector<2x8x8xf32> to vector<16x8xf32>
    %352 = vector.extract_strided_slice %347 {offsets = [4, 0, 0], sizes = [2, 8, 8], strides = [1, 1, 1]} : vector<8x8x8xf32> to vector<2x8x8xf32>
    %353 = vector.shape_cast %352 : vector<2x8x8xf32> to vector<16x8xf32>
    %354 = vector.extract_strided_slice %347 {offsets = [6, 0, 0], sizes = [2, 8, 8], strides = [1, 1, 1]} : vector<8x8x8xf32> to vector<2x8x8xf32>
    %355 = vector.shape_cast %354 : vector<2x8x8xf32> to vector<16x8xf32>
    %356 = tpu.concatenate %349, %351, %353, %355 in 1 : vector<16x8xf32>, vector<16x8xf32>, vector<16x8xf32>, vector<16x8xf32> -> vector<16x32xf32>
    %cst_136 = arith.constant dense<0.000000e+00> : vector<16x32xf32>
    %357 = tpu.matmul %356, %305, %cst_136 {dimension_numbers = #tpu.dot_dimension_numbers<[1], [0], [0], [1], [0, 0, 1, 1], [], []>} : vector<16x32xf32>, vector<32x32xf32>, vector<16x32xf32> -> vector<16x32xf32>
    %358 = vector.broadcast %307 : vector<1x32xf32> to vector<16x32xf32>
    %359 = arith.addf %357, %358 : vector<16x32xf32>
    %360 = arith.addf %254, %359 : vector<16x32xf32>
    %c1_137 = arith.constant 1 : index
    %c0_138 = arith.constant 0 : index
    %c0_139 = arith.constant 0 : index
    %361 = vector.load %arg13[%c1_137, %c0_138, %c0_139] : memref<2x1x32xf32, #tpu.memory_space<vmem>>, vector<1x1x32xf32>
    %362 = vector.shape_cast %361 : vector<1x1x32xf32> to vector<1x32xf32>
    %c1_140 = arith.constant 1 : index
    %c0_141 = arith.constant 0 : index
    %c0_142 = arith.constant 0 : index
    %363 = vector.load %arg14[%c1_140, %c0_141, %c0_142] : memref<2x1x32xf32, #tpu.memory_space<vmem>>, vector<1x1x32xf32>
    %364 = vector.shape_cast %363 : vector<1x1x32xf32> to vector<1x32xf32>
    %cst_143 = arith.constant dense<0.000000e+00> : vector<16xf32>
    %365 = vector.multi_reduction <add>, %360, %cst_143 [1] : vector<16x32xf32> to vector<16xf32>
    %366 = vector.shape_cast %365 : vector<16xf32> to vector<16x1xf32>
    %cst_144 = arith.constant 3.200000e+01 : f32
    %367 = vector.broadcast %cst_144 : f32 to vector<16x1xf32>
    %368 = arith.divf %366, %367 : vector<16x1xf32>
    %369 = vector.broadcast %368 : vector<16x1xf32> to vector<16x32xf32>
    %370 = arith.subf %360, %369 : vector<16x32xf32>
    %371 = arith.mulf %370, %370 : vector<16x32xf32>
    %cst_145 = arith.constant dense<0.000000e+00> : vector<16xf32>
    %372 = vector.multi_reduction <add>, %371, %cst_145 [1] : vector<16x32xf32> to vector<16xf32>
    %373 = vector.shape_cast %372 : vector<16xf32> to vector<16x1xf32>
    %cst_146 = arith.constant 3.200000e+01 : f32
    %374 = vector.broadcast %cst_146 : f32 to vector<16x1xf32>
    %375 = arith.divf %373, %374 : vector<16x1xf32>
    %376 = vector.broadcast %368 : vector<16x1xf32> to vector<16x32xf32>
    %377 = arith.subf %360, %376 : vector<16x32xf32>
    %cst_147 = arith.constant 9.99999974E-6 : f32
    %378 = vector.broadcast %cst_147 : f32 to vector<16x1xf32>
    %379 = arith.addf %375, %378 : vector<16x1xf32>
    %380 = math.rsqrt %379 : vector<16x1xf32>
    %381 = vector.broadcast %380 : vector<16x1xf32> to vector<16x32xf32>
    %382 = arith.mulf %377, %381 : vector<16x32xf32>
    %383 = vector.broadcast %362 : vector<1x32xf32> to vector<16x32xf32>
    %384 = arith.mulf %382, %383 : vector<16x32xf32>
    %385 = vector.broadcast %364 : vector<1x32xf32> to vector<16x32xf32>
    %386 = arith.addf %384, %385 : vector<16x32xf32>
    %387 = arith.addf %386, %3 : vector<16x32xf32>
    %388 = vector.extract_strided_slice %288 {offsets = [0, 0], sizes = [32, 32], strides = [1, 1]} : vector<32x96xf32> to vector<32x32xf32>
    %cst_148 = arith.constant dense<0.000000e+00> : vector<16x32xf32>
    %389 = tpu.matmul %387, %388, %cst_148 {dimension_numbers = #tpu.dot_dimension_numbers<[1], [0], [0], [1], [0, 0, 1, 1], [], []>} : vector<16x32xf32>, vector<32x32xf32>, vector<16x32xf32> -> vector<16x32xf32>
    %390 = vector.extract_strided_slice %290 {offsets = [0, 0], sizes = [1, 32], strides = [1, 1]} : vector<1x96xf32> to vector<1x32xf32>
    %391 = vector.broadcast %390 : vector<1x32xf32> to vector<16x32xf32>
    %392 = arith.addf %389, %391 : vector<16x32xf32>
    %393 = vector.extract_strided_slice %288 {offsets = [0, 32], sizes = [32, 32], strides = [1, 1]} : vector<32x96xf32> to vector<32x32xf32>
    %cst_149 = arith.constant dense<0.000000e+00> : vector<32x32xf32>
    %394 = tpu.matmul %8, %393, %cst_149 {dimension_numbers = #tpu.dot_dimension_numbers<[1], [0], [0], [1], [0, 0, 1, 1], [], []>} : vector<32x32xf32>, vector<32x32xf32>, vector<32x32xf32> -> vector<32x32xf32>
    %395 = vector.extract_strided_slice %290 {offsets = [0, 32], sizes = [1, 32], strides = [1, 1]} : vector<1x96xf32> to vector<1x32xf32>
    %396 = vector.broadcast %395 : vector<1x32xf32> to vector<32x32xf32>
    %397 = arith.addf %394, %396 : vector<32x32xf32>
    %398 = vector.extract_strided_slice %288 {offsets = [0, 64], sizes = [32, 32], strides = [1, 1]} : vector<32x96xf32> to vector<32x32xf32>
    %cst_150 = arith.constant dense<0.000000e+00> : vector<32x32xf32>
    %399 = tpu.matmul %5, %398, %cst_150 {dimension_numbers = #tpu.dot_dimension_numbers<[1], [0], [0], [1], [0, 0, 1, 1], [], []>} : vector<32x32xf32>, vector<32x32xf32>, vector<32x32xf32> -> vector<32x32xf32>
    %400 = vector.extract_strided_slice %290 {offsets = [0, 64], sizes = [1, 32], strides = [1, 1]} : vector<1x96xf32> to vector<1x32xf32>
    %401 = vector.broadcast %400 : vector<1x32xf32> to vector<32x32xf32>
    %402 = arith.addf %399, %401 : vector<32x32xf32>
    %c1_151 = arith.constant 1 : index
    %c0_152 = arith.constant 0 : index
    %c0_153 = arith.constant 0 : index
    %403 = vector.load %arg11[%c1_151, %c0_152, %c0_153] : memref<2x32x32xf32, #tpu.memory_space<vmem>>, vector<1x32x32xf32>
    %404 = vector.shape_cast %403 : vector<1x32x32xf32> to vector<32x32xf32>
    %c1_154 = arith.constant 1 : index
    %c0_155 = arith.constant 0 : index
    %c0_156 = arith.constant 0 : index
    %405 = vector.load %arg12[%c1_154, %c0_155, %c0_156] : memref<2x1x32xf32, #tpu.memory_space<vmem>>, vector<1x1x32xf32>
    %406 = vector.shape_cast %405 : vector<1x1x32xf32> to vector<1x32xf32>
    %407 = vector.extract_strided_slice %392 {offsets = [0, 0], sizes = [16, 8], strides = [1, 1]} : vector<16x32xf32> to vector<16x8xf32>
    %408 = vector.shape_cast %407 : vector<16x8xf32> to vector<2x8x8xf32>
    %409 = vector.extract_strided_slice %392 {offsets = [0, 8], sizes = [16, 8], strides = [1, 1]} : vector<16x32xf32> to vector<16x8xf32>
    %410 = vector.shape_cast %409 : vector<16x8xf32> to vector<2x8x8xf32>
    %411 = vector.extract_strided_slice %392 {offsets = [0, 16], sizes = [16, 8], strides = [1, 1]} : vector<16x32xf32> to vector<16x8xf32>
    %412 = vector.shape_cast %411 : vector<16x8xf32> to vector<2x8x8xf32>
    %413 = vector.extract_strided_slice %392 {offsets = [0, 24], sizes = [16, 8], strides = [1, 1]} : vector<16x32xf32> to vector<16x8xf32>
    %414 = vector.shape_cast %413 : vector<16x8xf32> to vector<2x8x8xf32>
    %415 = tpu.concatenate %408, %410, %412, %414 in 0 : vector<2x8x8xf32>, vector<2x8x8xf32>, vector<2x8x8xf32>, vector<2x8x8xf32> -> vector<8x8x8xf32>
    %416 = vector.extract_strided_slice %397 {offsets = [0, 0], sizes = [32, 8], strides = [1, 1]} : vector<32x32xf32> to vector<32x8xf32>
    %417 = vector.shape_cast %416 : vector<32x8xf32> to vector<2x16x8xf32>
    %418 = vector.extract_strided_slice %397 {offsets = [0, 8], sizes = [32, 8], strides = [1, 1]} : vector<32x32xf32> to vector<32x8xf32>
    %419 = vector.shape_cast %418 : vector<32x8xf32> to vector<2x16x8xf32>
    %420 = vector.extract_strided_slice %397 {offsets = [0, 16], sizes = [32, 8], strides = [1, 1]} : vector<32x32xf32> to vector<32x8xf32>
    %421 = vector.shape_cast %420 : vector<32x8xf32> to vector<2x16x8xf32>
    %422 = vector.extract_strided_slice %397 {offsets = [0, 24], sizes = [32, 8], strides = [1, 1]} : vector<32x32xf32> to vector<32x8xf32>
    %423 = vector.shape_cast %422 : vector<32x8xf32> to vector<2x16x8xf32>
    %424 = tpu.concatenate %417, %419, %421, %423 in 0 : vector<2x16x8xf32>, vector<2x16x8xf32>, vector<2x16x8xf32>, vector<2x16x8xf32> -> vector<8x16x8xf32>
    %425 = vector.extract_strided_slice %402 {offsets = [0, 0], sizes = [32, 8], strides = [1, 1]} : vector<32x32xf32> to vector<32x8xf32>
    %426 = vector.shape_cast %425 : vector<32x8xf32> to vector<2x16x8xf32>
    %427 = vector.extract_strided_slice %402 {offsets = [0, 8], sizes = [32, 8], strides = [1, 1]} : vector<32x32xf32> to vector<32x8xf32>
    %428 = vector.shape_cast %427 : vector<32x8xf32> to vector<2x16x8xf32>
    %429 = vector.extract_strided_slice %402 {offsets = [0, 16], sizes = [32, 8], strides = [1, 1]} : vector<32x32xf32> to vector<32x8xf32>
    %430 = vector.shape_cast %429 : vector<32x8xf32> to vector<2x16x8xf32>
    %431 = vector.extract_strided_slice %402 {offsets = [0, 24], sizes = [32, 8], strides = [1, 1]} : vector<32x32xf32> to vector<32x8xf32>
    %432 = vector.shape_cast %431 : vector<32x8xf32> to vector<2x16x8xf32>
    %433 = tpu.concatenate %426, %428, %430, %432 in 0 : vector<2x16x8xf32>, vector<2x16x8xf32>, vector<2x16x8xf32>, vector<2x16x8xf32> -> vector<8x16x8xf32>
    "tpu.trace_start"() <{level = 10 : i32, message = "bqd,bkd->bqk"}> : () -> ()
    %cst_157 = arith.constant dense<0.000000e+00> : vector<8x8x16xf32>
    %434 = tpu.matmul %415, %424, %cst_157 {dimension_numbers = #tpu.dot_dimension_numbers<[2], [2], [1], [1], [0, 0, 0, 1, 1, 1], [0], [0]>} : vector<8x8x8xf32>, vector<8x16x8xf32>, vector<8x8x16xf32> -> vector<8x8x16xf32>
    "tpu.trace_stop"() : () -> ()
    %cst_158 = arith.constant 0.353553385 : f32
    %435 = vector.broadcast %cst_158 : f32 to vector<8x8x16xf32>
    %436 = arith.mulf %434, %435 : vector<8x8x16xf32>
    %cst_159 = arith.constant dense<0xFF800000> : vector<8x8xf32>
    %437 = vector.multi_reduction <maximumf>, %436, %cst_159 [2] : vector<8x8x16xf32> to vector<8x8xf32>
    %438 = vector.shape_cast %437 : vector<8x8xf32> to vector<8x8x1xf32>
    %439 = vector.broadcast %438 : vector<8x8x1xf32> to vector<8x8x16xf32>
    %440 = arith.subf %436, %439 : vector<8x8x16xf32>
    %441 = math.exp %440 : vector<8x8x16xf32>
    %cst_160 = arith.constant dense<0.000000e+00> : vector<8x8xf32>
    %442 = vector.multi_reduction <add>, %441, %cst_160 [2] : vector<8x8x16xf32> to vector<8x8xf32>
    %443 = vector.shape_cast %442 : vector<8x8xf32> to vector<8x8x1xf32>
    %444 = vector.broadcast %443 : vector<8x8x1xf32> to vector<8x8x16xf32>
    %445 = arith.divf %441, %444 : vector<8x8x16xf32>
    "tpu.trace_start"() <{level = 10 : i32, message = "bqk,bkd->bqd"}> : () -> ()
    %cst_161 = arith.constant dense<0.000000e+00> : vector<8x8x8xf32>
    %446 = tpu.matmul %445, %433, %cst_161 {dimension_numbers = #tpu.dot_dimension_numbers<[2], [1], [1], [2], [0, 0, 0, 1, 1, 2], [0], [0]>} : vector<8x8x16xf32>, vector<8x16x8xf32>, vector<8x8x8xf32> -> vector<8x8x8xf32>
    "tpu.trace_stop"() : () -> ()
    %447 = vector.extract_strided_slice %446 {offsets = [0, 0, 0], sizes = [2, 8, 8], strides = [1, 1, 1]} : vector<8x8x8xf32> to vector<2x8x8xf32>
    %448 = vector.shape_cast %447 : vector<2x8x8xf32> to vector<16x8xf32>
    %449 = vector.extract_strided_slice %446 {offsets = [2, 0, 0], sizes = [2, 8, 8], strides = [1, 1, 1]} : vector<8x8x8xf32> to vector<2x8x8xf32>
    %450 = vector.shape_cast %449 : vector<2x8x8xf32> to vector<16x8xf32>
    %451 = vector.extract_strided_slice %446 {offsets = [4, 0, 0], sizes = [2, 8, 8], strides = [1, 1, 1]} : vector<8x8x8xf32> to vector<2x8x8xf32>
    %452 = vector.shape_cast %451 : vector<2x8x8xf32> to vector<16x8xf32>
    %453 = vector.extract_strided_slice %446 {offsets = [6, 0, 0], sizes = [2, 8, 8], strides = [1, 1, 1]} : vector<8x8x8xf32> to vector<2x8x8xf32>
    %454 = vector.shape_cast %453 : vector<2x8x8xf32> to vector<16x8xf32>
    %455 = tpu.concatenate %448, %450, %452, %454 in 1 : vector<16x8xf32>, vector<16x8xf32>, vector<16x8xf32>, vector<16x8xf32> -> vector<16x32xf32>
    %cst_162 = arith.constant dense<0.000000e+00> : vector<16x32xf32>
    %456 = tpu.matmul %455, %404, %cst_162 {dimension_numbers = #tpu.dot_dimension_numbers<[1], [0], [0], [1], [0, 0, 1, 1], [], []>} : vector<16x32xf32>, vector<32x32xf32>, vector<16x32xf32> -> vector<16x32xf32>
    %457 = vector.broadcast %406 : vector<1x32xf32> to vector<16x32xf32>
    %458 = arith.addf %456, %457 : vector<16x32xf32>
    %459 = arith.addf %386, %458 : vector<16x32xf32>
    %c1_163 = arith.constant 1 : index
    %c0_164 = arith.constant 0 : index
    %c0_165 = arith.constant 0 : index
    %460 = vector.load %arg15[%c1_163, %c0_164, %c0_165] : memref<2x1x32xf32, #tpu.memory_space<vmem>>, vector<1x1x32xf32>
    %461 = vector.shape_cast %460 : vector<1x1x32xf32> to vector<1x32xf32>
    %c1_166 = arith.constant 1 : index
    %c0_167 = arith.constant 0 : index
    %c0_168 = arith.constant 0 : index
    %462 = vector.load %arg16[%c1_166, %c0_167, %c0_168] : memref<2x1x32xf32, #tpu.memory_space<vmem>>, vector<1x1x32xf32>
    %463 = vector.shape_cast %462 : vector<1x1x32xf32> to vector<1x32xf32>
    %cst_169 = arith.constant dense<0.000000e+00> : vector<16xf32>
    %464 = vector.multi_reduction <add>, %459, %cst_169 [1] : vector<16x32xf32> to vector<16xf32>
    %465 = vector.shape_cast %464 : vector<16xf32> to vector<16x1xf32>
    %cst_170 = arith.constant 3.200000e+01 : f32
    %466 = vector.broadcast %cst_170 : f32 to vector<16x1xf32>
    %467 = arith.divf %465, %466 : vector<16x1xf32>
    %468 = vector.broadcast %467 : vector<16x1xf32> to vector<16x32xf32>
    %469 = arith.subf %459, %468 : vector<16x32xf32>
    %470 = arith.mulf %469, %469 : vector<16x32xf32>
    %cst_171 = arith.constant dense<0.000000e+00> : vector<16xf32>
    %471 = vector.multi_reduction <add>, %470, %cst_171 [1] : vector<16x32xf32> to vector<16xf32>
    %472 = vector.shape_cast %471 : vector<16xf32> to vector<16x1xf32>
    %cst_172 = arith.constant 3.200000e+01 : f32
    %473 = vector.broadcast %cst_172 : f32 to vector<16x1xf32>
    %474 = arith.divf %472, %473 : vector<16x1xf32>
    %475 = vector.broadcast %467 : vector<16x1xf32> to vector<16x32xf32>
    %476 = arith.subf %459, %475 : vector<16x32xf32>
    %cst_173 = arith.constant 9.99999974E-6 : f32
    %477 = vector.broadcast %cst_173 : f32 to vector<16x1xf32>
    %478 = arith.addf %474, %477 : vector<16x1xf32>
    %479 = math.rsqrt %478 : vector<16x1xf32>
    %480 = vector.broadcast %479 : vector<16x1xf32> to vector<16x32xf32>
    %481 = arith.mulf %476, %480 : vector<16x32xf32>
    %482 = vector.broadcast %461 : vector<1x32xf32> to vector<16x32xf32>
    %483 = arith.mulf %481, %482 : vector<16x32xf32>
    %484 = vector.broadcast %463 : vector<1x32xf32> to vector<16x32xf32>
    %485 = arith.addf %483, %484 : vector<16x32xf32>
    %c1_174 = arith.constant 1 : index
    %c0_175 = arith.constant 0 : index
    %c0_176 = arith.constant 0 : index
    %486 = vector.load %arg19[%c1_174, %c0_175, %c0_176] : memref<2x32x64xf32, #tpu.memory_space<vmem>>, vector<1x32x64xf32>
    %487 = vector.shape_cast %486 : vector<1x32x64xf32> to vector<32x64xf32>
    %cst_177 = arith.constant dense<0.000000e+00> : vector<16x64xf32>
    %488 = tpu.matmul %485, %487, %cst_177 {dimension_numbers = #tpu.dot_dimension_numbers<[1], [0], [0], [1], [0, 0, 1, 1], [], []>} : vector<16x32xf32>, vector<32x64xf32>, vector<16x64xf32> -> vector<16x64xf32>
    %c1_178 = arith.constant 1 : index
    %c0_179 = arith.constant 0 : index
    %c0_180 = arith.constant 0 : index
    %489 = vector.load %arg20[%c1_178, %c0_179, %c0_180] : memref<2x1x64xf32, #tpu.memory_space<vmem>>, vector<1x1x64xf32>
    %490 = vector.shape_cast %489 : vector<1x1x64xf32> to vector<1x64xf32>
    %491 = vector.broadcast %490 : vector<1x64xf32> to vector<16x64xf32>
    %492 = arith.addf %488, %491 : vector<16x64xf32>
    %cst_181 = arith.constant 0.000000e+00 : f32
    %493 = vector.broadcast %cst_181 : f32 to vector<16x64xf32>
    %494 = arith.maximumf %492, %493 : vector<16x64xf32>
    %c1_182 = arith.constant 1 : index
    %c0_183 = arith.constant 0 : index
    %c0_184 = arith.constant 0 : index
    %495 = vector.load %arg21[%c1_182, %c0_183, %c0_184] : memref<2x64x32xf32, #tpu.memory_space<vmem>>, vector<1x64x32xf32>
    %496 = vector.shape_cast %495 : vector<1x64x32xf32> to vector<64x32xf32>
    %cst_185 = arith.constant dense<0.000000e+00> : vector<16x32xf32>
    %497 = tpu.matmul %494, %496, %cst_185 {dimension_numbers = #tpu.dot_dimension_numbers<[1], [0], [0], [1], [0, 0, 1, 1], [], []>} : vector<16x64xf32>, vector<64x32xf32>, vector<16x32xf32> -> vector<16x32xf32>
    %c1_186 = arith.constant 1 : index
    %c0_187 = arith.constant 0 : index
    %c0_188 = arith.constant 0 : index
    %498 = vector.load %arg22[%c1_186, %c0_187, %c0_188] : memref<2x1x32xf32, #tpu.memory_space<vmem>>, vector<1x1x32xf32>
    %499 = vector.shape_cast %498 : vector<1x1x32xf32> to vector<1x32xf32>
    %500 = vector.broadcast %499 : vector<1x32xf32> to vector<16x32xf32>
    %501 = arith.addf %497, %500 : vector<16x32xf32>
    %502 = arith.addf %485, %501 : vector<16x32xf32>
    %c1_189 = arith.constant 1 : index
    %c0_190 = arith.constant 0 : index
    %c0_191 = arith.constant 0 : index
    %503 = vector.load %arg17[%c1_189, %c0_190, %c0_191] : memref<2x1x32xf32, #tpu.memory_space<vmem>>, vector<1x1x32xf32>
    %504 = vector.shape_cast %503 : vector<1x1x32xf32> to vector<1x32xf32>
    %c1_192 = arith.constant 1 : index
    %c0_193 = arith.constant 0 : index
    %c0_194 = arith.constant 0 : index
    %505 = vector.load %arg18[%c1_192, %c0_193, %c0_194] : memref<2x1x32xf32, #tpu.memory_space<vmem>>, vector<1x1x32xf32>
    %506 = vector.shape_cast %505 : vector<1x1x32xf32> to vector<1x32xf32>
    %cst_195 = arith.constant dense<0.000000e+00> : vector<16xf32>
    %507 = vector.multi_reduction <add>, %502, %cst_195 [1] : vector<16x32xf32> to vector<16xf32>
    %508 = vector.shape_cast %507 : vector<16xf32> to vector<16x1xf32>
    %cst_196 = arith.constant 3.200000e+01 : f32
    %509 = vector.broadcast %cst_196 : f32 to vector<16x1xf32>
    %510 = arith.divf %508, %509 : vector<16x1xf32>
    %511 = vector.broadcast %510 : vector<16x1xf32> to vector<16x32xf32>
    %512 = arith.subf %502, %511 : vector<16x32xf32>
    %513 = arith.mulf %512, %512 : vector<16x32xf32>
    %cst_197 = arith.constant dense<0.000000e+00> : vector<16xf32>
    %514 = vector.multi_reduction <add>, %513, %cst_197 [1] : vector<16x32xf32> to vector<16xf32>
    %515 = vector.shape_cast %514 : vector<16xf32> to vector<16x1xf32>
    %cst_198 = arith.constant 3.200000e+01 : f32
    %516 = vector.broadcast %cst_198 : f32 to vector<16x1xf32>
    %517 = arith.divf %515, %516 : vector<16x1xf32>
    %518 = vector.broadcast %510 : vector<16x1xf32> to vector<16x32xf32>
    %519 = arith.subf %502, %518 : vector<16x32xf32>
    %cst_199 = arith.constant 9.99999974E-6 : f32
    %520 = vector.broadcast %cst_199 : f32 to vector<16x1xf32>
    %521 = arith.addf %517, %520 : vector<16x1xf32>
    %522 = math.rsqrt %521 : vector<16x1xf32>
    %523 = vector.broadcast %522 : vector<16x1xf32> to vector<16x32xf32>
    %524 = arith.mulf %519, %523 : vector<16x32xf32>
    %525 = vector.broadcast %504 : vector<1x32xf32> to vector<16x32xf32>
    %526 = arith.mulf %524, %525 : vector<16x32xf32>
    %527 = vector.broadcast %506 : vector<1x32xf32> to vector<16x32xf32>
    %528 = arith.addf %526, %527 : vector<16x32xf32>
    %c0_200 = arith.constant 0 : index
    %c0_201 = arith.constant 0 : index
    %529 = vector.load %arg23[%c0_200, %c0_201] : memref<1x32xf32, #tpu.memory_space<vmem>>, vector<1x32xf32>
    %c0_202 = arith.constant 0 : index
    %c0_203 = arith.constant 0 : index
    %530 = vector.load %arg24[%c0_202, %c0_203] : memref<1x32xf32, #tpu.memory_space<vmem>>, vector<1x32xf32>
    %cst_204 = arith.constant dense<0.000000e+00> : vector<16xf32>
    %531 = vector.multi_reduction <add>, %528, %cst_204 [1] : vector<16x32xf32> to vector<16xf32>
    %532 = vector.shape_cast %531 : vector<16xf32> to vector<16x1xf32>
    %cst_205 = arith.constant 3.200000e+01 : f32
    %533 = vector.broadcast %cst_205 : f32 to vector<16x1xf32>
    %534 = arith.divf %532, %533 : vector<16x1xf32>
    %535 = vector.broadcast %534 : vector<16x1xf32> to vector<16x32xf32>
    %536 = arith.subf %528, %535 : vector<16x32xf32>
    %537 = arith.mulf %536, %536 : vector<16x32xf32>
    %cst_206 = arith.constant dense<0.000000e+00> : vector<16xf32>
    %538 = vector.multi_reduction <add>, %537, %cst_206 [1] : vector<16x32xf32> to vector<16xf32>
    %539 = vector.shape_cast %538 : vector<16xf32> to vector<16x1xf32>
    %cst_207 = arith.constant 3.200000e+01 : f32
    %540 = vector.broadcast %cst_207 : f32 to vector<16x1xf32>
    %541 = arith.divf %539, %540 : vector<16x1xf32>
    %542 = vector.broadcast %534 : vector<16x1xf32> to vector<16x32xf32>
    %543 = arith.subf %528, %542 : vector<16x32xf32>
    %cst_208 = arith.constant 9.99999974E-6 : f32
    %544 = vector.broadcast %cst_208 : f32 to vector<16x1xf32>
    %545 = arith.addf %541, %544 : vector<16x1xf32>
    %546 = math.rsqrt %545 : vector<16x1xf32>
    %547 = vector.broadcast %546 : vector<16x1xf32> to vector<16x32xf32>
    %548 = arith.mulf %543, %547 : vector<16x32xf32>
    %549 = vector.broadcast %529 : vector<1x32xf32> to vector<16x32xf32>
    %550 = arith.mulf %548, %549 : vector<16x32xf32>
    %551 = vector.broadcast %530 : vector<1x32xf32> to vector<16x32xf32>
    %552 = arith.addf %550, %551 : vector<16x32xf32>
    %553 = vector.shape_cast %552 : vector<16x32xf32> to vector<2x8x32xf32>
    %c1_209 = arith.constant 1 : index
    %c0_210 = arith.constant 0 : index
    %c0_211 = arith.constant 0 : index
    %c0_212 = arith.constant 0 : index
    %554 = vector.load %arg25[%c1_209, %c0_210, %c0_211, %c0_212] : memref<2x2x8x32xf32, #tpu.memory_space<vmem>>, vector<1x2x8x32xf32>
    %555 = vector.shape_cast %554 : vector<1x2x8x32xf32> to vector<2x8x32xf32>
    %556 = vector.shape_cast %553 : vector<2x8x32xf32> to vector<1x2x8x32xf32>
    tpu.vector_store %arg25[%c1_209, %c0_210, %c0_211, %c0_212], %556 {strides = array<i32>} : memref<2x2x8x32xf32, #tpu.memory_space<vmem>>, vector<1x2x8x32xf32>,
    %c0_213 = arith.constant 0 : index
    %c0_214 = arith.constant 0 : index
    %557 = vector.load %arg23[%c0_213, %c0_214] : memref<1x32xf32, #tpu.memory_space<vmem>>, vector<1x32xf32>
    %c0_215 = arith.constant 0 : index
    %c0_216 = arith.constant 0 : index
    %558 = vector.load %arg24[%c0_215, %c0_216] : memref<1x32xf32, #tpu.memory_space<vmem>>, vector<1x32xf32>
    %cst_217 = arith.constant dense<0.000000e+00> : vector<16xf32>
    %559 = vector.multi_reduction <add>, %528, %cst_217 [1] : vector<16x32xf32> to vector<16xf32>
    %560 = vector.shape_cast %559 : vector<16xf32> to vector<16x1xf32>
    %cst_218 = arith.constant 3.200000e+01 : f32
    %561 = vector.broadcast %cst_218 : f32 to vector<16x1xf32>
    %562 = arith.divf %560, %561 : vector<16x1xf32>
    %563 = vector.broadcast %562 : vector<16x1xf32> to vector<16x32xf32>
    %564 = arith.subf %528, %563 : vector<16x32xf32>
    %565 = arith.mulf %564, %564 : vector<16x32xf32>
    %cst_219 = arith.constant dense<0.000000e+00> : vector<16xf32>
    %566 = vector.multi_reduction <add>, %565, %cst_219 [1] : vector<16x32xf32> to vector<16xf32>
    %567 = vector.shape_cast %566 : vector<16xf32> to vector<16x1xf32>
    %cst_220 = arith.constant 3.200000e+01 : f32
    %568 = vector.broadcast %cst_220 : f32 to vector<16x1xf32>
    %569 = arith.divf %567, %568 : vector<16x1xf32>
    %570 = vector.broadcast %562 : vector<16x1xf32> to vector<16x32xf32>
    %571 = arith.subf %528, %570 : vector<16x32xf32>
    %cst_221 = arith.constant 9.99999974E-6 : f32
    %572 = vector.broadcast %cst_221 : f32 to vector<16x1xf32>
    %573 = arith.addf %569, %572 : vector<16x1xf32>
    %574 = math.rsqrt %573 : vector<16x1xf32>
    %575 = vector.broadcast %574 : vector<16x1xf32> to vector<16x32xf32>
    %576 = arith.mulf %571, %575 : vector<16x32xf32>
    %577 = vector.broadcast %557 : vector<1x32xf32> to vector<16x32xf32>
    %578 = arith.mulf %576, %577 : vector<16x32xf32>
    %579 = vector.broadcast %558 : vector<1x32xf32> to vector<16x32xf32>
    %580 = arith.addf %578, %579 : vector<16x32xf32>
    %581 = vector.shape_cast %580 : vector<16x32xf32> to vector<2x8x32xf32>
    %c0_222 = arith.constant 0 : index
    %c0_223 = arith.constant 0 : index
    %c0_224 = arith.constant 0 : index
    %582 = vector.load %arg26[%c0_222, %c0_223, %c0_224] : memref<2x8x32xf32, #tpu.memory_space<vmem>>, vector<2x8x32xf32>
    tpu.vector_store %arg26[%c0_222, %c0_223, %c0_224], %581 {strides = array<i32>} : memref<2x8x32xf32, #tpu.memory_space<vmem>>, vector<2x8x32xf32>,
    return
  }
  func.func @transform_0(%arg0: i32) -> (i32, i32, i32) {
    %c0_i32 = arith.constant 0 : i32
    %c0_i32_0 = arith.constant 0 : i32
    %c0_i32_1 = arith.constant 0 : i32
    %c0_i32_2 = arith.constant 0 : i32
    return %c0_i32, %c0_i32_0, %c0_i32_1 : i32, i32, i32
  }
  func.func @transform_1(%arg0: i32) -> (i32, i32, i32) {
    %c0_i32 = arith.constant 0 : i32
    %c0_i32_0 = arith.constant 0 : i32
    %c0_i32_1 = arith.constant 0 : i32
    %c0_i32_2 = arith.constant 0 : i32
    return %c0_i32, %c0_i32_0, %c0_i32_1 : i32, i32, i32
  }
  func.func @transform_2(%arg0: i32) -> (i32, i32, i32) {
    %c0_i32 = arith.constant 0 : i32
    %c0_i32_0 = arith.constant 0 : i32
    %c0_i32_1 = arith.constant 0 : i32
    %c0_i32_2 = arith.constant 0 : i32
    return %c0_i32, %c0_i32_0, %c0_i32_1 : i32, i32, i32
  }
  func.func @transform_3(%arg0: i32) -> (i32, i32, i32) {
    %c0_i32 = arith.constant 0 : i32
    %c0_i32_0 = arith.constant 0 : i32
    %c0_i32_1 = arith.constant 0 : i32
    %c0_i32_2 = arith.constant 0 : i32
    return %c0_i32, %c0_i32_0, %c0_i32_1 : i32, i32, i32
  }
  func.func @transform_4(%arg0: i32) -> (i32, i32, i32) {
    %c0_i32 = arith.constant 0 : i32
    %c0_i32_0 = arith.constant 0 : i32
    %c0_i32_1 = arith.constant 0 : i32
    %c0_i32_2 = arith.constant 0 : i32
    return %c0_i32, %c0_i32_0, %c0_i32_1 : i32, i32, i32
  }
  func.func @transform_5(%arg0: i32) -> (i32, i32, i32) {
    %c0_i32 = arith.constant 0 : i32
    %c0_i32_0 = arith.constant 0 : i32
    %c0_i32_1 = arith.constant 0 : i32
    %c0_i32_2 = arith.constant 0 : i32
    return %c0_i32, %c0_i32_0, %c0_i32_1 : i32, i32, i32
  }
  func.func @transform_6(%arg0: i32) -> (i32, i32, i32) {
    %c0_i32 = arith.constant 0 : i32
    %c0_i32_0 = arith.constant 0 : i32
    %c0_i32_1 = arith.constant 0 : i32
    %c0_i32_2 = arith.constant 0 : i32
    return %c0_i32, %c0_i32_0, %c0_i32_1 : i32, i32, i32
  }
  func.func @transform_7(%arg0: i32) -> (i32, i32, i32) {
    %c0_i32 = arith.constant 0 : i32
    %c0_i32_0 = arith.constant 0 : i32
    %c0_i32_1 = arith.constant 0 : i32
    %c0_i32_2 = arith.constant 0 : i32
    return %c0_i32, %c0_i32_0, %c0_i32_1 : i32, i32, i32
  }
  func.func @transform_8(%arg0: i32) -> (i32, i32, i32) {
    %c0_i32 = arith.constant 0 : i32
    %c0_i32_0 = arith.constant 0 : i32
    %c0_i32_1 = arith.constant 0 : i32
    %c0_i32_2 = arith.constant 0 : i32
    return %c0_i32, %c0_i32_0, %c0_i32_1 : i32, i32, i32
  }
  func.func @transform_9(%arg0: i32) -> (i32, i32, i32) {
    %c0_i32 = arith.constant 0 : i32
    %c0_i32_0 = arith.constant 0 : i32
    %c0_i32_1 = arith.constant 0 : i32
    %c0_i32_2 = arith.constant 0 : i32
    return %c0_i32, %c0_i32_0, %c0_i32_1 : i32, i32, i32
  }
  func.func @transform_10(%arg0: i32) -> (i32, i32, i32) {
    %c0_i32 = arith.constant 0 : i32
    %c0_i32_0 = arith.constant 0 : i32
    %c0_i32_1 = arith.constant 0 : i32
    %c0_i32_2 = arith.constant 0 : i32
    return %c0_i32, %c0_i32_0, %c0_i32_1 : i32, i32, i32
  }
  func.func @transform_11(%arg0: i32) -> (i32, i32, i32) {
    %c0_i32 = arith.constant 0 : i32
    %c0_i32_0 = arith.constant 0 : i32
    %c0_i32_1 = arith.constant 0 : i32
    %c0_i32_2 = arith.constant 0 : i32
    return %c0_i32, %c0_i32_0, %c0_i32_1 : i32, i32, i32
  }
  func.func @transform_12(%arg0: i32) -> (i32, i32, i32) {
    %c0_i32 = arith.constant 0 : i32
    %c0_i32_0 = arith.constant 0 : i32
    %c0_i32_1 = arith.constant 0 : i32
    %c0_i32_2 = arith.constant 0 : i32
    return %c0_i32, %c0_i32_0, %c0_i32_1 : i32, i32, i32
  }
  func.func @transform_13(%arg0: i32) -> (i32, i32, i32) {
    %c0_i32 = arith.constant 0 : i32
    %c0_i32_0 = arith.constant 0 : i32
    %c0_i32_1 = arith.constant 0 : i32
    %c0_i32_2 = arith.constant 0 : i32
    return %c0_i32, %c0_i32_0, %c0_i32_1 : i32, i32, i32
  }
  func.func @transform_14(%arg0: i32) -> (i32, i32, i32) {
    %c0_i32 = arith.constant 0 : i32
    %c0_i32_0 = arith.constant 0 : i32
    %c0_i32_1 = arith.constant 0 : i32
    %c0_i32_2 = arith.constant 0 : i32
    return %c0_i32, %c0_i32_0, %c0_i32_1 : i32, i32, i32
  }
  func.func @transform_15(%arg0: i32) -> (i32, i32, i32) {
    %c0_i32 = arith.constant 0 : i32
    %c0_i32_0 = arith.constant 0 : i32
    %c0_i32_1 = arith.constant 0 : i32
    %c0_i32_2 = arith.constant 0 : i32
    return %c0_i32, %c0_i32_0, %c0_i32_1 : i32, i32, i32
  }
  func.func @transform_16(%arg0: i32) -> (i32, i32, i32) {
    %c0_i32 = arith.constant 0 : i32
    %c0_i32_0 = arith.constant 0 : i32
    %c0_i32_1 = arith.constant 0 : i32
    %c0_i32_2 = arith.constant 0 : i32
    return %c0_i32, %c0_i32_0, %c0_i32_1 : i32, i32, i32
  }
  func.func @transform_17(%arg0: i32) -> (i32, i32, i32) {
    %c0_i32 = arith.constant 0 : i32
    %c0_i32_0 = arith.constant 0 : i32
    %c0_i32_1 = arith.constant 0 : i32
    %c0_i32_2 = arith.constant 0 : i32
    return %c0_i32, %c0_i32_0, %c0_i32_1 : i32, i32, i32
  }
  func.func @transform_18(%arg0: i32) -> (i32, i32, i32) {
    %c0_i32 = arith.constant 0 : i32
    %c0_i32_0 = arith.constant 0 : i32
    %c0_i32_1 = arith.constant 0 : i32
    %c0_i32_2 = arith.constant 0 : i32
    return %c0_i32, %c0_i32_0, %c0_i32_1 : i32, i32, i32
  }
  func.func @transform_19(%arg0: i32) -> (i32, i32, i32) {
    %c0_i32 = arith.constant 0 : i32
    %c0_i32_0 = arith.constant 0 : i32
    %c0_i32_1 = arith.constant 0 : i32
    %c0_i32_2 = arith.constant 0 : i32
    return %c0_i32, %c0_i32_0, %c0_i32_1 : i32, i32, i32
  }
  func.func @transform_20(%arg0: i32) -> (i32, i32, i32) {
    %c0_i32 = arith.constant 0 : i32
    %c0_i32_0 = arith.constant 0 : i32
    %c0_i32_1 = arith.constant 0 : i32
    %c0_i32_2 = arith.constant 0 : i32
    return %c0_i32, %c0_i32_0, %c0_i32_1 : i32, i32, i32
  }
  func.func @transform_21(%arg0: i32) -> (i32, i32, i32) {
    %c0_i32 = arith.constant 0 : i32
    %c0_i32_0 = arith.constant 0 : i32
    %c0_i32_1 = arith.constant 0 : i32
    %c0_i32_2 = arith.constant 0 : i32
    return %c0_i32, %c0_i32_0, %c0_i32_1 : i32, i32, i32
  }
  func.func @transform_22(%arg0: i32) -> (i32, i32) {
    %c0_i32 = arith.constant 0 : i32
    %c0_i32_0 = arith.constant 0 : i32
    %c0_i32_1 = arith.constant 0 : i32
    return %c0_i32, %c0_i32_0 : i32, i32
  }
  func.func @transform_23(%arg0: i32) -> (i32, i32) {
    %c0_i32 = arith.constant 0 : i32
    %c0_i32_0 = arith.constant 0 : i32
    %c0_i32_1 = arith.constant 0 : i32
    return %c0_i32, %c0_i32_0 : i32, i32
  }
  func.func @transform_24(%arg0: i32) -> (i32, i32, i32, i32) {
    %c0_i32 = arith.constant 0 : i32
    %c0_i32_0 = arith.constant 0 : i32
    %c0_i32_1 = arith.constant 0 : i32
    %c0_i32_2 = arith.constant 0 : i32
    %c0_i32_3 = arith.constant 0 : i32
    return %c0_i32, %c0_i32_0, %c0_i32_1, %c0_i32_2 : i32, i32, i32, i32
  }
  func.func @transform_25(%arg0: i32) -> (i32, i32, i32) {
    %c0_i32 = arith.constant 0 : i32
    %c0_i32_0 = arith.constant 0 : i32
    %c0_i32_1 = arith.constant 0 : i32
    %c0_i32_2 = arith.constant 0 : i32
    return %c0_i32, %c0_i32_0, %c0_i32_1 : i32, i32, i32
  }
}

</mosaic_0001>

<bundles_post_ra>
// kernel: tpu_custom_call.1
= control target key start
LH: loop header
LB: loop body
LE: loop exit
PB: predicated region body
PF: predicated region fallthrough
CT: control target
= control target key end

     0   :  { %s6451_s0 = inlined_call_operand.hbm [shape: f32[2,8,32], index: 0, kind: input, shape index: {}]   ;;  %s6452_s1 = inlined_call_operand.hbm [shape: f32[2,16,32], index: 1, kind: input, shape index: {}]   ;;  %s6453_s2 = inlined_call_operand.hbm [shape: f32[2,8,32], index: 2, kind: input, shape index: {}]   ;;  %s6454_s3 = inlined_call_operand.hbm [shape: f32[2,16,32], index: 3, kind: input, shape index: {}]   ;;  %s6455_s4 = inlined_call_operand.vmem [shape: f32[2,32,96], index: 4, kind: input, shape index: {}]   ;;  %s6456_s5 = inlined_call_operand.vmem [shape: f32[2,1,96], index: 5, kind: input, shape index: {}]   ;;  %s6457_s6 = inlined_call_operand.vmem [shape: f32[2,32,32], index: 6, kind: input, shape index: {}]   ;;  %s6458_s7 = inlined_call_operand.vmem [shape: f32[2,1,32], index: 7, kind: input, shape index: {}]   ;;  %s6459_s8 = inlined_call_operand.vmem [shape: f32[2,32,96], index: 8, kind: input, shape index: {}]   ;;  %s6460_s9 = inlined_call_operand.vmem [shape: f32[2,1,96], index: 9, kind: input, shape index: {}]   ;;  %s6461_s10 = inlined_call_operand.hbm [shape: f32[2,32,32], index: 10, kind: input, shape index: {}]   ;;  %s6462_s11 = inlined_call_operand.vmem [shape: f32[2,1,32], index: 11, kind: input, shape index: {}]   ;;  %s6463_s12 = inlined_call_operand.vmem [shape: f32[2,1,32], index: 12, kind: input, shape index: {}]   ;;  %s6464_s13 = inlined_call_operand.hbm [shape: f32[2,1,32], index: 13, kind: input, shape index: {}]   ;;  %s6465_s14 = inlined_call_operand.hbm [shape: f32[2,1,32], index: 14, kind: input, shape index: {}]   ;;  %s6466_s15 = inlined_call_operand.vmem [shape: f32[2,1,32], index: 15, kind: input, shape index: {}]   ;;  %s6467_s16 = inlined_call_operand.vmem [shape: f32[2,1,32], index: 16, kind: input, shape index: {}]   ;;  %s6468_s17 = inlined_call_operand.hbm [shape: f32[2,1,32], index: 17, kind: input, shape index: {}]   ;;  %s6469_s18 = inlined_call_operand.hbm [shape: f32[2,32,64], index: 18, kind: input, shape index: {}]   ;;  %s6470_s19 = inlined_call_operand.vmem [shape: f32[2,1,64], index: 19, kind: input, shape index: {}]   ;;  %s6471_s20 = inlined_call_operand.vmem [shape: f32[2,64,32], index: 20, kind: input, shape index: {}]   ;;  %s6472_s21 = inlined_call_operand.vmem [shape: f32[2,1,32], index: 21, kind: input, shape index: {}]   ;;  %s6473_s22 = inlined_call_operand.vmem [shape: f32[1,32], index: 22, kind: input, shape index: {}]   ;;  %s6474_s23 = inlined_call_operand.vmem [shape: f32[1,32], index: 23, kind: input, shape index: {}]   ;;  %s6475_s24 = inlined_call_operand.hbm [shape: f32[2,2,8,32], index: 24, kind: output, shape index: {0}]   ;;  %s6476_s25 = inlined_call_operand.hbm [shape: f32[2,8,32], index: 25, kind: output, shape index: {1}]  }
   0x1   :  { %6489 = sst [smem:[#allocation27_spill]] %s6451_s0 }
   0x2   :  { %6490 = sst [smem:[#allocation28_spill]] %s6452_s1 }
   0x3   :  { %6491 = sst [smem:[#allocation29_spill]] %s6453_s2 }
   0x4   :  { %6492 = sst [smem:[#allocation30_spill]] %s6454_s3 }
   0x5   :  { %6493 = sst [smem:[#allocation31_spill]] %s6455_s4 }
   0x6   :  { %6494 = sst [smem:[#allocation32_spill]] %s6456_s5 }
   0x7   :  { %6495 = sst [smem:[#allocation33_spill]] %s6457_s6 }
   0x8   :  { %6496 = sst [smem:[#allocation34_spill]] %s6458_s7 }
   0x9   :  { %6497 = sst [smem:[#allocation35_spill]] %s6459_s8 }
   0xa   :  { %6498 = sst [smem:[#allocation36_spill]] %s6460_s9 }
   0xb   :  { %6499 = sst [smem:[#allocation37_spill]] %s6476_s25 }
   0xc   :  { %31 = vsyncpa [#allocation3], 0 }
   0xd   :  { %32 = vsyncpa [#allocation6], 0 }
   0xe   :  { %33 = vsyncpa [#allocation9], 0 }
   0xf   :  { %34 = vsyncpa [#allocation12], 0 }
  0x10   :  { %35 = vsyncpa [#allocation15], 0 }
  0x11   :  { %36 = vsyncpa [#allocation4], 0 }
  0x12   :  { %37 = vsyncpa [#allocation19], 0  ;;  %s6500_s6 = sld [smem:[#allocation28_spill]]  ;;  %s5083_s7 = smov [#allocation5]  }
  0x13   :  { %s57_s3 = sshll.u32 %s5083_s7, 4  ;;  %s6501_s8 = sld [smem:[#allocation30_spill]]  ;;  %s58_s3 = int_to_ptr.vmem [resolvable:$true] %s57_s3 }
  0x14   :  { %s6483_s4 = smov 128   ;;  %s5085_s28 = smov 8  }
  0x15   :  { %s5086_s9 = smov [#allocation8]   ;;  %s123_s2 = sshll.u32 %s6464_s13, 4  ;;  %s124_s2 = int_to_ptr.hbm [resolvable:$true] %s123_s2 }
  0x16   :  { %s83_s5 = sshll.u32 %s5086_s9, 4  ;;  %s5090_s13 = smov [#allocation14]   ;;  %s84_s5 = int_to_ptr.vmem [resolvable:$true] %s83_s5 }
  0x17   :  { %s155_s9 = sshll.u32 %s5090_s13, 4  ;;  %s6502_s25 = sld [smem:[#allocation27_spill]]  ;;  %s156_s9 = int_to_ptr.vmem [resolvable:$true] %s155_s9 }
  0x18   :  { %s55_s30 = sshll.u32 %s6500_s6, 4  ;;  %s5087_s6 = smov [#allocation11]   ;;  %s56_s30 = int_to_ptr.hbm [resolvable:$true] %s55_s30 }
  0x19   :  { %s81_s27 = sshll.u32 %s6501_s8, 4  ;;  %s125_s7 = sshll.u32 %s5087_s6, 4  ;;  %s82_s27 = int_to_ptr.hbm [resolvable:$true] %s81_s27  ;;  %s126_s7 = int_to_ptr.vmem [resolvable:$true] %s125_s7 }
  0x1a   :  { %63 = dma.hbm_to_vmem [thread:$0]  %s56_s30, 512, %s58_s3, [#allocation6], %s6483_s4, %s6483_s4, %s5085_s28  }
  0x1b   :  { %89 = dma.hbm_to_vmem [thread:$0]  %s82_s27, 512, %s84_s5, [#allocation9], %s6483_s4, %s6483_s4, %s5085_s28  }
  0x1c   :  { %s153_s30 = sshll.u32 %s6468_s17, 4  ;;  %s6487_s3 = smov 16   ;;  %s154_s30 = int_to_ptr.hbm [resolvable:$true] %s153_s30 }
  0x1d   :  { %s5089_s8 = smov 1   ;;  %s42_s27 = sshll.u32 %s6502_s25, 4  ;;  %s43_s27 = int_to_ptr.hbm [resolvable:$true] %s42_s27 }
  0x1e   :  { %131 = dma.hbm_to_vmem [thread:$0]  %s124_s2, 32, %s126_s7, [#allocation12], %s6487_s3, %s6487_s3, %s5089_s8  }
  0x1f   :  { %161 = dma.hbm_to_vmem [thread:$0]  %s154_s30, 32, %s156_s9, [#allocation15], %s6487_s3, %s6487_s3, %s5089_s8  }
  0x20   :  { %s6503_s6 = sld [smem:[#allocation29_spill]]  ;;  %s5091_s1 = smov [#allocation2]  }
  0x21   :  { %s44_s4 = sshll.u32 %s5091_s1, 4  ;;  %s6504_s2 = smov 128   ;;  %s45_s4 = int_to_ptr.vmem [resolvable:$true] %s44_s4 }
  0x22   :  { %50 = dma.hbm_to_vmem [thread:$0]  %s43_s27, 256, %s45_s4, [#allocation3], %s6504_s2, %s6504_s2, %s5085_s28  }
  0x23   :  { %s5092_s7 = smov [#allocation7]   ;;  %s106_s29 = sshll.u32 %s6461_s10, 4  ;;  %s107_s29 = int_to_ptr.hbm [resolvable:$true] %s106_s29 }
  0x24   :  { %s70_s25 = sshll.u32 %s5092_s7, 4  ;;  %s136_s17 = sshll.u32 %s6465_s14, 4  ;;  %s71_s25 = int_to_ptr.vmem [resolvable:$true] %s70_s25  ;;  %s137_s17 = int_to_ptr.hbm [resolvable:$true] %s136_s17 }
  0x25   :  { %s5093_s5 = smov [#allocation10]   ;;  %s5094_s4 = smov [#allocation13]  }
  0x26   :  { %s68_s26 = sshll.u32 %s6503_s6, 4  ;;  %s108_s6 = sshll.u32 %s5093_s5, 4  ;;  %s69_s26 = int_to_ptr.hbm [resolvable:$true] %s68_s26  ;;  %s109_s6 = int_to_ptr.vmem [resolvable:$true] %s108_s6 }
  0x27   :  { %76 = dma.hbm_to_vmem [thread:$0]  %s69_s26, 256, %s71_s25, [#allocation6], %s6504_s2, %s6504_s2, %s5085_s28  }
  0x28   :  { %114 = dma.hbm_to_vmem [thread:$0]  %s107_s29, 1024, %s109_s6, [#allocation9], %s6504_s2, %s6504_s2, %s5085_s28  }
  0x29   :  { %s138_s10 = sshll.u32 %s5094_s4, 4  ;;  %s166_s7 = sshll.u32 %s6469_s18, 4  ;;  %s139_s10 = int_to_ptr.vmem [resolvable:$true] %s138_s10  ;;  %s167_s7 = int_to_ptr.hbm [resolvable:$true] %s166_s7 }
  0x2a   :  { %144 = dma.hbm_to_vmem [thread:$0]  %s137_s17, 32, %s139_s10, [#allocation12], %s6487_s3, %s6487_s3, %s5089_s8  }
  0x2b   :  { %s5095_s14 = smov [#allocation16]  }
  0x2c   :  { %s168_s26 = sshll.u32 %s5095_s14, 4  ;;  %s169_s26 = int_to_ptr.vmem [resolvable:$true] %s168_s26 }
  0x2d   :  { %174 = dma.hbm_to_vmem [thread:$0]  %s167_s7, 1024, %s169_s26, [#allocation15], %s6504_s2, %s6504_s2, %s5085_s28  }
  0x2e   :  { %5069 = dma.done.wait [#allocation3], 256  }
  0x2f   :  { %5070 = vsyncadd [#allocation3], 4294967040 }
  0x30   :  { %5071 = dma.done.wait [#allocation6], 768  }
  0x31   :  { %5072 = vsyncadd [#allocation6], 4294966528 }
  0x32   :  { %5073 = dma.done.wait [#allocation9], 1536  }
  0x33   :  { %5074 = vsyncadd [#allocation9], 4294965760 }
  0x34   :  { %5075 = dma.done.wait [#allocation12], 64  }
  0x35   :  { %5076 = vsyncadd [#allocation12], 4294967232 }
  0x36   :  { %5077 = dma.done.wait [#allocation15], 1056  }
  0x37   :  { %5078 = vsyncadd [#allocation15], 4294966240  ;;  %s6505_s25 = sld [smem:[#allocation31_spill]]  ;;  %v5301_v5 = vld [vmem:[#allocation2] sm:$0xff]  ;;  %v5303_v6 = vld [vmem:[#allocation7] sm:$0xff]  ;;  %vm252_vm0 = vcmask 261120  }
  0x38   :  { %v247_v8 = vadd.f32 %v5303_v6, %v5301_v5  ;;  %v5307_v9 = vld [vmem:[#allocation2 + $0x8] sm:$0xff]  ;;  %v5309_v10 = vld [vmem:[#allocation7 + $0x8] sm:$0xff]  ;;  %s6506_s4 = sld [smem:[#allocation32_spill]]  ;;  %s5096_s10 = smov 120   ;;  %vm371_vm1 = vcmask 64512  }
  0x39   :  { %v248_v11 = vadd.f32 %v5309_v10, %v5307_v9  ;;  %s5097_s27 = smov 112   ;;  %s5098_s1 = smov 96  }
  0x3a   :  { %s5099_s7 = smov 104   ;;  %s5100_s14 = smov 64  }
  0x3b   :  { %s6485_s26 = smov 24   ;;  %s6511_s13 = sld [smem:[#allocation33_spill]] }
  0x3c   :  { %s6512_s8 = sld [smem:[#allocation34_spill]]  ;;  %s6520_s9 = smov 24  }
  0x3d   :  { %v240_v0 = vld [vmem:[%s6505_s25 + $0x18] sm:$0xff]  ;;  %v239_v1 = vld [vmem:[%s6505_s25 + $0x10] sm:$0xff]  ;;  %v238_v2 = vld [vmem:[%s6505_s25 + $0x8] sm:$0xff]  ;;  %s6513_s30 = sld [smem:[#allocation35_spill]]  ;;  %s5104_s18 = smov [#allocation18]  }
  0x3e   :  { %271 = vmatpush.msra.mxu0 %v240_v0  ;;  %v4482_v3 = vpack.i.bf16 %v239_v1, %v240_v0  ;;  %v237_v4 = vld [vmem:[%s6505_s25] sm:$0xff]  ;;  %s6514_s6 = sld [smem:[#allocation36_spill]]  ;;  %s4251_s0 = sshll.u32 %s5104_s18, 4  ;;  %s4252_s0 = int_to_ptr.vmem [resolvable:$true] %s4251_s0 }
  0x3f   :  { %v4487_v7 = vpack.i.bf16 %v237_v4, %v238_v2  ;;  %v5318_v12 = vld [vmem:[%s6506_s4] ss:$0 sm:$0xff] }
  0x40   :  { %272 = vmatpush.msra.mxu0 %v239_v1 }
  0x42   :  { %273 = vmatpush.msra.mxu0 %v238_v2 }
  0x44   :  { %274 = vmatpush.msra.mxu0 %v237_v4 }
  0x45   :  { %4275 = vmatmul.msk.f32.vlgmr.msra.gmra.mxu0 %vm252_vm0, %v247_v8 }
  0x4d   :  { %4276 = vmatmul.msk.f32.gmra.mxu0 %vm252_vm0, %v248_v11 }
  0xc2   :  { %v276_v13 = vpop.f32.mrf.mxu0 }
  0xc3   :  { %v277_v14 = vadd.f32 %v5318_v12, %v276_v13 }
  0xc5   :  { %337 = vrot.lane.b32.xlu0 %v277_v14, %s5096_s10 }
  0xca   :  { %v279_v15 = vpop.f32.mrf.mxu0 }
  0xcb   :  { %v280_v16 = vadd.f32 %v5318_v12, %v279_v15 }
  0xcd   :  { %343 = vrot.lane.b32.xlu2 %v280_v16, %s5097_s27  ;;  %339 = vrot.lane.b32.xlu1 %v280_v16, %s5096_s10 }
  0xce   :  { %341 = vrot.lane.b32.xlu0 %v277_v14, %s5097_s27 }
  0xd5   :  { %369 = vrot.lane.b32.xlu2 %v277_v14, %s5098_s1  ;;  %345 = vrot.lane.b32.xlu1 %v277_v14, %s5099_s7 }
  0xd6   :  { %347 = vrot.lane.b32.xlu0 %v280_v16, %s5099_s7 }
  0xdd   :  { %396 = vrot.lane.b32.xlu2 %v280_v16, %s5098_s1 }
  0xe5   :  { %4483 = vrot.lane.b32.xlu2 %v4482_v3, %s5100_s14 }
 0x127   :  { %v344_v17 = vpop.permute.xlu2 %343 }
 0x128   :  { %500 = vrot.lane.b32.xlu2 %v344_v17, %s5098_s1 }
 0x12f   :  { %v370_v18 = vpop.permute.xlu2 %369 }
 0x130   :  { %4279 = vmatpush.xpose.msk.msra.mxu2 %vm371_vm1, %v370_v18 }
 0x133   :  { %4280 = vmatmul.msk.f32.vlgmr.msra.gmra.mxu2 %vm371_vm1, %v277_v14 }
 0x137   :  { %v397_v19 = vpop.permute.xlu2 %396  ;;  %v338_v20 = vpop.permute.xlu0 %337 }
 0x138   :  { %4281 = vmatpush.xpose.msk.msra.mxu3 %vm371_vm1, %v397_v19  ;;  %422 = vrot.lane.b32.xlu1 %v338_v20, %s5098_s1 }
 0x13b   :  { %4282 = vmatmul.msk.f32.vlgmr.msra.gmra.mxu3 %vm371_vm1, %v280_v16 }
 0x13f   :  { %v340_v21 = vpop.permute.xlu1 %339  ;;  %v4484_v25 = vpop.permute.xlu2 %4483 }
 0x140   :  { %v342_v22 = vpop.permute.xlu0 %341  ;;  %448 = vrot.lane.b32.xlu1 %v340_v21, %s5098_s1  ;;  %v4485_v26 = vunpack.i.l.bf16 %v4484_v25  ;;  %v4486_v27 = vunpack.i.h.bf16 %v4484_v25 }
 0x141   :  { %474 = vrot.lane.b32.xlu0 %v342_v22, %s5098_s1 }
 0x142   :  { %319 = vmatpush.msra.mxu1 %v4485_v26 }
 0x144   :  { %320 = vmatpush.msra.mxu1 %v4486_v27 }
 0x147   :  { %v346_v23 = vpop.permute.xlu1 %345 }
 0x148   :  { %526 = vrot.lane.b32.xlu1 %v346_v23, %s5098_s1  ;;  %v348_v24 = vpop.permute.xlu0 %347 }
 0x149   :  { %4488 = vrot.lane.b32.xlu0 %v4487_v7, %s5100_s14 }
 0x151   :  { %552 = vrot.lane.b32.xlu0 %v348_v24, %s5098_s1 }
 0x182   :  { %v501_v30 = vpop.permute.xlu2 %500 }
 0x1aa   :  { %v423_v28 = vpop.permute.xlu1 %422 }
 0x1ab   :  { %4283 = vmatpush.xpose.msk.msrb.mxu2 %vm371_vm1, %v423_v28 }
 0x1ae   :  { %4284 = vmatmul.msk.f32.vlgmr.msrb.gmra.mxu2 %vm371_vm1, %v338_v20 }
 0x1b2   :  { %v449_v29 = vpop.permute.xlu1 %448 }
 0x1b3   :  { %v475_v31 = vpop.permute.xlu0 %474  ;;  %4285 = vmatpush.xpose.msk.msrb.mxu3 %vm371_vm1, %v449_v29 }
 0x1b4   :  { %4287 = vmatpush.xpose.msk.msra.mxu2 %vm371_vm1, %v475_v31 }
 0x1b6   :  { %v393_v32 = vpop.f32.mrf.mxu2  ;;  %4286 = vmatmul.msk.f32.vlgmr.msrb.gmra.mxu3 %vm371_vm1, %v340_v21 }
 0x1b7   :  { %4289 = vmatpush.xpose.msk.msra.mxu3 %vm371_vm1, %v501_v30  ;;  %v578_v33 = vmul.f32 0.35355338, %v393_v32  ;;  %4288 = vmatmul.msk.f32.vlgmr.msra.gmra.mxu2 %vm371_vm1, %v342_v22 }
 0x1b9   :  { %v586_v34 = vsel %vm371_vm1, %v578_v33, -inf }
 0x1ba   :  { %587 = vmax.xlane.f32.xlu1 %v586_v34  ;;  %v527_v35 = vpop.permute.xlu1 %526 }
 0x1bb   :  { %v4489_v36 = vpop.permute.xlu0 %4488  ;;  %4291 = vmatpush.xpose.msk.msrb.mxu0 %vm371_vm1, %v527_v35 }
 0x1bc   :  { %v4490_v37 = vunpack.i.l.bf16 %v4489_v36  ;;  %v4491_v38 = vunpack.i.h.bf16 %v4489_v36 }
 0x1be   :  { %321 = vmatpush.msra.mxu1 %v4490_v37  ;;  %v419_v39 = vpop.f32.mrf.mxu3  ;;  %4290 = vmatmul.msk.f32.vlgmr.msra.gmra.mxu3 %vm371_vm1, %v344_v17 }
 0x1bf   :  { %v579_v40 = vmul.f32 0.35355338, %v419_v39  ;;  %4292 = vmatmul.msk.f32.vlgmr.msrb.gmra.mxu0 %vm371_vm1, %v346_v23 }
 0x1c0   :  { %322 = vmatpush.msra.mxu1 %v4491_v38 }
 0x1c1   :  { %4277 = vmatmul.msk.f32.vlgmr.msra.gmra.mxu1 %vm252_vm0, %v5301_v5  ;;  %v589_v41 = vsel %vm371_vm1, %v579_v40, -inf }
 0x1c2   :  { %590 = vmax.xlane.f32.xlu2 %v589_v41 }
 0x1c3   :  { %v553_v42 = vpop.permute.xlu0 %552 }
 0x1c4   :  { %4293 = vmatpush.xpose.msk.msrb.mxu1 %vm371_vm1, %v553_v42 }
 0x1c9   :  { %4278 = vmatmul.msk.f32.gmra.mxu1 %vm252_vm0, %v5307_v9 }
 0x1d1   :  { %4294 = vmatmul.msk.f32.vlgmr.msrb.gmra.mxu1 %vm371_vm1, %v348_v24 }
 0x22d   :  { %v588_v43 = vpop.xlane.xlu1 %587 }
 0x22e   :  { %v610_v46 = vsub.f32 %v578_v33, %v588_v43 }
 0x230   :  { %v618_v48 = vmul.f32 1.442695, %v610_v46 }
 0x231   :  { %v445_v44 = vpop.f32.mrf.mxu2 }
 0x232   :  { %v580_v45 = vmul.f32 0.35355338, %v445_v44  ;;  %4637 = vpow2.f32 %v618_v48 }
 0x234   :  { %v592_v47 = vsel %vm371_vm1, %v580_v45, -inf }
 0x235   :  { %593 = vmax.xlane.f32.xlu2 %v592_v47  ;;  %v591_v60 = vpop.xlane.xlu2 %590 }
 0x236   :  { %v611_v0 = vsub.f32 %v579_v40, %v591_v60 }
 0x238   :  { %v5367_v59 = vpop.eup %4637  ;;  %v620_v2 = vmul.f32 1.442695, %v611_v0 }
 0x239   :  { %v471_v49 = vpop.f32.mrf.mxu3  ;;  %v634_v61 = vsel %vm371_vm1, %v5367_v59, 0.0 }
 0x23a   :  { %v5361_v50 = vmul.f32 0.35355338, %v471_v49  ;;  %v497_v51 = vpop.f32.mrf.mxu2  ;;  %4639 = vpow2.f32 %v620_v2 }
 0x23b   :  { %v582_v52 = vmul.f32 0.35355338, %v497_v51 }
 0x23c   :  { %v549_v53 = vpop.f32.mrf.mxu0  ;;  %v595_v54 = vsel %vm371_vm1, %v5361_v50, -inf }
 0x23d   :  { %v584_v55 = vmul.f32 0.35355338, %v549_v53  ;;  %596 = vmax.xlane.f32.xlu2 %v595_v54  ;;  %v598_v56 = vsel %vm371_vm1, %v582_v52, -inf }
 0x23e   :  { %599 = vmax.xlane.f32.xlu0 %v598_v56  ;;  %v324_v57 = vpop.f32.mrf.mxu1 }
 0x23f   :  { %v604_v58 = vsel %vm371_vm1, %v584_v55, -inf }
 0x240   :  { %605 = vmax.xlane.f32.xlu1 %v604_v58  ;;  %v5378_v11 = vpop.eup %4639 }
 0x241   :  { %v523_v62 = vpop.f32.mrf.mxu3  ;;  %v637_v13 = vsel %vm371_vm1, %v5378_v11, 0.0 }
 0x242   :  { %v583_v1 = vmul.f32 0.35355338, %v523_v62 }
 0x244   :  { %v601_v3 = vsel %vm371_vm1, %v583_v1, -inf }
 0x246   :  { %635 = vadd.xlane.f32.xlu0 %v634_v61  ;;  %v327_v63 = vpop.f32.mrf.mxu1 }
 0x24e   :  { %602 = vmax.xlane.f32.xlu0 %v601_v3  ;;  %v575_v4 = vpop.f32.mrf.mxu1 }
 0x24f   :  { %v5372_v7 = vmul.f32 0.35355338, %v575_v4 }
 0x251   :  { %v607_v8 = vsel %vm371_vm1, %v5372_v7, -inf }
 0x252   :  { %608 = vmax.xlane.f32.xlu1 %v607_v8 }
 0x255   :  { %298 = vrot.lane.b32.xlu2 %v5318_v12, %s5100_s14 }
 0x25a   :  { %638 = vadd.xlane.f32.xlu1 %v637_v13 }
 0x2a8   :  { %v594_v14 = vpop.xlane.xlu2 %593 }
 0x2a9   :  { %v612_v15 = vsub.f32 %v580_v45, %v594_v14 }
 0x2ab   :  { %v622_v16 = vmul.f32 1.442695, %v612_v15 }
 0x2ad   :  { %4641 = vpow2.f32 %v622_v16 }
 0x2b0   :  { %v5382_v17 = vpop.xlane.xlu2 %596 }
 0x2b1   :  { %v600_v18 = vpop.xlane.xlu0 %599  ;;  %v613_v0 = vsub.f32 %v5361_v50, %v5382_v17 }
 0x2b2   :  { %v614_v22 = vsub.f32 %v582_v52, %v600_v18 }
 0x2b3   :  { %v5384_v19 = vpop.eup %4641  ;;  %v606_v20 = vpop.xlane.xlu1 %605  ;;  %v624_v2 = vmul.f32 1.442695, %v613_v0 }
 0x2b4   :  { %v616_v21 = vsub.f32 %v584_v55, %v606_v20  ;;  %v640_v12 = vsel %vm371_vm1, %v5384_v19, 0.0  ;;  %v626_v28 = vmul.f32 1.442695, %v614_v22 }
 0x2b5   :  { %641 = vadd.xlane.f32.xlu1 %v640_v12 }
 0x2b6   :  { %v630_v23 = vmul.f32 1.442695, %v616_v21 }
 0x2b8   :  { %4643 = vpow2.f32 %v630_v23  ;;  %v299_v24 = vpop.permute.xlu2 %298 }
 0x2b9   :  { %v325_v25 = vadd.f32 %v324_v57, %v299_v24  ;;  %v5388_v26 = vadd.f32 %v327_v63, %v299_v24  ;;  %v636_v27 = vpop.xlane.xlu0 %635 }
 0x2ba   :  { %4645 = vrcp.f32 %v636_v27  ;;  %v669_v37 = vand.u32 2147483648, %v636_v27  ;;  %v667_v40 = vand.u32 2147483647, %v636_v27  ;;  %vm663_vm3 = vweird.f32 %v636_v27 }
 0x2bb   :  { %796 = vmatpush.msrb.mxu2 %v325_v25  ;;  %819 = vmatpush.msrb.mxu3 %v5388_v26  ;;  %4647 = vpow2.f32 %v626_v28 }
 0x2bc   :  { %v670_v44 = vor.u32 1.1754944e-38, %v669_v37  ;;  %vm668_vm5 = vcmp.eq.f32.partialorder %v667_v40, 8.507059e+37 }
 0x2be   :  { %v5391_v29 = vpop.eup %4643 }
 0x2bf   :  { %v652_v30 = vsel %vm371_vm1, %v5391_v29, 0.0 }
 0x2c0   :  { %v4646_v31 = vpop.eup %4645  ;;  %653 = vadd.xlane.f32.xlu0 %v652_v30 }
 0x2c1   :  { %v659_v32 = vmul.f32 %v4646_v31, %v636_v27  ;;  %v603_v33 = vpop.xlane.xlu0 %602  ;;  %v5395_v36 = vpop.eup %4647  ;;  %vm664_vm2 = vweird.f32 %v4646_v31 }
 0x2c2   :  { %v615_v34 = vsub.f32 %v583_v1, %v603_v33  ;;  %v646_v43 = vsel %vm371_vm1, %v5395_v36, 0.0  ;;  %vm665_vm4 = vmor %vm663_vm3, %vm664_vm2 }
 0x2c3   :  { %v660_v35 = vsub.f32 1.0, %v659_v32 }
 0x2c4   :  { %v628_v38 = vmul.f32 1.442695, %v615_v34 }
 0x2c5   :  { %v661_v39 = vmul.f32 %v4646_v31, %v660_v35  ;;  %v609_v41 = vpop.xlane.xlu1 %608 }
 0x2c6   :  { %4649 = vpow2.f32 %v628_v38  ;;  %v617_v63 = vsub.f32 %v5372_v7, %v609_v41 }
 0x2c7   :  { %v662_v42 = vadd.f32 %v4646_v31, %v661_v39 }
 0x2c8   :  { %647 = vadd.xlane.f32.xlu0 %v646_v43  ;;  %v632_v1 = vmul.f32 1.442695, %v617_v63 }
 0x2c9   :  { %v666_v45 = vsel %vm665_vm4, %v4646_v31, %v662_v42 }
 0x2ca   :  { %v671_v46 = vsel %vm668_vm5, %v670_v44, %v666_v45 }
 0x2cb   :  { %v672_v47 = vmul.f32 %v5367_v59, %v671_v46 }
 0x2cc   :  { %v5400_v48 = vpop.eup %4649 }
 0x2cd   :  { %v639_v49 = vpop.xlane.xlu1 %638  ;;  %4295 = vmatmul.msk.f32.vlgmr.msrb.gmra.mxu2 %vm371_vm1, %v672_v47  ;;  %v649_v51 = vsel %vm371_vm1, %v5400_v48, 0.0 }
 0x2ce   :  { %4651 = vrcp.f32 %v639_v49  ;;  %650 = vadd.xlane.f32.xlu2 %v649_v51  ;;  %357 = vrot.lane.b32.xlu1 %v325_v25, %s5097_s27  ;;  %v684_v55 = vand.u32 2147483648, %v639_v49  ;;  %v682_v57 = vand.u32 2147483647, %v639_v49  ;;  %vm678_vm7 = vweird.f32 %v639_v49 }
 0x2cf   :  { %4653 = vpow2.f32 %v632_v1 }
 0x2d0   :  { %v685_v59 = vor.u32 1.1754944e-38, %v684_v55  ;;  %vm683_vm9 = vcmp.eq.f32.partialorder %v682_v57, 8.507059e+37  ;;  %4655 = vpow2.f32 %v624_v2 }
 0x2d4   :  { %v4652_v52 = vpop.eup %4651 }
 0x2d5   :  { %v674_v53 = vmul.f32 %v4652_v52, %v639_v49  ;;  %vm679_vm6 = vweird.f32 %v4652_v52  ;;  %v5417_v3 = vpop.eup %4653 }
 0x2d6   :  { %363 = vrot.lane.b32.xlu1 %v325_v25, %s5099_s7  ;;  %vm680_vm8 = vmor %vm678_vm7, %vm679_vm6  ;;  %v5419_v4 = vpop.eup %4655  ;;  %v655_v8 = vsel %vm371_vm1, %v5417_v3, 0.0 }
 0x2d7   :  { %v675_v54 = vsub.f32 1.0, %v674_v53 }
 0x2d9   :  { %v676_v56 = vmul.f32 %v4652_v52, %v675_v54 }
 0x2db   :  { %v677_v58 = vadd.f32 %v4652_v52, %v676_v56 }
 0x2dc   :  { %351 = vrot.lane.b32.xlu0 %v325_v25, %s5096_s10 }
 0x2dd   :  { %v681_v60 = vsel %vm680_vm8, %v4652_v52, %v677_v58 }
 0x2de   :  { %353 = vrot.lane.b32.xlu1 %v5388_v26, %s5096_s10  ;;  %v686_v61 = vsel %vm683_vm9, %v685_v59, %v681_v60  ;;  %v4608_v59 = vld [vmem:[%s6512_s8] ss:$0 sm:$0xff] }
 0x2df   :  { %v687_v62 = vmul.f32 %v5378_v11, %v686_v61  ;;  %v643_v11 = vsel %vm371_vm1, %v5419_v4, 0.0 }
 0x2e1   :  { %4296 = vmatmul.msk.f32.vlgmr.msrb.gmra.mxu3 %vm371_vm1, %v687_v62 }
 0x2e6   :  { %359 = vrot.lane.b32.xlu2 %v5388_v26, %s5097_s27 }
 0x306   :  { %656 = vadd.xlane.f32.xlu0 %v655_v8 }
 0x308   :  { %644 = vadd.xlane.f32.xlu1 %v643_v11 }
 0x321   :  { %365 = vrot.lane.b32.xlu1 %v5388_v26, %s5099_s7 }
 0x328   :  { %v642_v50 = vpop.xlane.xlu1 %641 }
 0x329   :  { %4657 = vrcp.f32 %v642_v50  ;;  %v699_v26 = vand.u32 2147483648, %v642_v50  ;;  %vm693_vm11 = vweird.f32 %v642_v50  ;;  %v697_v28 = vand.u32 2147483647, %v642_v50 }
 0x32b   :  { %v700_v39 = vor.u32 1.1754944e-38, %v699_v26  ;;  %vm698_vm15 = vcmp.eq.f32.partialorder %v697_v28, 8.507059e+37 }
 0x32f   :  { %v4658_v13 = vpop.eup %4657 }
 0x330   :  { %v689_v14 = vmul.f32 %v4658_v13, %v642_v50  ;;  %vm694_vm10 = vweird.f32 %v4658_v13 }
 0x331   :  { %vm5434_vm12 = vmor %vm693_vm11, %vm694_vm10 }
 0x332   :  { %v690_v16 = vsub.f32 1.0, %v689_v14 }
 0x333   :  { %v5427_v7 = vpop.xlane.xlu0 %653 }
 0x334   :  { %4659 = vrcp.f32 %v5427_v7  ;;  %v691_v18 = vmul.f32 %v4658_v13, %v690_v16  ;;  %v759_v43 = vand.u32 2147483648, %v5427_v7  ;;  %vm753_vm6 = vweird.f32 %v5427_v7 }
 0x335   :  { %v757_v56 = vand.u32 2147483647, %v5427_v7 }
 0x336   :  { %v692_v24 = vadd.f32 %v4658_v13, %v691_v18  ;;  %v760_v63 = vor.u32 1.1754944e-38, %v759_v43  ;;  %v331_v43 = vld [vmem:[%s6511_s13 + $0x8] sm:$0xff] }
 0x337   :  { %vm758_vm11 = vcmp.eq.f32.partialorder %v757_v56, 8.507059e+37 }
 0x338   :  { %v696_v35 = vsel %vm5434_vm12, %v4658_v13, %v692_v24 }
 0x339   :  { %v701_v47 = vsel %vm698_vm15, %v700_v39, %v696_v35 }
 0x33a   :  { %v5430_v17 = vpop.eup %4659  ;;  %v702_v58 = vmul.f32 %v5384_v19, %v701_v47 }
 0x33b   :  { %v648_v15 = vpop.xlane.xlu0 %647  ;;  %v749_v20 = vmul.f32 %v5430_v17, %v5427_v7  ;;  %vm754_vm4 = vweird.f32 %v5430_v17 }
 0x33c   :  { %4661 = vrcp.f32 %v648_v15  ;;  %v729_v30 = vand.u32 2147483648, %v648_v15  ;;  %v727_v33 = vand.u32 2147483647, %v648_v15  ;;  %vm723_vm14 = vweird.f32 %v648_v15  ;;  %vm5448_vm7 = vmor %vm753_vm6, %vm754_vm4 }
 0x33d   :  { %v750_v25 = vsub.f32 1.0, %v749_v20  ;;  %vm988_vm6 = vcmask 130048  }
 0x33e   :  { %v730_v44 = vor.u32 1.1754944e-38, %v729_v30  ;;  %vm728_vm3 = vcmp.eq.f32.partialorder %v727_v33, 8.507059e+37 }
 0x33f   :  { %v751_v37 = vmul.f32 %v5430_v17, %v750_v25 }
 0x340   :  { %v358_v21 = vpop.permute.xlu1 %357 }
 0x341   :  { %v651_v12 = vpop.xlane.xlu2 %650  ;;  %888 = vmatpush.msra.mxu2 %v358_v21  ;;  %v752_v49 = vadd.f32 %v5430_v17, %v751_v37 }
 0x342   :  { %v4662_v22 = vpop.eup %4661  ;;  %4663 = vrcp.f32 %v651_v12  ;;  %v744_v51 = vand.u32 2147483648, %v651_v12  ;;  %v742_v54 = vand.u32 2147483647, %v651_v12  ;;  %vm738_vm8 = vweird.f32 %v651_v12 }
 0x343   :  { %v719_v23 = vmul.f32 %v4662_v22, %v648_v15  ;;  %vm724_vm13 = vweird.f32 %v4662_v22 }
 0x344   :  { %vm725_vm2 = vmor %vm723_vm14, %vm724_vm13  ;;  %v745_v61 = vor.u32 1.1754944e-38, %v744_v51  ;;  %vm743_vm10 = vcmp.eq.f32.partialorder %v742_v54, 8.507059e+37 }
 0x345   :  { %v720_v27 = vsub.f32 1.0, %v719_v23 }
 0x347   :  { %v721_v32 = vmul.f32 %v4662_v22, %v720_v27 }
 0x348   :  { %v4664_v34 = vpop.eup %4663  ;;  %v364_v38 = vpop.permute.xlu1 %363 }
 0x349   :  { %v722_v40 = vadd.f32 %v4662_v22, %v721_v32  ;;  %v734_v41 = vmul.f32 %v4664_v34, %v651_v12  ;;  %v360_v42 = vpop.permute.xlu2 %359  ;;  %vm739_vm5 = vweird.f32 %v4664_v34 }
 0x34a   :  { %911 = vmatpush.msra.mxu3 %v360_v42  ;;  %vm740_vm9 = vmor %vm738_vm8, %vm739_vm5  ;;  %v332_v42 = vld [vmem:[%s6511_s13 + $0x10] sm:$0xff] }
 0x34b   :  { %v726_v45 = vsel %vm725_vm2, %v4662_v22, %v722_v40  ;;  %v735_v46 = vsub.f32 1.0, %v734_v41  ;;  %v333_v41 = vld [vmem:[%s6511_s13 + $0x18] sm:$0xff] }
 0x34c   :  { %v731_v52 = vsel %vm728_vm3, %v730_v44, %v726_v45  ;;  %1015 = vmatpush.msrb.mxu2 %v333_v41  ;;  %v330_v44 = vld [vmem:[%s6511_s13] sm:$0xff] }
 0x34d   :  { %v736_v53 = vmul.f32 %v4664_v34, %v735_v46  ;;  %v732_v55 = vmul.f32 %v5395_v36, %v731_v52  ;;  %v756_v36 = vsel %vm5448_vm7, %v5430_v17, %v752_v49  ;;  %vm991_vm7 = vcmask 195584  }
 0x34e   :  { %v352_v57 = vpop.permute.xlu0 %351  ;;  %v761_v2 = vsel %vm758_vm11, %v760_v63, %v756_v36  ;;  %1016 = vmatpush.msrb.mxu2 %v332_v42 }
 0x34f   :  { %v737_v60 = vadd.f32 %v4664_v34, %v736_v53  ;;  %842 = vmatpush.msra.mxu0 %v352_v57  ;;  %4299 = vmatmul.msk.f32.vlgmr.msra.gmra.mxu2 %vm371_vm1, %v732_v55  ;;  %v762_v8 = vmul.f32 %v5391_v29, %v761_v2  ;;  %v5102_v2 = vmov 32.0  }
 0x350   :  { %4297 = vmatmul.msk.f32.vlgmr.msra.gmra.mxu0 %vm371_vm1, %v702_v58  ;;  %v354_v62 = vpop.permute.xlu1 %353  ;;  %1017 = vmatpush.msrb.mxu2 %v331_v43 }
 0x351   :  { %v741_v19 = vsel %vm740_vm9, %v4664_v34, %v737_v60  ;;  %934 = vmatpush.msrb.mxu0 %v364_v38  ;;  %865 = vmatpush.msra.mxu1 %v354_v62  ;;  %v798_v34 = vpop.f32.mrf.mxu2 }
 0x352   :  { %v746_v0 = vsel %vm743_vm10, %v745_v61, %v741_v19  ;;  %1018 = vmatpush.msrb.mxu2 %v330_v44  ;;  %v4609_v44 = vld [vmem:[%s6463_s12] ss:$0 sm:$0xff] }
 0x353   :  { %v747_v1 = vmul.f32 %v5400_v48, %v746_v0 }
 0x355   :  { %4300 = vmatmul.msk.f32.vlgmr.msra.gmra.mxu3 %vm371_vm1, %v747_v1 }
 0x358   :  { %4301 = vmatmul.msk.f32.vlgmr.msrb.gmra.mxu0 %vm371_vm1, %v762_v8  ;;  %v244_v8 = vld [vmem:[%s6513_s30 + $0x10] sm:$0xff] }
 0x364   :  { %v821_v37 = vpop.f32.mrf.mxu3 }
 0x379   :  { %v657_v11 = vpop.xlane.xlu0 %656 }
 0x37a   :  { %4665 = vrcp.f32 %v657_v11  ;;  %v774_v24 = vand.u32 2147483648, %v657_v11  ;;  %vm768_vm3 = vweird.f32 %v657_v11  ;;  %v772_v26 = vand.u32 2147483647, %v657_v11 }
 0x37b   :  { %v645_v50 = vpop.xlane.xlu1 %644 }
 0x37c   :  { %4667 = vrcp.f32 %v645_v50  ;;  %v714_v18 = vand.u32 2147483648, %v645_v50  ;;  %v712_v21 = vand.u32 2147483647, %v645_v50  ;;  %vm708_vm13 = vweird.f32 %v645_v50 }
 0x37d   :  { %v775_v30 = vor.u32 1.1754944e-38, %v774_v24  ;;  %vm773_vm5 = vcmp.eq.f32.partialorder %v772_v26, 8.507059e+37  ;;  %4669 = vrcp.f32 %v5102_v2 }
 0x37e   :  { %v715_v29 = vor.u32 1.1754944e-38, %v714_v18  ;;  %vm713_vm2 = vcmp.eq.f32.partialorder %v712_v21, 8.507059e+37 }
 0x380   :  { %v4666_v7 = vpop.eup %4665 }
 0x381   :  { %v764_v13 = vmul.f32 %v4666_v7, %v657_v11  ;;  %vm769_vm15 = vweird.f32 %v4666_v7 }
 0x382   :  { %v4668_v14 = vpop.eup %4667  ;;  %vm770_vm4 = vmor %vm768_vm3, %vm769_vm15 }
 0x383   :  { %v765_v15 = vsub.f32 1.0, %v764_v13  ;;  %v704_v16 = vmul.f32 %v4668_v14, %v645_v50  ;;  %vm709_vm12 = vweird.f32 %v4668_v14  ;;  %v4670_v50 = vpop.eup %4669  ;;  %v242_v13 = vld [vmem:[%s6513_s30] sm:$0xff] }
 0x384   :  { %vm710_vm14 = vmor %vm708_vm13, %vm709_vm12  ;;  %vm1041_vm8 = vweird.f32 %v4670_v50 }
 0x385   :  { %v705_v17 = vsub.f32 1.0, %v704_v16  ;;  %v766_v20 = vmul.f32 %v4666_v7, %v765_v15 }
 0x387   :  { %v706_v48 = vmul.f32 %v4668_v14, %v705_v17  ;;  %v767_v22 = vadd.f32 %v4666_v7, %v766_v20 }
 0x389   :  { %v707_v12 = vadd.f32 %v4668_v14, %v706_v48  ;;  %v771_v28 = vsel %vm770_vm4, %v4666_v7, %v767_v22  ;;  %v1037_v7 = vmul.f32 32.0, %v4670_v50 }
 0x38a   :  { %v776_v31 = vsel %vm773_vm5, %v775_v30, %v771_v28 }
 0x38b   :  { %v711_v23 = vsel %vm710_vm14, %v4668_v14, %v707_v12  ;;  %v777_v33 = vmul.f32 %v5417_v3, %v776_v31  ;;  %v1038_v14 = vsub.f32 1.0, %v1037_v7 }
 0x38c   :  { %v716_v25 = vsel %vm713_vm2, %v715_v29, %v711_v23 }
 0x38d   :  { %v717_v27 = vmul.f32 %v5419_v4, %v716_v25  ;;  %v1039_v15 = vmul.f32 %v4670_v50, %v1038_v14 }
 0x38f   :  { %4298 = vmatmul.msk.f32.vlgmr.msra.gmra.mxu1 %vm371_vm1, %v717_v27  ;;  %v1040_v16 = vadd.f32 %v4670_v50, %v1039_v15 }
 0x391   :  { %v5514_v17 = vsel %vm1041_vm8, %v4670_v50, %v1040_v16 }
 0x393   :  { %v366_v32 = vpop.permute.xlu1 %365 }
 0x394   :  { %957 = vmatpush.msrb.mxu1 %v366_v32 }
 0x397   :  { %4302 = vmatmul.msk.f32.vlgmr.msrb.gmra.mxu1 %vm371_vm1, %v777_v33 }
 0x3cd   :  { %v844_v35 = vpop.f32.mrf.mxu0 }
 0x3ce   :  { %964 = vrot.lane.b32.xlu1 %v844_v35, %s5085_s28 }
 0x3d2   :  { %v890_v38 = vpop.f32.mrf.mxu2 }
 0x3d5   :  { %v936_v4 = vpop.f32.mrf.mxu0 }
 0x3d6   :  { %980 = vrot.lane.b32.xlu0 %v936_v4, %s6485_s26  ;;  %972 = vrot.lane.b32.xlu1 %v890_v38, %s6487_s3 }
 0x3d8   :  { %v913_v39 = vpop.f32.mrf.mxu3 }
 0x3de   :  { %974 = vrot.lane.b32.xlu1 %v913_v39, %s6487_s3  ;;  %v5529_v39 = vld [vmem:[#allocation5] sm:$0xff] }
 0x40c   :  { %v867_v40 = vpop.f32.mrf.mxu1 }
 0x40d   :  { %966 = vrot.lane.b32.xlu2 %v867_v40, %s5085_s28  ;;  %v229_v40 = vld [vmem:[#allocation8] sm:$0xff] }
 0x414   :  { %v959_v3 = vpop.f32.mrf.mxu1 }
 0x415   :  { %982 = vrot.lane.b32.xlu2 %v959_v3, %s6485_s26 }
 0x440   :  { %v965_v45 = vpop.permute.xlu1 %964 }
 0x441   :  { %v986_v46 = vsel %vm371_vm1, %v798_v34, %v965_v45  ;;  %v5535_v45 = vadd.f32 %v229_v40, %v5529_v39 }
 0x448   :  { %v981_v47 = vpop.permute.xlu0 %980  ;;  %v973_v49 = vpop.permute.xlu1 %972 }
 0x449   :  { %v989_v51 = vsel %vm988_vm6, %v986_v46, %v973_v49  ;;  %v4610_v49 = vld [vmem:[#allocation11] ss:$0 sm:$0xff] }
 0x44a   :  { %v992_v52 = vsel %vm991_vm7, %v989_v51, %v981_v47 }
 0x44b   :  { %4303 = vmatmul.msk.f32.vlgmr.msrb.gmra.mxu2 %vm252_vm0, %v992_v52  ;;  %v5539_v52 = vld [vmem:[#allocation5 + $0x8] sm:$0xff] }
 0x450   :  { %v975_v55 = vpop.permute.xlu1 %974 }
 0x467   :  { %v967_v53 = vpop.permute.xlu2 %966 }
 0x468   :  { %v987_v54 = vsel %vm371_vm1, %v821_v37, %v967_v53  ;;  %v230_v53 = vld [vmem:[#allocation8 + $0x8] sm:$0xff] }
 0x469   :  { %v990_v57 = vsel %vm988_vm6, %v987_v54, %v975_v55  ;;  %v5546_v55 = vld [vmem:[%s6514_s6] ss:$0 sm:$0xff] }
 0x46f   :  { %v983_v56 = vpop.permute.xlu2 %982 }
 0x470   :  { %v993_v58 = vsel %vm991_vm7, %v990_v57, %v983_v56  ;;  %v5551_v57 = vadd.f32 %v230_v53, %v5539_v52 }
 0x471   :  { %4304 = vmatmul.msk.f32.gmra.mxu2 %vm252_vm0, %v993_v58  ;;  %v5558_v58 = vld [vmem:[#allocation5 + $0x10] sm:$0xff] }
 0x4ce   :  { %v1020_v60 = vpop.f32.mrf.mxu2 }
 0x4cf   :  { %v1021_v36 = vadd.f32 %v4608_v59, %v1020_v60 }
 0x4d1   :  { %v1026_v61 = vadd.f32 %v1021_v36, %v5301_v5  ;;  %v245_v5 = vld [vmem:[%s6513_s30 + $0x18] sm:$0xff] }
 0x4d2   :  { %v5504_v11 = vpack.i.bf16 %v244_v8, %v245_v5  ;;  %1114 = vmatpush.msrb.mxu3 %v245_v5 }
 0x4d3   :  { %v1030_v62 = vsel %vm252_vm0, %v1026_v61, 0.0 }
 0x4d4   :  { %1031 = vadd.xlane.f32.xlu1 %v1030_v62  ;;  %1115 = vmatpush.msrb.mxu3 %v244_v8  ;;  %v5568_v62 = vld [vmem:[#allocation5 + $0x18] sm:$0xff] }
 0x4ed   :  { %4493 = vrot.lane.b32.xlu1 %v5504_v11, %s5098_s1 }
 0x4f4   :  { %v1023_v63 = vpop.f32.mrf.mxu2 }
 0x4f5   :  { %v1024_v19 = vadd.f32 %v4608_v59, %v1023_v63  ;;  %v231_v59 = vld [vmem:[#allocation8 + $0x10] sm:$0xff]  ;;  %v232_v63 = vld [vmem:[#allocation8 + $0x18] sm:$0xff] }
 0x4f6   :  { %v5561_v60 = vadd.f32 %v231_v59, %v5558_v58 }
 0x4f7   :  { %v1027_v0 = vadd.f32 %v1024_v19, %v5307_v9  ;;  %v243_v9 = vld [vmem:[%s6513_s30 + $0x8] sm:$0xff]  ;;  %v5571_v19 = vadd.f32 %v232_v63, %v5568_v62 }
 0x4f8   :  { %1116 = vmatpush.msrb.mxu3 %v243_v9  ;;  %v5518_v29 = vpack.i.bf16 %v242_v13, %v243_v9 }
 0x4f9   :  { %v1033_v1 = vsel %vm252_vm0, %v1027_v0, 0.0 }
 0x4fa   :  { %1034 = vadd.xlane.f32.xlu2 %v1033_v1  ;;  %1117 = vmatpush.msrb.mxu3 %v242_v13 }
 0x547   :  { %v1032_v18 = vpop.xlane.xlu1 %1031 }
 0x548   :  { %v1043_v20 = vmul.f32 %v5514_v17, %v1032_v18 }
 0x54a   :  { %v1045_v48 = vsub.f32 %v1026_v61, %v1043_v20 }
 0x54c   :  { %v1047_v21 = vmul.f32 %v1045_v48, %v1045_v48 }
 0x54e   :  { %v1049_v12 = vsel %vm252_vm0, %v1047_v21, 0.0 }
 0x54f   :  { %1050 = vadd.xlane.f32.xlu0 %v1049_v12 }
 0x55f   :  { %v4494_v27 = vpop.permute.xlu1 %4493 }
 0x560   :  { %v4495_v28 = vunpack.i.l.bf16 %v4494_v27  ;;  %v4496_v30 = vunpack.i.h.bf16 %v4494_v27 }
 0x562   :  { %1168 = vmatpush.msra.mxu0 %v4495_v28 }
 0x563   :  { %4498 = vrot.lane.b32.xlu0 %v5518_v29, %s5098_s1 }
 0x564   :  { %1169 = vmatpush.msra.mxu0 %v4496_v30 }
 0x56b   :  { %4503 = vrot.lane.b32.xlu0 %v5504_v11, %s5100_s14 }
 0x56d   :  { %v1035_v22 = vpop.xlane.xlu2 %1034 }
 0x56e   :  { %v1044_v23 = vmul.f32 %v5514_v17, %v1035_v22 }
 0x570   :  { %v5523_v24 = vsub.f32 %v1027_v0, %v1044_v23 }
 0x572   :  { %v1048_v25 = vmul.f32 %v5523_v24, %v5523_v24 }
 0x574   :  { %v1052_v26 = vsel %vm252_vm0, %v1048_v25, 0.0 }
 0x575   :  { %1053 = vadd.xlane.f32.xlu2 %v1052_v26 }
 0x58d   :  { %1141 = vrot.lane.b32.xlu2 %v5546_v55, %s5098_s1 }
 0x595   :  { %4508 = vrot.lane.b32.xlu2 %v5518_v29, %s5100_s14 }
 0x5c2   :  { %v1051_v31 = vpop.xlane.xlu0 %1050 }
 0x5c3   :  { %v1055_v32 = vmul.f32 %v1051_v31, %v5514_v17 }
 0x5c5   :  { %v1057_v33 = vadd.f32 1e-05, %v1055_v32 }
 0x5c7   :  { %4671 = vrsqrt.f32 %v1057_v33  ;;  %vm1065_vm10 = vweird.f32 %v1057_v33 }
 0x5cd   :  { %v4672_v34 = vpop.eup %4671 }
 0x5ce   :  { %v1060_v35 = vmul.f32 %v4672_v34, %v1057_v33  ;;  %vm1066_vm9 = vweird.f32 %v4672_v34 }
 0x5cf   :  { %vm1067_vm11 = vmor %vm1065_vm10, %vm1066_vm9 }
 0x5d0   :  { %v1061_v37 = vmul.f32 %v4672_v34, %v1060_v35 }
 0x5d2   :  { %v1062_v38 = vmul.f32 0.5, %v1061_v37 }
 0x5d4   :  { %v1063_v4 = vsub.f32 1.5, %v1062_v38 }
 0x5d5   :  { %v4499_v3 = vpop.permute.xlu0 %4498 }
 0x5d6   :  { %v1064_v41 = vmul.f32 %v4672_v34, %v1063_v4  ;;  %v4501_v42 = vunpack.i.h.bf16 %v4499_v3  ;;  %v4500_v43 = vunpack.i.l.bf16 %v4499_v3 }
 0x5d8   :  { %v1068_v46 = vsel %vm1067_vm11, %v4672_v34, %v1064_v41  ;;  %1170 = vmatpush.msra.mxu0 %v4500_v43 }
 0x5d9   :  { %v1079_v47 = vmul.f32 %v1068_v46, %v1045_v48 }
 0x5da   :  { %1171 = vmatpush.msra.mxu0 %v4501_v42 }
 0x5db   :  { %v1084_v51 = vmul.f32 %v4609_v44, %v1079_v47  ;;  %4307 = vmatmul.msk.f32.vlgmr.msra.gmra.mxu0 %vm252_vm0, %v5535_v45 }
 0x5dd   :  { %v5541_v54 = vadd.f32 %v4610_v49, %v1084_v51  ;;  %v4504_v26 = vpop.permute.xlu0 %4503 }
 0x5de   :  { %v4506_v27 = vunpack.i.h.bf16 %v4504_v26  ;;  %v4505_v28 = vunpack.i.l.bf16 %v4504_v26 }
 0x5df   :  { %v1091_v56 = vadd.f32 %v5541_v54, %v5303_v6 }
 0x5e0   :  { %1224 = vmatpush.msra.mxu1 %v4505_v28 }
 0x5e1   :  { %4305 = vmatmul.msk.f32.vlgmr.msrb.gmra.mxu3 %vm252_vm0, %v1091_v56 }
 0x5e2   :  { %1225 = vmatpush.msra.mxu1 %v4506_v27 }
 0x5e3   :  { %4308 = vmatmul.msk.f32.gmra.mxu0 %vm252_vm0, %v5551_v57 }
 0x5e8   :  { %v1054_v36 = vpop.xlane.xlu2 %1053 }
 0x5e9   :  { %v1056_v6 = vmul.f32 %v1054_v36, %v5514_v17 }
 0x5eb   :  { %v1058_v61 = vadd.f32 1e-05, %v1056_v6  ;;  %4309 = vmatmul.msk.f32.gmra.mxu0 %vm252_vm0, %v5561_v60 }
 0x5ed   :  { %4673 = vrsqrt.f32 %v1058_v61  ;;  %vm1075_vm13 = vweird.f32 %v1058_v61 }
 0x5f0   :  { %v1142_v15 = vpop.permute.xlu2 %1141 }
 0x5f3   :  { %v4674_v0 = vpop.eup %4673  ;;  %4310 = vmatmul.msk.f32.gmra.mxu0 %vm252_vm0, %v5571_v19 }
 0x5f4   :  { %v1070_v1 = vmul.f32 %v4674_v0, %v1058_v61  ;;  %vm1076_vm12 = vweird.f32 %v4674_v0 }
 0x5f5   :  { %vm1077_vm14 = vmor %vm1075_vm13, %vm1076_vm12 }
 0x5f6   :  { %v1071_v2 = vmul.f32 %v4674_v0, %v1070_v1 }
 0x5f8   :  { %v1072_v8 = vmul.f32 0.5, %v1071_v2  ;;  %v4509_v30 = vpop.permute.xlu2 %4508 }
 0x5f9   :  { %v4510_v31 = vunpack.i.l.bf16 %v4509_v30  ;;  %v4511_v32 = vunpack.i.h.bf16 %v4509_v30 }
 0x5fa   :  { %v1073_v5 = vsub.f32 1.5, %v1072_v8 }
 0x5fb   :  { %1226 = vmatpush.msra.mxu1 %v4510_v31 }
 0x5fc   :  { %v1074_v11 = vmul.f32 %v4674_v0, %v1073_v5 }
 0x5fd   :  { %1227 = vmatpush.msra.mxu1 %v4511_v32 }
 0x5fe   :  { %v1078_v50 = vsel %vm1077_vm14, %v4674_v0, %v1074_v11  ;;  %4311 = vmatmul.msk.f32.vlgmr.msra.gmra.mxu1 %vm252_vm0, %v5529_v39 }
 0x5ff   :  { %v1080_v9 = vmul.f32 %v1078_v50, %v5523_v24 }
 0x601   :  { %v1085_v7 = vmul.f32 %v4609_v44, %v1080_v9 }
 0x603   :  { %v5576_v13 = vadd.f32 %v4610_v49, %v1085_v7 }
 0x605   :  { %v1092_v14 = vadd.f32 %v5576_v13, %v5309_v10 }
 0x606   :  { %4312 = vmatmul.msk.f32.gmra.mxu1 %vm252_vm0, %v5539_v52 }
 0x607   :  { %4306 = vmatmul.msk.f32.gmra.mxu3 %vm252_vm0, %v1092_v14 }
 0x60e   :  { %4313 = vmatmul.msk.f32.gmra.mxu1 %vm252_vm0, %v5558_v58 }
 0x616   :  { %4314 = vmatmul.msk.f32.gmra.mxu1 %vm252_vm0, %v5568_v62 }
 0x658   :  { %v1173_v16 = vpop.f32.mrf.mxu0 }
 0x659   :  { %v1174_v18 = vadd.f32 %v1173_v16, %v1142_v15 }
 0x65b   :  { %1272 = vrot.lane.b32.xlu0 %v1174_v18, %s5097_s27 }
 0x660   :  { %v1176_v20 = vpop.f32.mrf.mxu0 }
 0x661   :  { %v1177_v48 = vadd.f32 %v1176_v20, %v1142_v15 }
 0x663   :  { %1282 = vrot.lane.b32.xlu2 %v1177_v48, %s5099_s7  ;;  %1266 = vrot.lane.b32.xlu1 %v1177_v48, %s5096_s10 }
 0x664   :  { %4315 = vmatpush.xpose.msk.msra.mxu2 %vm371_vm1, %v1177_v48  ;;  %v1119_v21 = vpop.f32.mrf.mxu3 }
 0x665   :  { %v1120_v10 = vadd.f32 %v5546_v55, %v1119_v21 }
 0x667   :  { %1248 = vrot.lane.b32.xlu0 %v1120_v10, %s5096_s10 }
 0x668   :  { %4316 = vmatpush.xpose.msk.msra.mxu2 %vm371_vm1, %v1174_v18  ;;  %v1179_v12 = vpop.f32.mrf.mxu0 }
 0x669   :  { %v1180_v29 = vadd.f32 %v1179_v12, %v1142_v15 }
 0x66b   :  { %4317 = vmatmul.msk.f32.vlgmr.msra.gmra.mxu2 %vm371_vm1, %v1120_v10  ;;  %1252 = vrot.lane.b32.xlu2 %v1120_v10, %s5097_s27 }
 0x66c   :  { %1264 = vrot.lane.b32.xlu1 %v1174_v18, %s5096_s10 }
 0x66f   :  { %1268 = vrot.lane.b32.xlu0 %v1180_v29, %s5096_s10 }
 0x670   :  { %v1182_v22 = vpop.f32.mrf.mxu0 }
 0x671   :  { %v1183_v23 = vadd.f32 %v1182_v22, %v1142_v15 }
 0x673   :  { %4318 = vmatpush.xpose.msk.msra.mxu3 %vm371_vm1, %v1183_v23  ;;  %1280 = vrot.lane.b32.xlu2 %v1174_v18, %s5099_s7 }
 0x674   :  { %1274 = vrot.lane.b32.xlu1 %v1177_v48, %s5097_s27 }
 0x677   :  { %4319 = vmatpush.xpose.msk.msra.mxu3 %vm371_vm1, %v1180_v29  ;;  %1278 = vrot.lane.b32.xlu0 %v1183_v23, %s5097_s27 }
 0x67b   :  { %v5637_v1 = vpop.f32.mrf.mxu1 }
 0x67c   :  { %1270 = vrot.lane.b32.xlu1 %v1183_v23, %s5096_s10 }
 0x67f   :  { %1256 = vrot.lane.b32.xlu0 %v1120_v10, %s5099_s7 }
 0x683   :  { %v1232_v16 = vpop.f32.mrf.mxu1 }
 0x687   :  { %1284 = vrot.lane.b32.xlu0 %v1180_v29, %s5099_s7 }
 0x68a   :  { %v1122_v24 = vpop.f32.mrf.mxu3 }
 0x68b   :  { %v1123_v25 = vadd.f32 %v5546_v55, %v1122_v24  ;;  %v1235_v20 = vpop.f32.mrf.mxu1 }
 0x68d   :  { %4320 = vmatmul.msk.f32.vlgmr.msra.gmra.mxu3 %vm371_vm1, %v1123_v25  ;;  %1254 = vrot.lane.b32.xlu2 %v1123_v25, %s5097_s27 }
 0x68e   :  { %1250 = vrot.lane.b32.xlu1 %v1123_v25, %s5096_s10 }
 0x693   :  { %v1238_v12 = vpop.f32.mrf.mxu1 }
 0x695   :  { %1258 = vrot.lane.b32.xlu2 %v1123_v25, %s5099_s7 }
 0x696   :  { %1276 = vrot.lane.b32.xlu1 %v1180_v29, %s5097_s27 }
 0x69e   :  { %1286 = vrot.lane.b32.xlu1 %v1183_v23, %s5099_s7 }
 0x6bd   :  { %v1283_v33 = vpop.permute.xlu2 %1282 }
 0x6be   :  { %4333 = vmatpush.xpose.msk.msrb.mxu0 %vm371_vm1, %v1283_v33 }
 0x6c5   :  { %v1253_v34 = vpop.permute.xlu2 %1252 }
 0x6cd   :  { %v1281_v35 = vpop.permute.xlu2 %1280  ;;  %v1273_v37 = vpop.permute.xlu0 %1272 }
 0x6ce   :  { %4334 = vmatpush.xpose.msk.msrb.mxu0 %vm371_vm1, %v1281_v35 }
 0x6d5   :  { %v1267_v38 = vpop.permute.xlu1 %1266 }
 0x6d6   :  { %4321 = vmatpush.xpose.msk.msrb.mxu2 %vm371_vm1, %v1267_v38 }
 0x6d9   :  { %v1249_v4 = vpop.permute.xlu0 %1248 }
 0x6de   :  { %v1265_v39 = vpop.permute.xlu1 %1264 }
 0x6df   :  { %4322 = vmatpush.xpose.msk.msrb.mxu2 %vm371_vm1, %v1265_v39 }
 0x6e1   :  { %v1269_v40 = vpop.permute.xlu0 %1268 }
 0x6e2   :  { %4323 = vmatmul.msk.f32.vlgmr.msrb.gmra.mxu2 %vm371_vm1, %v1249_v4 }
 0x6e6   :  { %v1275_v3 = vpop.permute.xlu1 %1274 }
 0x6e7   :  { %4327 = vmatpush.xpose.msk.msra.mxu2 %vm371_vm1, %v1275_v3  ;;  %v1255_v52 = vpop.permute.xlu2 %1254 }
 0x6e9   :  { %v1279_v41 = vpop.permute.xlu0 %1278 }
 0x6eb   :  { %4328 = vmatpush.xpose.msk.msra.mxu2 %vm371_vm1, %v1273_v37 }
 0x6ee   :  { %v1271_v42 = vpop.permute.xlu1 %1270  ;;  %v1351_v43 = vpop.f32.mrf.mxu2  ;;  %4329 = vmatmul.msk.f32.vlgmr.msra.gmra.mxu2 %vm371_vm1, %v1253_v34 }
 0x6ef   :  { %v1536_v44 = vmul.f32 0.35355338, %v1351_v43  ;;  %4324 = vmatpush.xpose.msk.msrb.mxu3 %vm371_vm1, %v1271_v42  ;;  %v1259_v6 = vpop.permute.xlu2 %1258 }
 0x6f1   :  { %v1257_v46 = vpop.permute.xlu0 %1256  ;;  %v1544_v47 = vsel %vm988_vm6, %v1536_v44, -inf }
 0x6f2   :  { %1545 = vmax.xlane.f32.xlu1 %v1544_v47  ;;  %4335 = vmatmul.msk.f32.vlgmr.msrb.gmra.mxu0 %vm371_vm1, %v1257_v46 }
 0x6f3   :  { %4325 = vmatpush.xpose.msk.msrb.mxu3 %vm371_vm1, %v1269_v40 }
 0x6f7   :  { %4330 = vmatpush.xpose.msk.msra.mxu3 %vm371_vm1, %v1279_v41 }
 0x6f9   :  { %v1285_v36 = vpop.permute.xlu0 %1284 }
 0x700   :  { %v1251_v49 = vpop.permute.xlu1 %1250 }
 0x701   :  { %4326 = vmatmul.msk.f32.vlgmr.msrb.gmra.mxu3 %vm371_vm1, %v1251_v49 }
 0x708   :  { %v1277_v51 = vpop.permute.xlu1 %1276 }
 0x709   :  { %4331 = vmatpush.xpose.msk.msra.mxu3 %vm371_vm1, %v1277_v51 }
 0x70c   :  { %4332 = vmatmul.msk.f32.vlgmr.msra.gmra.mxu3 %vm371_vm1, %v1255_v52 }
 0x710   :  { %v1287_v53 = vpop.permute.xlu1 %1286  ;;  %v1377_v56 = vpop.f32.mrf.mxu3 }
 0x711   :  { %v1537_v58 = vmul.f32 0.35355338, %v1377_v56  ;;  %4336 = vmatpush.xpose.msk.msrb.mxu1 %vm371_vm1, %v1287_v53 }
 0x713   :  { %v1547_v59 = vsel %vm988_vm6, %v1537_v58, -inf }
 0x714   :  { %1548 = vmax.xlane.f32.xlu1 %v1547_v59 }
 0x715   :  { %4337 = vmatpush.xpose.msk.msrb.mxu1 %vm371_vm1, %v1285_v36 }
 0x718   :  { %4338 = vmatmul.msk.f32.vlgmr.msrb.gmra.mxu1 %vm371_vm1, %v1259_v6 }
 0x765   :  { %v1546_v61 = vpop.xlane.xlu1 %1545  ;;  %v1403_v0 = vpop.f32.mrf.mxu2 }
 0x766   :  { %v1568_v62 = vsub.f32 %v1536_v44, %v1546_v61  ;;  %v1538_v15 = vmul.f32 0.35355338, %v1403_v0 }
 0x768   :  { %v1576_v63 = vmul.f32 1.442695, %v1568_v62  ;;  %v1550_v18 = vsel %vm988_vm6, %v1538_v15, -inf }
 0x76a   :  { %4675 = vpow2.f32 %v1576_v63 }
 0x76f   :  { %v1507_v2 = vpop.f32.mrf.mxu0 }
 0x770   :  { %v5639_v8 = vpop.eup %4675  ;;  %v5641_v5 = vmul.f32 0.35355338, %v1507_v2 }
 0x771   :  { %v1455_v11 = vpop.f32.mrf.mxu2  ;;  %v1592_v50 = vsel %vm988_vm6, %v5639_v8, 0.0 }
 0x772   :  { %v5645_v9 = vmul.f32 0.35355338, %v1455_v11  ;;  %1593 = vadd.xlane.f32.xlu1 %v1592_v50  ;;  %v1562_v7 = vsel %vm988_vm6, %v5641_v5, -inf }
 0x773   :  { %1563 = vmax.xlane.f32.xlu0 %v1562_v7 }
 0x774   :  { %v1556_v14 = vsel %vm988_vm6, %v5645_v9, -inf }
 0x775   :  { %1557 = vmax.xlane.f32.xlu2 %v1556_v14 }
 0x77b   :  { %1551 = vmax.xlane.f32.xlu0 %v1550_v18 }
 0x784   :  { %v1429_v48 = vpop.f32.mrf.mxu3 }
 0x785   :  { %v5652_v21 = vmul.f32 0.35355338, %v1429_v48 }
 0x787   :  { %v1553_v10 = vsel %vm988_vm6, %v5652_v21, -inf  ;;  %v1549_v29 = vpop.xlane.xlu1 %1548 }
 0x788   :  { %1554 = vmax.xlane.f32.xlu2 %v1553_v10  ;;  %v1569_v22 = vsub.f32 %v1537_v58, %v1549_v29 }
 0x78a   :  { %v1578_v26 = vmul.f32 1.442695, %v1569_v22 }
 0x78c   :  { %4677 = vpow2.f32 %v1578_v26 }
 0x78f   :  { %v1481_v23 = vpop.f32.mrf.mxu3 }
 0x790   :  { %v1541_v24 = vmul.f32 0.35355338, %v1481_v23 }
 0x792   :  { %v1559_v25 = vsel %vm988_vm6, %v1541_v24, -inf  ;;  %v5661_v31 = vpop.eup %4677 }
 0x793   :  { %1560 = vmax.xlane.f32.xlu1 %v1559_v25  ;;  %v1595_v32 = vsel %vm988_vm6, %v5661_v31, 0.0 }
 0x795   :  { %v1533_v27 = vpop.f32.mrf.mxu1 }
 0x796   :  { %v5657_v28 = vmul.f32 0.35355338, %v1533_v27 }
 0x798   :  { %v1565_v30 = vsel %vm988_vm6, %v5657_v28, -inf }
 0x799   :  { %1566 = vmax.xlane.f32.xlu0 %v1565_v30 }
 0x7a0   :  { %1197 = vrot.lane.b32.xlu2 %v5546_v55, %s5100_s14 }
 0x7a1   :  { %1596 = vadd.xlane.f32.xlu0 %v1595_v32 }
 0x7e5   :  { %v1594_v33 = vpop.xlane.xlu1 %1593 }
 0x7e6   :  { %v1564_v34 = vpop.xlane.xlu0 %1563  ;;  %4679 = vrcp.f32 %v1594_v33  ;;  %v1625_v46 = vand.u32 2147483647, %v1594_v33  ;;  %v1627_v47 = vand.u32 2147483648, %v1594_v33  ;;  %vm1621_vm2 = vweird.f32 %v1594_v33 }
 0x7e7   :  { %v1574_v18 = vsub.f32 %v5641_v5, %v1564_v34 }
 0x7e8   :  { %v5667_v40 = vpop.xlane.xlu2 %1557  ;;  %vm1626_vm4 = vcmp.eq.f32.partialorder %v1625_v46, 8.507059e+37  ;;  %v1628_v51 = vor.u32 1.1754944e-38, %v1627_v47 }
 0x7e9   :  { %v1588_v29 = vmul.f32 1.442695, %v1574_v18  ;;  %v1572_v26 = vsub.f32 %v5645_v9, %v5667_v40 }
 0x7eb   :  { %v1584_v27 = vmul.f32 1.442695, %v1572_v26 }
 0x7ec   :  { %v4680_v37 = vpop.eup %4679 }
 0x7ed   :  { %v1617_v39 = vmul.f32 %v4680_v37, %v1594_v33  ;;  %vm1622_vm15 = vweird.f32 %v4680_v37 }
 0x7ee   :  { %v1552_v35 = vpop.xlane.xlu0 %1551  ;;  %vm1623_vm3 = vmor %vm1621_vm2, %vm1622_vm15 }
 0x7ef   :  { %v1570_v38 = vsub.f32 %v1538_v15, %v1552_v35  ;;  %v1618_v3 = vsub.f32 1.0, %v1617_v39 }
 0x7f1   :  { %v1580_v4 = vmul.f32 1.442695, %v1570_v38  ;;  %v1619_v42 = vmul.f32 %v4680_v37, %v1618_v3 }
 0x7f3   :  { %4681 = vpow2.f32 %v1580_v4  ;;  %v1620_v44 = vadd.f32 %v4680_v37, %v1619_v42 }
 0x7f5   :  { %v1624_v49 = vsel %vm1623_vm3, %v4680_v37, %v1620_v44 }
 0x7f6   :  { %v1629_v36 = vsel %vm1626_vm4, %v1628_v51, %v1624_v49 }
 0x7f7   :  { %v1630_v0 = vmul.f32 %v5639_v8, %v1629_v36 }
 0x7f9   :  { %v5669_v41 = vpop.eup %4681 }
 0x7fa   :  { %v1598_v43 = vsel %vm988_vm6, %v5669_v41, 0.0 }
 0x7fb   :  { %1599 = vadd.xlane.f32.xlu0 %v1598_v43  ;;  %v1555_v55 = vpop.xlane.xlu2 %1554 }
 0x7fc   :  { %v1571_v25 = vsub.f32 %v5652_v21, %v1555_v55 }
 0x7fe   :  { %v1582_v5 = vmul.f32 1.442695, %v1571_v25 }
 0x803   :  { %v1198_v52 = vpop.permute.xlu2 %1197 }
 0x804   :  { %v1230_v53 = vadd.f32 %v5637_v1, %v1198_v52  ;;  %v1233_v56 = vadd.f32 %v1232_v16, %v1198_v52  ;;  %v1239_v58 = vadd.f32 %v1238_v12, %v1198_v52  ;;  %v1236_v59 = vadd.f32 %v1235_v20, %v1198_v52 }
 0x806   :  { %v1561_v6 = vpop.xlane.xlu1 %1560  ;;  %1753 = vmatpush.msrb.mxu2 %v1233_v56  ;;  %1776 = vmatpush.msrb.mxu3 %v1239_v58  ;;  %v4512_v61 = vpack.i.bf16 %v1230_v53, %v1233_v56  ;;  %v4527_v63 = vpack.i.bf16 %v1236_v59, %v1239_v58 }
 0x807   :  { %v1573_v62 = vsub.f32 %v1541_v24, %v1561_v6 }
 0x808   :  { %1777 = vmatpush.msrb.mxu3 %v1236_v59  ;;  %4513 = vrot.lane.b32.xlu1 %v4512_v61, %s5096_s10 }
 0x809   :  { %v1586_v2 = vmul.f32 1.442695, %v1573_v62  ;;  %1754 = vmatpush.msrb.mxu2 %v1230_v53 }
 0x80a   :  { %4339 = vmatmul.msk.f32.vlgmr.msrb.gmra.mxu2 %vm988_vm6, %v1630_v0 }
 0x80b   :  { %4683 = vpow2.f32 %v1586_v2 }
 0x80c   :  { %v1567_v1 = vpop.xlane.xlu0 %1566 }
 0x80d   :  { %v1575_v32 = vsub.f32 %v5657_v28, %v1567_v1 }
 0x80f   :  { %4518 = vrot.lane.b32.xlu0 %v4512_v61, %s5097_s27  ;;  %v1590_v21 = vmul.f32 1.442695, %v1575_v32 }
 0x811   :  { %v5678_v11 = vpop.eup %4683 }
 0x812   :  { %v1607_v50 = vsel %vm988_vm6, %v5678_v11, 0.0 }
 0x813   :  { %1608 = vadd.xlane.f32.xlu2 %v1607_v50 }
 0x814   :  { %v1597_v7 = vpop.xlane.xlu0 %1596 }
 0x815   :  { %4685 = vrcp.f32 %v1597_v7  ;;  %v1642_v8 = vand.u32 2147483648, %v1597_v7  ;;  %v1640_v48 = vand.u32 2147483647, %v1597_v7  ;;  %vm1636_vm8 = vweird.f32 %v1597_v7 }
 0x816   :  { %4687 = vpow2.f32 %v1588_v29 }
 0x817   :  { %v1643_v12 = vor.u32 1.1754944e-38, %v1642_v8  ;;  %vm1641_vm10 = vcmp.eq.f32.partialorder %v1640_v48, 8.507059e+37  ;;  %4689 = vpow2.f32 %v1582_v5 }
 0x818   :  { %4691 = vpow2.f32 %v1584_v27 }
 0x819   :  { %4693 = vpow2.f32 %v1590_v21 }
 0x81b   :  { %v4686_v14 = vpop.eup %4685 }
 0x81c   :  { %v1632_v15 = vmul.f32 %v4686_v14, %v1597_v7  ;;  %vm1637_vm5 = vweird.f32 %v4686_v14  ;;  %v5689_v30 = vpop.eup %4687 }
 0x81d   :  { %vm1638_vm9 = vmor %vm1636_vm8, %vm1637_vm5  ;;  %v5694_v33 = vpop.eup %4689 }
 0x81e   :  { %v1633_v16 = vsub.f32 1.0, %v1632_v15  ;;  %v5696_v9 = vpop.eup %4691  ;;  %v1601_v34 = vsel %vm988_vm6, %v5694_v33, 0.0 }
 0x81f   :  { %v1604_v35 = vsel %vm988_vm6, %v5696_v9, 0.0  ;;  %v5702_v28 = vpop.eup %4693 }
 0x820   :  { %v1634_v20 = vmul.f32 %v4686_v14, %v1633_v16  ;;  %v1613_v37 = vsel %vm988_vm6, %v5702_v28, 0.0 }
 0x822   :  { %v1635_v10 = vadd.f32 %v4686_v14, %v1634_v20 }
 0x824   :  { %v1639_v22 = vsel %vm1638_vm9, %v4686_v14, %v1635_v10 }
 0x825   :  { %v1644_v23 = vsel %vm1641_vm10, %v1643_v12, %v1639_v22 }
 0x826   :  { %v1645_v24 = vmul.f32 %v5661_v31, %v1644_v23  ;;  %v1610_v31 = vsel %vm988_vm6, %v5689_v30, 0.0 }
 0x828   :  { %4340 = vmatmul.msk.f32.vlgmr.msrb.gmra.mxu3 %vm988_vm6, %v1645_v24 }
 0x82b   :  { %4533 = vrot.lane.b32.xlu2 %v4527_v63, %s5097_s27 }
 0x832   :  { %1611 = vadd.xlane.f32.xlu1 %v1610_v31 }
 0x839   :  { %1602 = vadd.xlane.f32.xlu0 %v1601_v34 }
 0x83a   :  { %1605 = vadd.xlane.f32.xlu1 %v1604_v35 }
 0x841   :  { %1614 = vadd.xlane.f32.xlu0 %v1613_v37 }
 0x853   :  { %4523 = vrot.lane.b32.xlu1 %v4512_v61, %s5099_s7 }
 0x85b   :  { %4528 = vrot.lane.b32.xlu1 %v4527_v63, %s5096_s10 }
 0x863   :  { %4538 = vrot.lane.b32.xlu1 %v4527_v63, %s5099_s7 }
 0x86e   :  { %v1600_v38 = vpop.xlane.xlu0 %1599 }
 0x86f   :  { %4695 = vrcp.f32 %v1600_v38  ;;  %v1657_v3 = vand.u32 2147483648, %v1600_v38  ;;  %v1655_v43 = vand.u32 2147483647, %v1600_v38  ;;  %vm1651_vm12 = vweird.f32 %v1600_v38 }
 0x871   :  { %v1658_v47 = vor.u32 1.1754944e-38, %v1657_v3  ;;  %vm1656_vm14 = vcmp.eq.f32.partialorder %v1655_v43, 8.507059e+37 }
 0x875   :  { %v4696_v4 = vpop.eup %4695 }
 0x876   :  { %v1647_v39 = vmul.f32 %v4696_v4, %v1600_v38  ;;  %vm1652_vm11 = vweird.f32 %v4696_v4 }
 0x877   :  { %vm1653_vm13 = vmor %vm1651_vm12, %vm1652_vm11 }
 0x878   :  { %v1648_v40 = vsub.f32 1.0, %v1647_v39 }
 0x87a   :  { %v1649_v42 = vmul.f32 %v4696_v4, %v1648_v40  ;;  %v4514_v55 = vpop.permute.xlu1 %4513 }
 0x87b   :  { %v4515_v44 = vunpack.i.l.bf16 %v4514_v55  ;;  %v4516_v49 = vunpack.i.h.bf16 %v4514_v55 }
 0x87c   :  { %v1650_v46 = vadd.f32 %v4696_v4, %v1649_v42 }
 0x87d   :  { %1799 = vmatpush.msra.mxu0 %v4515_v44 }
 0x87e   :  { %v1654_v51 = vsel %vm1653_vm13, %v4696_v4, %v1650_v46 }
 0x87f   :  { %v1659_v52 = vsel %vm1656_vm14, %v1658_v47, %v1654_v51  ;;  %1800 = vmatpush.msra.mxu0 %v4516_v49 }
 0x880   :  { %v1660_v53 = vmul.f32 %v5669_v41, %v1659_v52 }
 0x881   :  { %v4519_v56 = vpop.permute.xlu0 %4518 }
 0x882   :  { %v4520_v58 = vunpack.i.l.bf16 %v4519_v56  ;;  %4341 = vmatmul.msk.f32.vlgmr.msra.gmra.mxu0 %vm988_vm6, %v1660_v53  ;;  %v4521_v59 = vunpack.i.h.bf16 %v4519_v56 }
 0x884   :  { %1845 = vmatpush.msra.mxu2 %v4520_v58 }
 0x886   :  { %1846 = vmatpush.msra.mxu2 %v4521_v59  ;;  %v1609_v36 = vpop.xlane.xlu2 %1608 }
 0x887   :  { %4697 = vrcp.f32 %v1609_v36  ;;  %v1702_v2 = vand.u32 2147483648, %v1609_v36  ;;  %v1700_v41 = vand.u32 2147483647, %v1609_v36  ;;  %vm1696_vm2 = vweird.f32 %v1609_v36 }
 0x889   :  { %v1703_v14 = vor.u32 1.1754944e-38, %v1702_v2  ;;  %vm1701_vm4 = vcmp.eq.f32.partialorder %v1700_v41, 8.507059e+37 }
 0x88d   :  { %v4698_v6 = vpop.eup %4697 }
 0x88e   :  { %v1692_v61 = vmul.f32 %v4698_v6, %v1609_v36  ;;  %v4534_v62 = vpop.permute.xlu2 %4533  ;;  %vm1697_vm15 = vweird.f32 %v4698_v6 }
 0x88f   :  { %v4535_v63 = vunpack.i.l.bf16 %v4534_v62  ;;  %v4536_v1 = vunpack.i.h.bf16 %v4534_v62  ;;  %vm1698_vm3 = vmor %vm1696_vm2, %vm1697_vm15 }
 0x890   :  { %v1693_v0 = vsub.f32 1.0, %v1692_v61 }
 0x891   :  { %1868 = vmatpush.msra.mxu3 %v4535_v63 }
 0x892   :  { %v1694_v50 = vmul.f32 %v4698_v6, %v1693_v0 }
 0x893   :  { %1869 = vmatpush.msra.mxu3 %v4536_v1 }
 0x894   :  { %v1695_v7 = vadd.f32 %v4698_v6, %v1694_v50 }
 0x896   :  { %v1699_v15 = vsel %vm1698_vm3, %v4698_v6, %v1695_v7 }
 0x897   :  { %v1704_v16 = vsel %vm1701_vm4, %v1703_v14, %v1699_v15 }
 0x898   :  { %v1705_v8 = vmul.f32 %v5678_v11, %v1704_v16 }
 0x89a   :  { %4344 = vmatmul.msk.f32.vlgmr.msra.gmra.mxu3 %vm988_vm6, %v1705_v8 }
 0x8a5   :  { %v1612_v18 = vpop.xlane.xlu1 %1611 }
 0x8a6   :  { %4699 = vrcp.f32 %v1612_v18  ;;  %v1717_v3 = vand.u32 2147483648, %v1612_v18  ;;  %vm1711_vm12 = vweird.f32 %v1612_v18  ;;  %v1715_v42 = vand.u32 2147483647, %v1612_v18 }
 0x8a8   :  { %v1718_v46 = vor.u32 1.1754944e-38, %v1717_v3  ;;  %vm1716_vm14 = vcmp.eq.f32.partialorder %v1715_v42, 8.507059e+37  ;;  %v4612_v3 = vld [vmem:[%s6462_s11] ss:$0 sm:$0xff] }
 0x8ac   :  { %v1603_v20 = vpop.xlane.xlu0 %1602  ;;  %v4700_v10 = vpop.eup %4699 }
 0x8ad   :  { %v1606_v48 = vpop.xlane.xlu1 %1605  ;;  %v1707_v12 = vmul.f32 %v4700_v10, %v1612_v18  ;;  %vm1712_vm11 = vweird.f32 %v4700_v10  ;;  %vm1666_vm2 = vweird.f32 %v1603_v20  ;;  %v1670_v58 = vand.u32 2147483647, %v1603_v20 }
 0x8ae   :  { %4701 = vrcp.f32 %v1606_v48  ;;  %v1687_v5 = vand.u32 2147483648, %v1606_v48  ;;  %v1685_v11 = vand.u32 2147483647, %v1606_v48  ;;  %vm1681_vm8 = vweird.f32 %v1606_v48  ;;  %vm1713_vm13 = vmor %vm1711_vm12, %vm1712_vm11 }
 0x8af   :  { %4703 = vrcp.f32 %v1603_v20  ;;  %v1708_v23 = vsub.f32 1.0, %v1707_v12  ;;  %vm1671_vm4 = vcmp.eq.f32.partialorder %v1670_v58, 8.507059e+37  ;;  %v1756_v12 = vpop.f32.mrf.mxu2 }
 0x8b0   :  { %v1688_v34 = vor.u32 1.1754944e-38, %v1687_v5  ;;  %vm1686_vm10 = vcmp.eq.f32.partialorder %v1685_v11, 8.507059e+37  ;;  %v1241_v5 = vld [vmem:[#allocation10] sm:$0xff] }
 0x8b1   :  { %v1709_v32 = vmul.f32 %v4700_v10, %v1708_v23 }
 0x8b3   :  { %v1710_v38 = vadd.f32 %v4700_v10, %v1709_v32 }
 0x8b4   :  { %v4702_v29 = vpop.eup %4701  ;;  %v5713_v25 = vpop.xlane.xlu0 %1614 }
 0x8b5   :  { %v1677_v22 = vmul.f32 %v4702_v29, %v1606_v48  ;;  %v4704_v26 = vpop.eup %4703  ;;  %vm1682_vm5 = vweird.f32 %v4702_v29  ;;  %4705 = vrcp.f32 %v5713_v25  ;;  %v1714_v43 = vsel %vm1713_vm13, %v4700_v10, %v1710_v38 }
 0x8b6   :  { %v1662_v31 = vmul.f32 %v4704_v26, %v1603_v20  ;;  %vm1683_vm9 = vmor %vm1681_vm8, %vm1682_vm5  ;;  %v1719_v51 = vsel %vm1716_vm14, %v1718_v46, %v1714_v43  ;;  %vm1667_vm15 = vweird.f32 %v4704_v26  ;;  %v1732_v1 = vand.u32 2147483648, %v5713_v25 }
 0x8b7   :  { %v1678_v24 = vsub.f32 1.0, %v1677_v22  ;;  %v1720_v59 = vmul.f32 %v5689_v30, %v1719_v51  ;;  %vm1668_vm3 = vmor %vm1666_vm2, %vm1667_vm15  ;;  %vm1726_vm8 = vweird.f32 %v5713_v25  ;;  %v1730_v30 = vand.u32 2147483647, %v5713_v25 }
 0x8b8   :  { %v1663_v4 = vsub.f32 1.0, %v1662_v31  ;;  %v1733_v14 = vor.u32 1.1754944e-38, %v1732_v1 }
 0x8b9   :  { %v1679_v27 = vmul.f32 %v4702_v29, %v1678_v24  ;;  %v1244_v24 = vld [vmem:[#allocation10 + $0x18] sm:$0xff] }
 0x8ba   :  { %v1664_v55 = vmul.f32 %v4704_v26, %v1663_v4  ;;  %1971 = vmatpush.msrb.mxu2 %v1244_v24  ;;  %v4614_v24 = vld [vmem:[%s6466_s15] ss:$0 sm:$0xff] }
 0x8bb   :  { %v1680_v21 = vadd.f32 %v4702_v29, %v1679_v27  ;;  %v4706_v40 = vpop.eup %4705 }
 0x8bc   :  { %v1722_v44 = vmul.f32 %v4706_v40, %v5713_v25  ;;  %v1665_v52 = vadd.f32 %v4704_v26, %v1664_v55  ;;  %vm1727_vm5 = vweird.f32 %v4706_v40  ;;  %v1243_v25 = vld [vmem:[#allocation10 + $0x10] sm:$0xff] }
 0x8bd   :  { %v1684_v35 = vsel %vm1683_vm9, %v4702_v29, %v1680_v21  ;;  %vm1728_vm9 = vmor %vm1726_vm8, %vm1727_vm5  ;;  %1972 = vmatpush.msrb.mxu2 %v1243_v25 }
 0x8be   :  { %v1689_v37 = vsel %vm1686_vm10, %v1688_v34, %v1684_v35  ;;  %v1723_v53 = vsub.f32 1.0, %v1722_v44  ;;  %v1669_v36 = vsel %vm1668_vm3, %v4704_v26, %v1665_v52  ;;  %vm1731_vm10 = vcmp.eq.f32.partialorder %v1730_v30, 8.507059e+37  ;;  %v1242_v26 = vld [vmem:[#allocation10 + $0x8] sm:$0xff]  ;;  %v2086_v30 = vld [vmem:[%s6471_s20 + $0x38] sm:$0xff] }
 0x8bf   :  { %v1690_v39 = vmul.f32 %v5696_v9, %v1689_v37  ;;  %v1672_v9 = vand.u32 2147483648, %v1603_v20  ;;  %1973 = vmatpush.msrb.mxu2 %v1242_v26  ;;  %vm2091_vm3 = vcmask 523264  }
 0x8c0   :  { %v1724_v6 = vmul.f32 %v4706_v40, %v1723_v53 }
 0x8c1   :  { %4343 = vmatmul.msk.f32.vlgmr.msra.gmra.mxu2 %vm988_vm6, %v1690_v39  ;;  %v1673_v61 = vor.u32 1.1754944e-38, %v1672_v9 }
 0x8c2   :  { %v1725_v2 = vadd.f32 %v4706_v40, %v1724_v6  ;;  %1974 = vmatpush.msrb.mxu2 %v1241_v5 }
 0x8c3   :  { %v1674_v63 = vsel %vm1671_vm4, %v1673_v61, %v1669_v36 }
 0x8c4   :  { %v1675_v41 = vmul.f32 %v5694_v33, %v1674_v63  ;;  %v1729_v7 = vsel %vm1728_vm9, %v4706_v40, %v1725_v2  ;;  %v1779_v33 = vpop.f32.mrf.mxu3  ;;  %v2041_v63 = vld [vmem:[#allocation16 + $0x8] sm:$0xff] }
 0x8c5   :  { %v4524_v47 = vpop.permute.xlu1 %4523  ;;  %v1734_v16 = vsel %vm1731_vm10, %v1733_v14, %v1729_v7 }
 0x8c6   :  { %v4525_v49 = vunpack.i.l.bf16 %v4524_v47  ;;  %v4526_v56 = vunpack.i.h.bf16 %v4524_v47  ;;  %v1735_v20 = vmul.f32 %v5702_v28, %v1734_v16 }
 0x8c8   :  { %1891 = vmatpush.msrb.mxu0 %v4525_v49 }
 0x8ca   :  { %1892 = vmatpush.msrb.mxu0 %v4526_v56 }
 0x8cb   :  { %4345 = vmatmul.msk.f32.vlgmr.msrb.gmra.mxu0 %vm988_vm6, %v1720_v59 }
 0x8cd   :  { %v4529_v62 = vpop.permute.xlu1 %4528 }
 0x8ce   :  { %v4530_v0 = vunpack.i.l.bf16 %v4529_v62  ;;  %v4531_v50 = vunpack.i.h.bf16 %v4529_v62  ;;  %v2042_v62 = vld [vmem:[#allocation16 + $0x10] sm:$0xff] }
 0x8d0   :  { %1822 = vmatpush.msra.mxu1 %v4530_v0  ;;  %v2040_v0 = vld [vmem:[#allocation16] sm:$0xff] }
 0x8d2   :  { %1823 = vmatpush.msra.mxu1 %v4531_v50 }
 0x8d3   :  { %4342 = vmatmul.msk.f32.vlgmr.msra.gmra.mxu1 %vm988_vm6, %v1675_v41  ;;  %v2085_v41 = vld [vmem:[%s6471_s20 + $0x30] sm:$0xff] }
 0x8d5   :  { %v4539_v15 = vpop.permute.xlu1 %4538 }
 0x8d6   :  { %v4540_v8 = vunpack.i.l.bf16 %v4539_v15  ;;  %v4541_v18 = vunpack.i.h.bf16 %v4539_v15  ;;  %v2084_v15 = vld [vmem:[%s6471_s20 + $0x28] sm:$0xff] }
 0x8d8   :  { %1914 = vmatpush.msrb.mxu1 %v4540_v8 }
 0x8da   :  { %1915 = vmatpush.msrb.mxu1 %v4541_v18 }
 0x8db   :  { %4346 = vmatmul.msk.f32.vlgmr.msrb.gmra.mxu1 %vm988_vm6, %v1735_v20  ;;  %v2083_v20 = vld [vmem:[%s6471_s20 + $0x20] sm:$0xff] }
 0x8ff   :  { %v1802_v48 = vpop.f32.mrf.mxu0 }
 0x900   :  { %1922 = vrot.lane.b32.xlu1 %v1802_v48, %s5085_s28 }
 0x91d   :  { %v1871_v10 = vpop.f32.mrf.mxu3 }
 0x91e   :  { %1932 = vrot.lane.b32.xlu0 %v1871_v10, %s6487_s3  ;;  %v2082_v10 = vld [vmem:[%s6471_s20 + $0x18] sm:$0xff] }
 0x944   :  { %v1848_v29 = vpop.f32.mrf.mxu2 }
 0x945   :  { %1930 = vrot.lane.b32.xlu1 %v1848_v29, %s6487_s3 }
 0x948   :  { %v1894_v22 = vpop.f32.mrf.mxu0 }
 0x949   :  { %1938 = vrot.lane.b32.xlu2 %v1894_v22, %s6485_s26  ;;  %v4613_v22 = vld [vmem:[#allocation13] ss:$0 sm:$0xff] }
 0x950   :  { %v1825_v23 = vpop.f32.mrf.mxu1 }
 0x951   :  { %1924 = vrot.lane.b32.xlu1 %v1825_v23, %s5085_s28 }
 0x958   :  { %v1917_v28 = vpop.f32.mrf.mxu1 }
 0x959   :  { %1940 = vrot.lane.b32.xlu2 %v1917_v28, %s6485_s26 }
 0x972   :  { %v1923_v27 = vpop.permute.xlu1 %1922 }
 0x973   :  { %v1944_v11 = vsel %vm371_vm1, %v1756_v12, %v1923_v27 }
 0x990   :  { %v1933_v37 = vpop.permute.xlu0 %1932 }
 0x9a3   :  { %v1939_v31 = vpop.permute.xlu2 %1938 }
 0x9b3   :  { %v1941_v4 = vpop.permute.xlu2 %1940 }
 0x9b7   :  { %v1931_v32 = vpop.permute.xlu1 %1930 }
 0x9b8   :  { %v1946_v21 = vsel %vm988_vm6, %v1944_v11, %v1931_v32 }
 0x9b9   :  { %v1948_v34 = vsel %vm991_vm7, %v1946_v21, %v1939_v31 }
 0x9ba   :  { %4347 = vmatmul.msk.f32.vlgmr.msrb.gmra.mxu2 %vm252_vm0, %v1948_v34 }
 0x9c3   :  { %v1925_v35 = vpop.permute.xlu1 %1924 }
 0x9c4   :  { %v1945_v38 = vsel %vm371_vm1, %v1779_v33, %v1925_v35 }
 0x9c5   :  { %v1947_v39 = vsel %vm988_vm6, %v1945_v38, %v1933_v37 }
 0x9c6   :  { %v1949_v40 = vsel %vm991_vm7, %v1947_v39, %v1941_v4  ;;  %v2081_v4 = vld [vmem:[%s6471_s20 + $0x10] sm:$0xff]  ;;  %v2080_v39 = vld [vmem:[%s6471_s20 + $0x8] sm:$0xff] }
 0x9c7   :  { %4348 = vmatmul.msk.f32.gmra.mxu2 %vm252_vm0, %v1949_v40  ;;  %v2079_v40 = vld [vmem:[%s6471_s20] sm:$0xff] }
 0xa3d   :  { %v1976_v42 = vpop.f32.mrf.mxu2 }
 0xa3e   :  { %v1977_v43 = vadd.f32 %v4612_v3, %v1976_v42 }
 0xa40   :  { %v1982_v55 = vadd.f32 %v1977_v43, %v5541_v54 }
 0xa42   :  { %v1986_v44 = vsel %vm252_vm0, %v1982_v55, 0.0 }
 0xa43   :  { %1987 = vadd.xlane.f32.xlu1 %v1986_v44 }
 0xa4a   :  { %v1979_v46 = vpop.f32.mrf.mxu2 }
 0xa4b   :  { %v1980_v47 = vadd.f32 %v4612_v3, %v1979_v46  ;;  %v4615_v3 = vld [vmem:[%s6470_s19] ss:$0 sm:$0xff] }
 0xa4d   :  { %v1983_v49 = vadd.f32 %v1980_v47, %v5576_v13  ;;  %v2043_v13 = vld [vmem:[#allocation16 + $0x18] sm:$0xff] }
 0xa4e   :  { %2066 = vmatpush.msra.mxu0 %v2043_v13 }
 0xa4f   :  { %v1989_v51 = vsel %vm252_vm0, %v1983_v49, 0.0 }
 0xa50   :  { %1990 = vadd.xlane.f32.xlu2 %v1989_v51  ;;  %2067 = vmatpush.msra.mxu0 %v2042_v62 }
 0xa52   :  { %2068 = vmatpush.msra.mxu0 %v2041_v63 }
 0xa54   :  { %2069 = vmatpush.msra.mxu0 %v2040_v0 }
 0xa56   :  { %2106 = vmatpush.msrb.mxu0 %v2086_v30  ;;  %v5801_v30 = vld [vmem:[%s6505_s25 + $0x38] sm:$0xff] }
 0xa57   :  { %2274 = vmatpush.msra.mxu1 %v5801_v30 }
 0xa58   :  { %2107 = vmatpush.msrb.mxu0 %v2085_v41  ;;  %v4355_v41 = vld [vmem:[%s6505_s25 + $0x30] sm:$0xff] }
 0xa59   :  { %2275 = vmatpush.msra.mxu1 %v4355_v41 }
 0xa5a   :  { %2108 = vmatpush.msrb.mxu0 %v2084_v15 }
 0xa5c   :  { %2109 = vmatpush.msrb.mxu0 %v2083_v20 }
 0xa5e   :  { %2110 = vmatpush.msrb.mxu0 %v2082_v10 }
 0xa60   :  { %2111 = vmatpush.msrb.mxu0 %v2081_v4 }
 0xa62   :  { %2112 = vmatpush.msrb.mxu0 %v2080_v39 }
 0xa64   :  { %2113 = vmatpush.msrb.mxu0 %v2079_v40 }
 0xab6   :  { %v1988_v52 = vpop.xlane.xlu1 %1987 }
 0xab7   :  { %v1992_v53 = vmul.f32 %v1988_v52, %v5514_v17 }
 0xab9   :  { %v1994_v9 = vsub.f32 %v1982_v55, %v1992_v53 }
 0xabb   :  { %v1996_v56 = vmul.f32 %v1994_v9, %v1994_v9 }
 0xabd   :  { %v1998_v58 = vsel %vm252_vm0, %v1996_v56, 0.0 }
 0xabe   :  { %1999 = vadd.xlane.f32.xlu0 %v1998_v58 }
 0xac3   :  { %v1991_v59 = vpop.xlane.xlu2 %1990 }
 0xac4   :  { %v1993_v54 = vmul.f32 %v1991_v59, %v5514_v17 }
 0xac6   :  { %v1995_v36 = vsub.f32 %v1983_v49, %v1993_v54  ;;  %v4616_v49 = vld [vmem:[%s6472_s21] ss:$0 sm:$0xff] }
 0xac8   :  { %v1997_v6 = vmul.f32 %v1995_v36, %v1995_v36 }
 0xaca   :  { %v2001_v61 = vsel %vm252_vm0, %v1997_v6, 0.0 }
 0xacb   :  { %2002 = vadd.xlane.f32.xlu1 %v2001_v61 }
 0xb31   :  { %v2000_v2 = vpop.xlane.xlu0 %1999 }
 0xb32   :  { %v2004_v1 = vmul.f32 %v2000_v2, %v5514_v17 }
 0xb34   :  { %v2006_v50 = vadd.f32 1e-05, %v2004_v1 }
 0xb36   :  { %4707 = vrsqrt.f32 %v2006_v50  ;;  %vm2014_vm12 = vweird.f32 %v2006_v50 }
 0xb3c   :  { %v4708_v7 = vpop.eup %4707 }
 0xb3d   :  { %v2009_v14 = vmul.f32 %v4708_v7, %v2006_v50  ;;  %vm2015_vm11 = vweird.f32 %v4708_v7 }
 0xb3e   :  { %v2003_v16 = vpop.xlane.xlu1 %2002  ;;  %vm2016_vm13 = vmor %vm2014_vm12, %vm2015_vm11 }
 0xb3f   :  { %v2010_v8 = vmul.f32 %v4708_v7, %v2009_v14  ;;  %v2005_v18 = vmul.f32 %v2003_v16, %v5514_v17  ;;  %v4353_v14 = vld [vmem:[%s6505_s25 + $0x20] sm:$0xff] }
 0xb41   :  { %v2011_v48 = vmul.f32 0.5, %v2010_v8  ;;  %v2007_v33 = vadd.f32 1e-05, %v2005_v18  ;;  %v4542_v18 = vpack.i.bf16 %v4355_v41, %v5801_v30 }
 0xb43   :  { %v2012_v12 = vsub.f32 1.5, %v2011_v48  ;;  %4709 = vrsqrt.f32 %v2007_v33  ;;  %vm2024_vm15 = vweird.f32 %v2007_v33 }
 0xb45   :  { %v2013_v29 = vmul.f32 %v4708_v7, %v2012_v12 }
 0xb47   :  { %v2017_v23 = vsel %vm2016_vm13, %v4708_v7, %v2013_v29  ;;  %v4354_v7 = vld [vmem:[%s6505_s25 + $0x28] sm:$0xff]  ;;  %s4240_s25 = sshll.u32 %s6475_s24, 4  ;;  %s4241_s25 = int_to_ptr.hbm [resolvable:$true] %s4240_s25 }
 0xb48   :  { %v2028_v28 = vmul.f32 %v2017_v23, %v1994_v9  ;;  %2276 = vmatpush.msra.mxu1 %v4354_v7  ;;  %v4547_v20 = vpack.i.bf16 %v4353_v14, %v4354_v7 }
 0xb49   :  { %v4710_v25 = vpop.eup %4709 }
 0xb4a   :  { %v2033_v26 = vmul.f32 %v4613_v22, %v2028_v28  ;;  %v2019_v5 = vmul.f32 %v4710_v25, %v2007_v33  ;;  %vm2025_vm14 = vweird.f32 %v4710_v25  ;;  %2277 = vmatpush.msra.mxu1 %v4353_v14 }
 0xb4b   :  { %vm2026_vm2 = vmor %vm2024_vm15, %vm2025_vm14 }
 0xb4c   :  { %v2020_v27 = vmul.f32 %v4710_v25, %v2019_v5  ;;  %v2038_v11 = vadd.f32 %v4614_v24, %v2033_v26  ;;  %v4618_v5 = vld [vmem:[#allocation14] ss:$0 sm:$0xff] }
 0xb4e   :  { %v2021_v32 = vmul.f32 0.5, %v2020_v27  ;;  %4349 = vmatmul.msk.f32.vlgmr.msra.gmra.mxu0 %vm252_vm0, %v2038_v11 }
 0xb50   :  { %v2022_v31 = vsub.f32 1.5, %v2021_v32 }
 0xb52   :  { %v2023_v21 = vmul.f32 %v4710_v25, %v2022_v31 }
 0xb54   :  { %v2027_v34 = vsel %vm2026_vm2, %v4710_v25, %v2023_v21  ;;  %v4617_v25 = vld [vmem:[%s6467_s16] ss:$0 sm:$0xff] }
 0xb55   :  { %v2029_v35 = vmul.f32 %v2027_v34, %v1995_v36 }
 0xb57   :  { %v2034_v37 = vmul.f32 %v4613_v22, %v2029_v35 }
 0xb59   :  { %v2039_v38 = vadd.f32 %v4614_v24, %v2034_v37  ;;  %v5821_v37 = vld [vmem:[#allocation7] sm:$0xff] }
 0xb5b   :  { %4350 = vmatmul.msk.f32.gmra.mxu0 %vm252_vm0, %v2039_v38 }
 0xbcb   :  { %v2071_v42 = vpop.f32.mrf.mxu0 }
 0xbcc   :  { %v2072_v43 = vadd.f32 %v4615_v3, %v2071_v42 }
 0xbce   :  { %v2077_v55 = vmax.f32 %v2072_v43, 0.0 }
 0xbd0   :  { %4351 = vmatmul.msk.f32.vlgmr.msrb.gmra.mxu0 %vm2091_vm3, %v2077_v55  ;;  %v5828_v55 = vld [vmem:[#allocation7 + $0x8] sm:$0xff] }
 0xbd8   :  { %v2074_v44 = vpop.f32.mrf.mxu0 }
 0xbd9   :  { %v2075_v46 = vadd.f32 %v4615_v3, %v2074_v44 }
 0xbdb   :  { %v2078_v47 = vmax.f32 %v2075_v46, 0.0  ;;  %v5836_v46 = vld [vmem:[%s6506_s4 + $0x1] ss:$0 sm:$0xff]  ;;  %s6519_s4 = smov 16  }
 0xbdd   :  { %4352 = vmatmul.msk.f32.gmra.mxu0 %vm2091_vm3, %v2078_v47 }
 0xc4d   :  { %v2115_v51 = vpop.f32.mrf.mxu0 }
 0xc4e   :  { %v2116_v52 = vadd.f32 %v4616_v49, %v2115_v51 }
 0xc50   :  { %v2121_v53 = vadd.f32 %v2116_v52, %v2038_v11 }
 0xc52   :  { %v2125_v9 = vsel %vm252_vm0, %v2121_v53, 0.0 }
 0xc53   :  { %2126 = vadd.xlane.f32.xlu2 %v2125_v9 }
 0xc5a   :  { %v2118_v56 = vpop.f32.mrf.mxu0 }
 0xc5b   :  { %v2119_v58 = vadd.f32 %v4616_v49, %v2118_v56 }
 0xc5d   :  { %v2122_v59 = vadd.f32 %v2119_v58, %v2039_v38 }
 0xc5f   :  { %v2128_v54 = vsel %vm252_vm0, %v2122_v59, 0.0 }
 0xc60   :  { %2129 = vadd.xlane.f32.xlu1 %v2128_v54 }
 0xcc6   :  { %v2127_v36 = vpop.xlane.xlu2 %2126 }
 0xcc7   :  { %v2131_v6 = vmul.f32 %v2127_v36, %v5514_v17 }
 0xcc9   :  { %v2133_v61 = vsub.f32 %v2121_v53, %v2131_v6 }
 0xccb   :  { %v2135_v13 = vmul.f32 %v2133_v61, %v2133_v61 }
 0xccd   :  { %v2137_v62 = vsel %vm252_vm0, %v2135_v13, 0.0 }
 0xcce   :  { %2138 = vadd.xlane.f32.xlu2 %v2137_v62 }
 0xcd3   :  { %v2130_v63 = vpop.xlane.xlu1 %2129 }
 0xcd4   :  { %v2132_v0 = vmul.f32 %v2130_v63, %v5514_v17 }
 0xcd6   :  { %v2134_v2 = vsub.f32 %v2122_v59, %v2132_v0 }
 0xcd8   :  { %v2136_v1 = vmul.f32 %v2134_v2, %v2134_v2 }
 0xcda   :  { %v2140_v50 = vsel %vm252_vm0, %v2136_v1, 0.0 }
 0xcdb   :  { %2141 = vadd.xlane.f32.xlu0 %v2140_v50 }
 0xd41   :  { %v2139_v15 = vpop.xlane.xlu2 %2138 }
 0xd42   :  { %v2143_v16 = vmul.f32 %v2139_v15, %v5514_v17 }
 0xd44   :  { %v2145_v8 = vadd.f32 1e-05, %v2143_v16 }
 0xd46   :  { %4711 = vrsqrt.f32 %v2145_v8  ;;  %vm2153_vm5 = vweird.f32 %v2145_v8 }
 0xd4c   :  { %v4712_v48 = vpop.eup %4711 }
 0xd4d   :  { %v2148_v33 = vmul.f32 %v4712_v48, %v2145_v8  ;;  %vm2154_vm4 = vweird.f32 %v4712_v48 }
 0xd4e   :  { %v2142_v10 = vpop.xlane.xlu0 %2141  ;;  %vm2155_vm8 = vmor %vm2153_vm5, %vm2154_vm4 }
 0xd4f   :  { %v2149_v12 = vmul.f32 %v4712_v48, %v2148_v33  ;;  %v2144_v29 = vmul.f32 %v2142_v10, %v5514_v17 }
 0xd51   :  { %v2150_v22 = vmul.f32 0.5, %v2149_v12  ;;  %v2146_v23 = vadd.f32 1e-05, %v2144_v29 }
 0xd53   :  { %v2151_v28 = vsub.f32 1.5, %v2150_v22  ;;  %4713 = vrsqrt.f32 %v2146_v23  ;;  %vm2163_vm10 = vweird.f32 %v2146_v23 }
 0xd55   :  { %v2152_v24 = vmul.f32 %v4712_v48, %v2151_v28 }
 0xd57   :  { %v2156_v26 = vsel %vm2155_vm8, %v4712_v48, %v2152_v24 }
 0xd58   :  { %v2167_v27 = vmul.f32 %v2156_v26, %v2133_v61 }
 0xd59   :  { %v4714_v11 = vpop.eup %4713 }
 0xd5a   :  { %v2172_v32 = vmul.f32 %v4617_v25, %v2167_v27  ;;  %v2158_v31 = vmul.f32 %v4714_v11, %v2146_v23  ;;  %vm2164_vm9 = vweird.f32 %v4714_v11 }
 0xd5b   :  { %vm2165_vm11 = vmor %vm2163_vm10, %vm2164_vm9 }
 0xd5c   :  { %v5819_v21 = vadd.f32 %v4618_v5, %v2172_v32  ;;  %v2159_v34 = vmul.f32 %v4714_v11, %v2158_v31 }
 0xd5e   :  { %v2160_v35 = vmul.f32 0.5, %v2159_v34  ;;  %v2251_v38 = vadd.f32 %v5821_v37, %v5819_v21 }
 0xd60   :  { %v2161_v4 = vsub.f32 1.5, %v2160_v35  ;;  %4363 = vmatmul.msk.f32.vlgmr.msra.gmra.mxu1 %vm252_vm0, %v2251_v38 }
 0xd62   :  { %v2162_v39 = vmul.f32 %v4714_v11, %v2161_v4 }
 0xd64   :  { %v2166_v40 = vsel %vm2165_vm11, %v4714_v11, %v2162_v39 }
 0xd65   :  { %v2168_v3 = vmul.f32 %v2166_v40, %v2134_v2 }
 0xd67   :  { %v2173_v42 = vmul.f32 %v4617_v25, %v2168_v3 }
 0xd69   :  { %v5826_v43 = vadd.f32 %v4618_v5, %v2173_v42 }
 0xd6b   :  { %v2252_v44 = vadd.f32 %v5828_v55, %v5826_v43 }
 0xd6d   :  { %4364 = vmatmul.msk.f32.gmra.mxu1 %vm252_vm0, %v2252_v44 }
 0xddd   :  { %v2279_v47 = vpop.f32.mrf.mxu1 }
 0xdde   :  { %v2280_v49 = vadd.f32 %v5836_v46, %v2279_v47 }
 0xde0   :  { %2350 = vrot.lane.b32.xlu2 %v2280_v49, %s5099_s7  ;;  %2342 = vrot.lane.b32.xlu1 %v2280_v49, %s5096_s10 }
 0xdea   :  { %v2282_v51 = vpop.f32.mrf.mxu1 }
 0xdeb   :  { %v2283_v52 = vadd.f32 %v5836_v46, %v2282_v51 }
 0xded   :  { %2348 = vrot.lane.b32.xlu0 %v2283_v52, %s5097_s27  ;;  %2352 = vrot.lane.b32.xlu2 %v2283_v52, %s5099_s7 }
 0xdee   :  { %2344 = vrot.lane.b32.xlu1 %v2283_v52, %s5096_s10 }
 0xdf5   :  { %2346 = vrot.lane.b32.xlu0 %v2280_v49, %s5097_s27  ;;  %4548 = vrot.lane.b32.xlu2 %v4547_v20, %s5100_s14 }
 0xdf6   :  { %4543 = vrot.lane.b32.xlu1 %v4542_v18, %s5100_s14 }
 0xdfd   :  { %2374 = vrot.lane.b32.xlu0 %v2280_v49, %s5098_s1  ;;  %2400 = vrot.lane.b32.xlu2 %v2283_v52, %s5098_s1 }
 0xe3a   :  { %v2351_v53 = vpop.permute.xlu2 %2350 }
 0xe3b   :  { %2530 = vrot.lane.b32.xlu1 %v2351_v53, %s5098_s1 }
 0xe47   :  { %v2353_v9 = vpop.permute.xlu2 %2352 }
 0xe4f   :  { %v4549_v56 = vpop.permute.xlu2 %4548 }
 0xe50   :  { %v4550_v63 = vunpack.i.l.bf16 %v4549_v56  ;;  %v4551_v0 = vunpack.i.h.bf16 %v4549_v56 }
 0xe52   :  { %v2343_v58 = vpop.permute.xlu1 %2342 }
 0xe53   :  { %2426 = vrot.lane.b32.xlu0 %v2343_v58, %s5098_s1 }
 0xe57   :  { %v2401_v59 = vpop.permute.xlu2 %2400 }
 0xe58   :  { %4374 = vmatpush.xpose.msk.msrb.mxu1 %vm371_vm1, %v2401_v59 }
 0xe5b   :  { %4375 = vmatmul.msk.f32.vlgmr.msrb.gmra.mxu1 %vm371_vm1, %v2283_v52 }
 0xe5f   :  { %v2349_v54 = vpop.permute.xlu0 %2348 }
 0xe60   :  { %v2345_v36 = vpop.permute.xlu1 %2344  ;;  %2504 = vrot.lane.b32.xlu0 %v2349_v54, %s5098_s1 }
 0xe61   :  { %2452 = vrot.lane.b32.xlu2 %v2345_v36, %s5098_s1 }
 0xe67   :  { %v2347_v6 = vpop.permute.xlu0 %2346 }
 0xe68   :  { %v4544_v61 = vpop.permute.xlu1 %4543  ;;  %2478 = vrot.lane.b32.xlu1 %v2347_v6, %s5098_s1  ;;  %2556 = vrot.lane.b32.xlu0 %v2353_v9, %s5098_s1 }
 0xe69   :  { %v4546_v13 = vunpack.i.h.bf16 %v4544_v61  ;;  %v4545_v62 = vunpack.i.l.bf16 %v4544_v61 }
 0xe6b   :  { %2322 = vmatpush.msra.mxu2 %v4545_v62 }
 0xe6d   :  { %2323 = vmatpush.msra.mxu2 %v4546_v13 }
 0xe6f   :  { %2324 = vmatpush.msra.mxu2 %v4550_v63  ;;  %v2375_v2 = vpop.permute.xlu0 %2374 }
 0xe70   :  { %4372 = vmatpush.xpose.msk.msrb.mxu3 %vm371_vm1, %v2375_v2 }
 0xe71   :  { %2325 = vmatpush.msra.mxu2 %v4551_v0 }
 0xe72   :  { %4365 = vmatmul.msk.f32.vlgmr.msra.gmra.mxu2 %vm252_vm0, %v5819_v21 }
 0xe73   :  { %4373 = vmatmul.msk.f32.vlgmr.msrb.gmra.mxu3 %vm371_vm1, %v2280_v49 }
 0xe7a   :  { %4366 = vmatmul.msk.f32.gmra.mxu2 %vm252_vm0, %v5826_v43 }
 0xead   :  { %v2531_v30 = vpop.permute.xlu1 %2530 }
 0xebb   :  { %v2453_v1 = vpop.permute.xlu2 %2452 }
 0xebc   :  { %4378 = vmatpush.xpose.msk.msra.mxu0 %vm371_vm1, %v2453_v1 }
 0xebf   :  { %4379 = vmatmul.msk.f32.vlgmr.msra.gmra.mxu0 %vm371_vm1, %v2345_v36 }
 0xec5   :  { %v2427_v50 = vpop.permute.xlu0 %2426 }
 0xec6   :  { %4376 = vmatpush.xpose.msk.msra.mxu3 %vm371_vm1, %v2427_v50 }
 0xec9   :  { %4377 = vmatmul.msk.f32.vlgmr.msra.gmra.mxu3 %vm371_vm1, %v2343_v58 }
 0xeca   :  { %4384 = vmatpush.xpose.msk.msrb.mxu3 %vm371_vm1, %v2531_v30 }
 0xed1   :  { %4385 = vmatmul.msk.f32.vlgmr.msrb.gmra.mxu3 %vm371_vm1, %v2351_v53 }
 0xed2   :  { %v2505_v41 = vpop.permute.xlu0 %2504 }
 0xed3   :  { %4382 = vmatpush.xpose.msk.msrb.mxu2 %vm371_vm1, %v2505_v41 }
 0xed6   :  { %4383 = vmatmul.msk.f32.vlgmr.msrb.gmra.mxu2 %vm371_vm1, %v2349_v54 }
 0xed8   :  { %v2423_v7 = vpop.f32.mrf.mxu1 }
 0xed9   :  { %v2583_v14 = vmul.f32 0.35355338, %v2423_v7 }
 0xeda   :  { %v2557_v15 = vpop.permute.xlu0 %2556  ;;  %v2479_v16 = vpop.permute.xlu1 %2478 }
 0xedb   :  { %4380 = vmatpush.xpose.msk.msra.mxu1 %vm371_vm1, %v2479_v16  ;;  %4386 = vmatpush.xpose.msk.msrb.mxu0 %vm371_vm1, %v2557_v15  ;;  %v2593_v8 = vsel %vm371_vm1, %v2583_v14, -inf }
 0xedc   :  { %2594 = vmax.xlane.f32.xlu0 %v2593_v8 }
 0xede   :  { %4381 = vmatmul.msk.f32.vlgmr.msra.gmra.mxu1 %vm371_vm1, %v2347_v6  ;;  %4387 = vmatmul.msk.f32.vlgmr.msrb.gmra.mxu0 %vm371_vm1, %v2353_v9 }
 0xef5   :  { %v2327_v29 = vpop.f32.mrf.mxu2 }
 0xef6   :  { %v2397_v18 = vpop.f32.mrf.mxu3 }
 0xef7   :  { %v2582_v20 = vmul.f32 0.35355338, %v2397_v18 }
 0xef9   :  { %v2590_v48 = vsel %vm371_vm1, %v2582_v20, -inf }
 0xefa   :  { %2591 = vmax.xlane.f32.xlu2 %v2590_v48 }
 0xefd   :  { %v2330_v24 = vpop.f32.mrf.mxu2 }
 0xf3c   :  { %v2475_v33 = vpop.f32.mrf.mxu0 }
 0xf3d   :  { %v2585_v10 = vmul.f32 0.35355338, %v2475_v33 }
 0xf3f   :  { %v2599_v12 = vsel %vm371_vm1, %v2585_v10, -inf }
 0xf40   :  { %2600 = vmax.xlane.f32.xlu0 %v2599_v12 }
 0xf4c   :  { %v2449_v22 = vpop.f32.mrf.mxu3 }
 0xf4d   :  { %v5879_v23 = vmul.f32 0.35355338, %v2449_v22 }
 0xf4f   :  { %v2596_v28 = vsel %vm371_vm1, %v5879_v23, -inf  ;;  %v2595_v25 = vpop.xlane.xlu0 %2594 }
 0xf50   :  { %2597 = vmax.xlane.f32.xlu1 %v2596_v28  ;;  %v2615_v27 = vsub.f32 %v2583_v14, %v2595_v25 }
 0xf52   :  { %v2624_v31 = vmul.f32 1.442695, %v2615_v27 }
 0xf54   :  { %2301 = vrot.lane.b32.xlu0 %v5836_v46, %s5100_s14  ;;  %v2553_v26 = vpop.f32.mrf.mxu3  ;;  %4715 = vpow2.f32 %v2624_v31 }
 0xf55   :  { %v2588_v5 = vmul.f32 0.35355338, %v2553_v26 }
 0xf57   :  { %v2608_v11 = vsel %vm371_vm1, %v2588_v5, -inf }
 0xf58   :  { %2609 = vmax.xlane.f32.xlu1 %v2608_v11 }
 0xf59   :  { %v2527_v32 = vpop.f32.mrf.mxu2 }
 0xf5a   :  { %v2587_v34 = vmul.f32 0.35355338, %v2527_v32  ;;  %v5890_v42 = vpop.eup %4715 }
 0xf5b   :  { %v2501_v35 = vpop.f32.mrf.mxu1  ;;  %v2579_v39 = vpop.f32.mrf.mxu0  ;;  %v2641_v46 = vsel %vm371_vm1, %v5890_v42, 0.0 }
 0xf5c   :  { %v2586_v38 = vmul.f32 0.35355338, %v2501_v35  ;;  %v2605_v40 = vsel %vm371_vm1, %v2587_v34, -inf  ;;  %v5888_v3 = vmul.f32 0.35355338, %v2579_v39 }
 0xf5e   :  { %v2602_v4 = vsel %vm371_vm1, %v2586_v38, -inf  ;;  %v2611_v44 = vsel %vm371_vm1, %v5888_v3, -inf }
 0xf5f   :  { %2603 = vmax.xlane.f32.xlu2 %v2602_v4 }
 0xf60   :  { %2606 = vmax.xlane.f32.xlu1 %v2605_v40 }
 0xf67   :  { %2612 = vmax.xlane.f32.xlu2 %v2611_v44 }
 0xf68   :  { %2642 = vadd.xlane.f32.xlu1 %v2641_v46 }
 0xf6d   :  { %v2592_v47 = vpop.xlane.xlu2 %2591 }
 0xf6e   :  { %v2614_v49 = vsub.f32 %v2582_v20, %v2592_v47 }
 0xf70   :  { %v2622_v51 = vmul.f32 1.442695, %v2614_v49 }
 0xf72   :  { %4717 = vpow2.f32 %v2622_v51 }
 0xf78   :  { %v5896_v52 = vpop.eup %4717 }
 0xf79   :  { %v2638_v53 = vsel %vm371_vm1, %v5896_v52, 0.0 }
 0xf7a   :  { %2639 = vadd.xlane.f32.xlu2 %v2638_v53 }
 0xfb3   :  { %v2601_v9 = vpop.xlane.xlu0 %2600 }
 0xfb4   :  { %v2617_v56 = vsub.f32 %v2585_v10, %v2601_v9 }
 0xfb6   :  { %v2628_v58 = vmul.f32 1.442695, %v2617_v56 }
 0xfb8   :  { %4719 = vpow2.f32 %v2628_v58 }
 0xfbe   :  { %v5900_v59 = vpop.eup %4719 }
 0xfbf   :  { %v2647_v54 = vsel %vm371_vm1, %v5900_v59, 0.0 }
 0xfc0   :  { %2648 = vadd.xlane.f32.xlu2 %v2647_v54 }
 0xfc3   :  { %v2598_v36 = vpop.xlane.xlu1 %2597 }
 0xfc4   :  { %v2616_v41 = vsub.f32 %v5879_v23, %v2598_v36 }
 0xfc6   :  { %v2302_v6 = vpop.permute.xlu0 %2301  ;;  %v2626_v8 = vmul.f32 1.442695, %v2616_v41 }
 0xfc7   :  { %v5904_v61 = vadd.f32 %v2327_v29, %v2302_v6  ;;  %v5906_v13 = vadd.f32 %v2330_v24, %v2302_v6 }
 0xfc9   :  { %2800 = vmatpush.msrb.mxu1 %v5904_v61  ;;  %2823 = vmatpush.msra.mxu2 %v5906_v13  ;;  %v4552_v9 = vpack.i.bf16 %v5906_v13, %v5904_v61 }
 0xfcb   :  { %v2610_v62 = vpop.xlane.xlu1 %2609 }
 0xfcc   :  { %v2620_v63 = vsub.f32 %v2588_v5, %v2610_v62 }
 0xfce   :  { %v2634_v0 = vmul.f32 1.442695, %v2620_v63 }
 0xfd0   :  { %4721 = vpow2.f32 %v2634_v0 }
 0xfd2   :  { %v2604_v2 = vpop.xlane.xlu2 %2603 }
 0xfd3   :  { %v2618_v1 = vsub.f32 %v2586_v38, %v2604_v2  ;;  %v2607_v50 = vpop.xlane.xlu1 %2606 }
 0xfd4   :  { %v2619_v30 = vsub.f32 %v2587_v34, %v2607_v50 }
 0xfd5   :  { %v2630_v7 = vmul.f32 1.442695, %v2618_v1 }
 0xfd6   :  { %v5911_v14 = vpop.eup %4721  ;;  %v2632_v15 = vmul.f32 1.442695, %v2619_v30 }
 0xfd7   :  { %4723 = vpow2.f32 %v2630_v7  ;;  %v2656_v16 = vsel %vm371_vm1, %v5911_v14, 0.0 }
 0xfd8   :  { %4725 = vpow2.f32 %v2632_v15  ;;  %2657 = vadd.xlane.f32.xlu2 %v2656_v16 }
 0xfda   :  { %v2613_v23 = vpop.xlane.xlu2 %2612 }
 0xfdb   :  { %v2643_v18 = vpop.xlane.xlu1 %2642  ;;  %v2621_v56 = vsub.f32 %v5888_v3, %v2613_v23 }
 0xfdc   :  { %4727 = vrcp.f32 %v2643_v18  ;;  %v2688_v24 = vand.u32 2147483648, %v2643_v18  ;;  %v2686_v5 = vand.u32 2147483647, %v2643_v18  ;;  %vm2682_vm13 = vweird.f32 %v2643_v18 }
 0xfdd   :  { %v5915_v20 = vpop.eup %4723  ;;  %4729 = vpow2.f32 %v2626_v8  ;;  %v2636_v58 = vmul.f32 1.442695, %v2621_v56 }
 0xfde   :  { %v5917_v48 = vpop.eup %4725  ;;  %v2650_v33 = vsel %vm371_vm1, %v5915_v20, 0.0  ;;  %v2689_v11 = vor.u32 1.1754944e-38, %v2688_v24  ;;  %vm2687_vm15 = vcmp.eq.f32.partialorder %v2686_v5, 8.507059e+37 }
 0xfdf   :  { %2651 = vadd.xlane.f32.xlu1 %v2650_v33  ;;  %v2653_v10 = vsel %vm371_vm1, %v5917_v48, 0.0 }
 0xfe0   :  { %2654 = vadd.xlane.f32.xlu0 %v2653_v10 }
 0xfe2   :  { %v4728_v12 = vpop.eup %4727 }
 0xfe3   :  { %v5923_v29 = vpop.eup %4729  ;;  %v2678_v22 = vmul.f32 %v4728_v12, %v2643_v18  ;;  %vm2683_vm12 = vweird.f32 %v4728_v12 }
 0xfe4   :  { %v2644_v25 = vsel %vm371_vm1, %v5923_v29, 0.0  ;;  %vm2684_vm14 = vmor %vm2682_vm13, %vm2683_vm12 }
 0xfe5   :  { %v2679_v28 = vsub.f32 1.0, %v2678_v22 }
 0xfe7   :  { %v2680_v26 = vmul.f32 %v4728_v12, %v2679_v28  ;;  %2645 = vadd.xlane.f32.xlu1 %v2644_v25 }
 0xfe9   :  { %v2681_v27 = vadd.f32 %v4728_v12, %v2680_v26 }
 0xfeb   :  { %v2685_v32 = vsel %vm2684_vm14, %v4728_v12, %v2681_v27 }
 0xfec   :  { %v2690_v31 = vsel %vm2687_vm15, %v2689_v11, %v2685_v32 }
 0xfed   :  { %v2640_v34 = vpop.xlane.xlu2 %2639  ;;  %v2691_v35 = vmul.f32 %v5890_v42, %v2690_v31 }
 0xfee   :  { %4731 = vrcp.f32 %v2640_v34  ;;  %v2673_v40 = vand.u32 2147483648, %v2640_v34  ;;  %v2671_v46 = vand.u32 2147483647, %v2640_v34  ;;  %vm2667_vm4 = vweird.f32 %v2640_v34 }
 0xfef   :  { %4389 = vmatmul.msk.f32.vlgmr.msra.gmra.mxu2 %vm371_vm1, %v2691_v35  ;;  %4733 = vpow2.f32 %v2636_v58 }
 0xff0   :  { %2368 = vrot.lane.b32.xlu2 %v5904_v61, %s5099_s7  ;;  %v2674_v49 = vor.u32 1.1754944e-38, %v2673_v40  ;;  %vm2672_vm8 = vcmp.eq.f32.partialorder %v2671_v46, 8.507059e+37 }
 0xff4   :  { %v4732_v38 = vpop.eup %4731 }
 0xff5   :  { %v2663_v4 = vmul.f32 %v4732_v38, %v2640_v34  ;;  %vm2668_vm2 = vweird.f32 %v4732_v38  ;;  %v5941_v54 = vpop.eup %4733 }
 0xff6   :  { %vm2669_vm5 = vmor %vm2667_vm4, %vm2668_vm2 }
 0xff7   :  { %v2664_v39 = vsub.f32 1.0, %v2663_v4 }
 0xff9   :  { %v2665_v44 = vmul.f32 %v4732_v38, %v2664_v39 }
 0xffb   :  { %v2666_v47 = vadd.f32 %v4732_v38, %v2665_v44 }
 0xffd   :  { %v2670_v51 = vsel %vm2669_vm5, %v4732_v38, %v2666_v47 }
 0xffe   :  { %v2675_v42 = vsel %vm2672_vm8, %v2674_v49, %v2670_v51 }
 0xfff   :  { %v2676_v53 = vmul.f32 %v5896_v52, %v2675_v42  ;;  %v2659_v52 = vsel %vm371_vm1, %v5941_v54, 0.0 }
0x1000   :  { %2356 = vrot.lane.b32.xlu1 %v5904_v61, %s5096_s10 }
0x1001   :  { %4388 = vmatmul.msk.f32.vlgmr.msrb.gmra.mxu1 %vm371_vm1, %v2676_v53 }
0x1008   :  { %4553 = vrot.lane.b32.xlu1 %v4552_v9, %s5097_s27 }
0x1010   :  { %2358 = vrot.lane.b32.xlu1 %v5906_v13, %s5096_s10 }
0x1019   :  { %2660 = vadd.xlane.f32.xlu2 %v2659_v52 }
0x1031   :  { %2370 = vrot.lane.b32.xlu2 %v5906_v13, %s5099_s7 }
0x1033   :  { %v5947_v36 = vpop.xlane.xlu2 %2648 }
0x104b   :  { %v5951_v3 = vpop.xlane.xlu2 %2657 }
0x104c   :  { %4735 = vrcp.f32 %v5951_v3  ;;  %vm2757_vm14 = vweird.f32 %v5951_v3  ;;  %v2761_v31 = vand.u32 2147483647, %v5951_v3  ;;  %v2763_v34 = vand.u32 2147483648, %v5951_v3 }
0x104e   :  { %v2764_v9 = vor.u32 1.1754944e-38, %v2763_v34 }
0x1052   :  { %v5949_v6 = vpop.xlane.xlu1 %2651  ;;  %v4736_v63 = vpop.eup %4735 }
0x1053   :  { %v5954_v61 = vpop.xlane.xlu0 %2654  ;;  %v2753_v50 = vmul.f32 %v4736_v63, %v5951_v3  ;;  %vm2758_vm13 = vweird.f32 %v4736_v63  ;;  %vm2727_vm5 = vweird.f32 %v5949_v6  ;;  %v2733_v46 = vand.u32 2147483648, %v5949_v6  ;;  %v2369_v53 = vpop.permute.xlu2 %2368 }
0x1054   :  { %vm5983_vm4 = vmor %vm2757_vm14, %vm2758_vm13  ;;  %v2748_v47 = vand.u32 2147483648, %v5954_v61  ;;  %v2746_v42 = vand.u32 2147483647, %v5954_v61 }
0x1055   :  { %v2754_v8 = vsub.f32 1.0, %v2753_v50 }
0x1056   :  { %v2749_v3 = vor.u32 1.1754944e-38, %v2748_v47  ;;  %vm2747_vm14 = vcmp.eq.f32.partialorder %v2746_v42, 8.507059e+37 }
0x1057   :  { %v2755_v28 = vmul.f32 %v4736_v63, %v2754_v8 }
0x1059   :  { %v2756_v32 = vadd.f32 %v4736_v63, %v2755_v28 }
0x105a   :  { %v2646_v62 = vpop.xlane.xlu1 %2645 }
0x105b   :  { %4737 = vrcp.f32 %v2646_v62  ;;  %v2703_v33 = vand.u32 2147483648, %v2646_v62  ;;  %vm2697_vm10 = vweird.f32 %v2646_v62  ;;  %v2701_v22 = vand.u32 2147483647, %v2646_v62 }
0x105c   :  { %4739 = vrcp.f32 %v5949_v6  ;;  %v2760_v49 = vsel %vm5983_vm4, %v4736_v63, %v2756_v32 }
0x105d   :  { %4741 = vrcp.f32 %v5954_v61  ;;  %v2704_v25 = vor.u32 1.1754944e-38, %v2703_v33  ;;  %vm2702_vm12 = vcmp.eq.f32.partialorder %v2701_v22, 8.507059e+37 }
0x105e   :  { %4743 = vrcp.f32 %v5947_v36 }
0x1061   :  { %v4738_v0 = vpop.eup %4737 }
0x1062   :  { %v5958_v2 = vpop.eup %4739  ;;  %v2693_v13 = vmul.f32 %v4738_v0, %v2646_v62  ;;  %vm2698_vm9 = vweird.f32 %v4738_v0  ;;  %v2718_v62 = vand.u32 2147483648, %v5947_v36 }
0x1063   :  { %v5961_v1 = vpop.eup %4741  ;;  %v2723_v41 = vmul.f32 %v5958_v2, %v5949_v6  ;;  %vm2699_vm11 = vmor %vm2697_vm10, %vm2698_vm9  ;;  %vm2728_vm15 = vweird.f32 %v5958_v2  ;;  %vm2742_vm9 = vweird.f32 %v5954_v61 }
0x1064   :  { %v2694_v30 = vsub.f32 1.0, %v2693_v13  ;;  %v2738_v7 = vmul.f32 %v5961_v1, %v5954_v61  ;;  %v5968_v16 = vpop.eup %4743  ;;  %vm2743_vm2 = vweird.f32 %v5961_v1  ;;  %vm5992_vm8 = vmor %vm2727_vm5, %vm2728_vm15  ;;  %vm2712_vm15 = vweird.f32 %v5947_v36 }
0x1065   :  { %v2724_v10 = vsub.f32 1.0, %v2723_v41  ;;  %v2708_v23 = vmul.f32 %v5968_v16, %v5947_v36  ;;  %vm2744_vm10 = vmor %vm2742_vm9, %vm2743_vm2  ;;  %v2716_v13 = vand.u32 2147483647, %v5947_v36  ;;  %v2719_v8 = vor.u32 1.1754944e-38, %v2718_v62 }
0x1066   :  { %v2695_v15 = vmul.f32 %v4738_v0, %v2694_v30  ;;  %v2739_v12 = vsub.f32 1.0, %v2738_v7 }
0x1067   :  { %v2725_v26 = vmul.f32 %v5958_v2, %v2724_v10  ;;  %v2709_v27 = vsub.f32 1.0, %v2708_v23  ;;  %vm2717_vm4 = vcmp.eq.f32.partialorder %v2716_v13, 8.507059e+37 }
0x1068   :  { %v2696_v18 = vadd.f32 %v4738_v0, %v2695_v15  ;;  %v2740_v5 = vmul.f32 %v5961_v1, %v2739_v12 }
0x1069   :  { %v2726_v35 = vadd.f32 %v5958_v2, %v2725_v26  ;;  %v2710_v40 = vmul.f32 %v5968_v16, %v2709_v27 }
0x106a   :  { %v2700_v24 = vsel %vm2699_vm11, %v4738_v0, %v2696_v18  ;;  %v2741_v38 = vadd.f32 %v5961_v1, %v2740_v5  ;;  %vm2762_vm11 = vcmp.eq.f32.partialorder %v2761_v31, 8.507059e+37 }
0x106b   :  { %v2705_v11 = vsel %vm2702_vm12, %v2704_v25, %v2700_v24  ;;  %v2730_v56 = vsel %vm5992_vm8, %v5958_v2, %v2726_v35  ;;  %v2765_v52 = vsel %vm2762_vm11, %v2764_v9, %v2760_v49  ;;  %v2711_v61 = vadd.f32 %v5968_v16, %v2710_v40  ;;  %v4367_v40 = vld [vmem:[%s6511_s13 + $0x20] sm:$0xff] }
0x106c   :  { %v2706_v39 = vmul.f32 %v5923_v29, %v2705_v11  ;;  %v2731_v29 = vand.u32 2147483647, %v5949_v6  ;;  %v2745_v58 = vsel %vm2744_vm10, %v5961_v1, %v2741_v38  ;;  %v2734_v6 = vor.u32 1.1754944e-38, %v2733_v46  ;;  %v4370_v38 = vld [vmem:[%s6511_s13 + $0x38] sm:$0xff] }
0x106d   :  { %vm2713_vm12 = vweird.f32 %v5968_v16  ;;  %v2750_v0 = vsel %vm2747_vm14, %v2749_v3, %v2745_v58  ;;  %v2766_v1 = vmul.f32 %v5911_v14, %v2765_v52 }
0x106e   :  { %vm2732_vm13 = vcmp.eq.f32.partialorder %v2731_v29, 8.507059e+37  ;;  %vm2714_vm2 = vmor %vm2712_vm15, %vm2713_vm12  ;;  %v2751_v15 = vmul.f32 %v5917_v48, %v2750_v0 }
0x106f   :  { %v2735_v63 = vsel %vm2732_vm13, %v2734_v6, %v2730_v56  ;;  %v2715_v41 = vsel %vm2714_vm2, %v5968_v16, %v2711_v61  ;;  %v4620_v6 = vld [vmem:[%s6512_s8 + $0x1] ss:$0 sm:$0xff] }
0x1070   :  { %v2736_v7 = vmul.f32 %v5915_v20, %v2735_v63  ;;  %v2720_v14 = vsel %vm2717_vm4, %v2719_v8, %v2715_v41 }
0x1071   :  { %v2721_v18 = vmul.f32 %v5900_v59, %v2720_v14 }
0x1072   :  { %v2357_v4 = vpop.permute.xlu1 %2356  ;;  %v2825_v32 = vpop.f32.mrf.mxu2 }
0x1073   :  { %2846 = vmatpush.msra.mxu3 %v2357_v4  ;;  %v4369_v4 = vld [vmem:[%s6511_s13 + $0x30] sm:$0xff] }
0x1074   :  { %4390 = vmatmul.msk.f32.vlgmr.msra.gmra.mxu3 %vm371_vm1, %v2706_v39  ;;  %v4368_v39 = vld [vmem:[%s6511_s13 + $0x28] sm:$0xff]  ;;  %s6527_s13 = sld [smem:[#allocation37_spill]] }
0x1075   :  { %2938 = vmatpush.msrb.mxu3 %v2369_v53 }
0x107a   :  { %v4554_v2 = vpop.permute.xlu1 %4553  ;;  %s4253_s3 = sshll.u32 %s6527_s13, 4  ;;  %s4254_s3 = int_to_ptr.hbm [resolvable:$true] %s4253_s3 }
0x107b   :  { %v4556_v50 = vunpack.i.h.bf16 %v4554_v2  ;;  %v4555_v30 = vunpack.i.l.bf16 %v4554_v2 }
0x107c   :  { %4394 = vmatmul.msk.f32.vlgmr.msrb.gmra.mxu3 %vm371_vm1, %v2766_v1 }
0x107d   :  { %2892 = vmatpush.msra.mxu1 %v4555_v30  ;;  %2915 = vmatpush.msrb.mxu2 %v4556_v50  ;;  %v4358_v50 = vld [vmem:[%s6513_s30 + $0x20] sm:$0xff]  ;;  %v4359_v30 = vld [vmem:[%s6513_s30 + $0x28] sm:$0xff] }
0x107e   :  { %4392 = vmatmul.msk.f32.vlgmr.msra.gmra.mxu1 %vm371_vm1, %v2736_v7  ;;  %4393 = vmatmul.msk.f32.vlgmr.msrb.gmra.mxu2 %vm371_vm1, %v2751_v15  ;;  %v2802_v5 = vpop.f32.mrf.mxu1  ;;  %v6061_v41 = vpack.i.bf16 %v4358_v50, %v4359_v30  ;;  %v4360_v7 = vld [vmem:[%s6513_s30 + $0x30] sm:$0xff]  ;;  %v4361_v15 = vld [vmem:[%s6513_s30 + $0x38] sm:$0xff] }
0x107f   :  { %3017 = vmatpush.msrb.mxu1 %v4370_v38  ;;  %v6071_v8 = vpack.i.bf16 %v4360_v7, %v4361_v15  ;;  %3111 = vmatpush.msra.mxu2 %v4361_v15  ;;  %v4622_v38 = vld [vmem:[#allocation11 + $0x1] ss:$0 sm:$0xff] }
0x1081   :  { %3018 = vmatpush.msrb.mxu1 %v4369_v4  ;;  %3112 = vmatpush.msra.mxu2 %v4360_v7 }
0x1082   :  { %v2359_v36 = vpop.permute.xlu1 %2358 }
0x1083   :  { %2869 = vmatpush.msra.mxu0 %v2359_v36  ;;  %3019 = vmatpush.msrb.mxu1 %v4368_v39 }
0x1084   :  { %4391 = vmatmul.msk.f32.vlgmr.msra.gmra.mxu0 %vm371_vm1, %v2721_v18  ;;  %3113 = vmatpush.msra.mxu2 %v4359_v30 }
0x1085   :  { %3020 = vmatpush.msrb.mxu1 %v4367_v40 }
0x1086   :  { %3114 = vmatpush.msra.mxu2 %v4358_v50 }
0x108c   :  { %v2661_v16 = vpop.xlane.xlu2 %2660 }
0x108d   :  { %4745 = vrcp.f32 %v2661_v16  ;;  %v2778_v12 = vand.u32 2147483648, %v2661_v16  ;;  %v2776_v23 = vand.u32 2147483647, %v2661_v16  ;;  %vm2772_vm8 = vweird.f32 %v2661_v16 }
0x108f   :  { %v2779_v24 = vor.u32 1.1754944e-38, %v2778_v12  ;;  %vm2777_vm10 = vcmp.eq.f32.partialorder %v2776_v23, 8.507059e+37 }
0x1093   :  { %v4746_v20 = vpop.eup %4745 }
0x1094   :  { %v2768_v33 = vmul.f32 %v4746_v20, %v2661_v16  ;;  %v2371_v48 = vpop.permute.xlu2 %2370  ;;  %vm2773_vm5 = vweird.f32 %v4746_v20 }
0x1095   :  { %2961 = vmatpush.msrb.mxu0 %v2371_v48  ;;  %vm2774_vm9 = vmor %vm2772_vm8, %vm2773_vm5 }
0x1096   :  { %v2769_v10 = vsub.f32 1.0, %v2768_v33 }
0x1098   :  { %v2770_v22 = vmul.f32 %v4746_v20, %v2769_v10 }
0x109a   :  { %v2771_v28 = vadd.f32 %v4746_v20, %v2770_v22 }
0x109c   :  { %v2775_v25 = vsel %vm2774_vm9, %v4746_v20, %v2771_v28 }
0x109d   :  { %v2780_v59 = vsel %vm2777_vm10, %v2779_v24, %v2775_v25 }
0x109e   :  { %v2781_v26 = vmul.f32 %v5941_v54, %v2780_v59 }
0x10a0   :  { %4395 = vmatmul.msk.f32.vlgmr.msrb.gmra.mxu0 %vm371_vm1, %v2781_v26 }
0x10f7   :  { %v2848_v27 = vpop.f32.mrf.mxu3 }
0x10f8   :  { %2968 = vrot.lane.b32.xlu0 %v2848_v27, %s5085_s28 }
0x10fb   :  { %v2894_v11 = vpop.f32.mrf.mxu1 }
0x10fc   :  { %2976 = vrot.lane.b32.xlu1 %v2894_v11, %s6519_s4 }
0x10ff   :  { %v2940_v31 = vpop.f32.mrf.mxu3 }
0x1100   :  { %2984 = vrot.lane.b32.xlu2 %v2940_v31, %s6520_s9 }
0x1101   :  { %v2871_v34 = vpop.f32.mrf.mxu0  ;;  %v2917_v35 = vpop.f32.mrf.mxu2 }
0x1104   :  { %2970 = vrot.lane.b32.xlu1 %v2871_v34, %s5085_s28 }
0x1108   :  { %2978 = vrot.lane.b32.xlu2 %v2917_v35, %s6519_s4  ;;  %v4621_v35 = vld [vmem:[%s6463_s12 + $0x1] ss:$0 sm:$0xff] }
0x111d   :  { %v2963_v54 = vpop.f32.mrf.mxu0 }
0x111e   :  { %2986 = vrot.lane.b32.xlu1 %v2963_v54, %s6520_s9 }
0x115a   :  { %v2985_v49 = vpop.permute.xlu2 %2984 }
0x1162   :  { %v2979_v9 = vpop.permute.xlu2 %2978 }
0x116a   :  { %v2969_v44 = vpop.permute.xlu0 %2968 }
0x116b   :  { %v2990_v46 = vsel %vm371_vm1, %v2802_v5, %v2969_v44  ;;  %v6090_v5 = vld [vmem:[%s6514_s6 + $0x1] ss:$0 sm:$0xff] }
0x116e   :  { %v2977_v47 = vpop.permute.xlu1 %2976 }
0x116f   :  { %v2992_v51 = vsel %vm988_vm6, %v2990_v46, %v2977_v47 }
0x1170   :  { %v2994_v29 = vsel %vm991_vm7, %v2992_v51, %v2985_v49 }
0x1171   :  { %4396 = vmatmul.msk.f32.vlgmr.msrb.gmra.mxu1 %vm252_vm0, %v2994_v29 }
0x1176   :  { %v2971_v42 = vpop.permute.xlu1 %2970 }
0x1177   :  { %v2991_v53 = vsel %vm371_vm1, %v2825_v32, %v2971_v42 }
0x1178   :  { %v2993_v58 = vsel %vm988_vm6, %v2991_v53, %v2979_v9 }
0x1190   :  { %v2987_v56 = vpop.permute.xlu1 %2986 }
0x1191   :  { %v2995_v52 = vsel %vm991_vm7, %v2993_v58, %v2987_v56 }
0x1192   :  { %4397 = vmatmul.msk.f32.gmra.mxu1 %vm252_vm0, %v2995_v52 }
0x11ee   :  { %v3022_v3 = vpop.f32.mrf.mxu1 }
0x11ef   :  { %v3023_v61 = vadd.f32 %v4620_v6, %v3022_v3 }
0x11f1   :  { %v3028_v62 = vadd.f32 %v3023_v61, %v5819_v21 }
0x11f3   :  { %v3034_v63 = vsel %vm252_vm0, %v3028_v62, 0.0 }
0x11f4   :  { %3035 = vadd.xlane.f32.xlu2 %v3034_v63 }
0x120c   :  { %4558 = vrot.lane.b32.xlu2 %v6071_v8, %s5098_s1 }
0x120f   :  { %v3025_v0 = vpop.f32.mrf.mxu1 }
0x1210   :  { %v3026_v13 = vadd.f32 %v4620_v6, %v3025_v0 }
0x1212   :  { %v3029_v2 = vadd.f32 %v3026_v13, %v5826_v43 }
0x1214   :  { %v3037_v1 = vsel %vm252_vm0, %v3029_v2, 0.0  ;;  %4573 = vrot.lane.b32.xlu2 %v6061_v41, %s5100_s14 }
0x1215   :  { %3038 = vadd.xlane.f32.xlu0 %v3037_v1 }
0x1229   :  { %4563 = vrot.lane.b32.xlu0 %v6061_v41, %s5098_s1 }
0x1231   :  { %4568 = vrot.lane.b32.xlu0 %v6071_v8, %s5100_s14 }
0x1267   :  { %v3036_v14 = vpop.xlane.xlu2 %3035 }
0x1268   :  { %v3040_v36 = vmul.f32 %v3036_v14, %v5514_v17 }
0x126a   :  { %v3042_v18 = vsub.f32 %v3028_v62, %v3040_v36 }
0x126c   :  { %v3044_v16 = vmul.f32 %v3042_v18, %v3042_v18 }
0x126e   :  { %v3046_v20 = vsel %vm252_vm0, %v3044_v16, 0.0 }
0x126f   :  { %3047 = vadd.xlane.f32.xlu1 %v3046_v20  ;;  %v4559_v23 = vpop.permute.xlu2 %4558 }
0x1270   :  { %v4561_v24 = vunpack.i.h.bf16 %v4559_v23  ;;  %v4560_v25 = vunpack.i.l.bf16 %v4559_v23 }
0x1272   :  { %3153 = vmatpush.msra.mxu3 %v4560_v25  ;;  %v4804_v25 = vld [vmem:[#allocation5 + $0x18] sm:$0xff] }
0x1274   :  { %3154 = vmatpush.msra.mxu3 %v4561_v24 }
0x1277   :  { %v4574_v7 = vpop.permute.xlu2 %4573 }
0x1278   :  { %v4575_v36 = vunpack.i.l.bf16 %v4574_v7  ;;  %v4576_v20 = vunpack.i.h.bf16 %v4574_v7 }
0x1288   :  { %v3039_v33 = vpop.xlane.xlu0 %3038 }
0x1289   :  { %v3041_v48 = vmul.f32 %v3039_v33, %v5514_v17 }
0x128b   :  { %v3043_v10 = vsub.f32 %v3029_v2, %v3041_v48  ;;  %v4801_v48 = vld [vmem:[#allocation5] sm:$0xff] }
0x128d   :  { %v3045_v12 = vmul.f32 %v3043_v10, %v3043_v10 }
0x128f   :  { %v3049_v22 = vsel %vm252_vm0, %v3045_v12, 0.0 }
0x1290   :  { %3050 = vadd.xlane.f32.xlu1 %v3049_v22  ;;  %v4803_v22 = vld [vmem:[#allocation5 + $0x10] sm:$0xff] }
0x129b   :  { %v4564_v28 = vpop.permute.xlu0 %4563 }
0x129c   :  { %v4565_v59 = vunpack.i.l.bf16 %v4564_v28  ;;  %v4566_v26 = vunpack.i.h.bf16 %v4564_v28 }
0x129e   :  { %3155 = vmatpush.msra.mxu3 %v4565_v59 }
0x12a0   :  { %3156 = vmatpush.msra.mxu3 %v4566_v26 }
0x12a1   :  { %4401 = vmatmul.msk.f32.vlgmr.msra.gmra.mxu3 %vm252_vm0, %v5535_v45 }
0x12a3   :  { %v4569_v15 = vpop.permute.xlu0 %4568 }
0x12a4   :  { %v4571_v8 = vunpack.i.h.bf16 %v4569_v15  ;;  %v4570_v14 = vunpack.i.l.bf16 %v4569_v15 }
0x12a6   :  { %3197 = vmatpush.msra.mxu0 %v4570_v14 }
0x12a8   :  { %3198 = vmatpush.msra.mxu0 %v4571_v8 }
0x12a9   :  { %4402 = vmatmul.msk.f32.gmra.mxu3 %vm252_vm0, %v5551_v57  ;;  %3138 = vrot.lane.b32.xlu1 %v6090_v5, %s5098_s1 }
0x12aa   :  { %3199 = vmatpush.msra.mxu0 %v4575_v36 }
0x12ac   :  { %3200 = vmatpush.msra.mxu0 %v4576_v20 }
0x12ad   :  { %4405 = vmatmul.msk.f32.vlgmr.msra.gmra.mxu0 %vm252_vm0, %v4801_v48 }
0x12b1   :  { %4403 = vmatmul.msk.f32.gmra.mxu3 %vm252_vm0, %v5561_v60 }
0x12b9   :  { %4404 = vmatmul.msk.f32.gmra.mxu3 %vm252_vm0, %v5571_v19 }
0x12e2   :  { %v3048_v27 = vpop.xlane.xlu1 %3047 }
0x12e3   :  { %v3052_v45 = vmul.f32 %v3048_v27, %v5514_v17 }
0x12e5   :  { %v3054_v11 = vadd.f32 1e-05, %v3052_v45 }
0x12e7   :  { %4747 = vrsqrt.f32 %v3054_v11  ;;  %vm3062_vm12 = vweird.f32 %v3054_v11 }
0x12ed   :  { %v4748_v57 = vpop.eup %4747 }
0x12ee   :  { %v3057_v32 = vmul.f32 %v4748_v57, %v3054_v11  ;;  %vm3063_vm11 = vweird.f32 %v4748_v57 }
0x12ef   :  { %vm3064_vm13 = vmor %vm3062_vm12, %vm3063_vm11 }
0x12f0   :  { %v3058_v31 = vmul.f32 %v4748_v57, %v3057_v32 }
0x12f2   :  { %v3059_v60 = vmul.f32 0.5, %v3058_v31 }
0x12f4   :  { %v3060_v34 = vsub.f32 1.5, %v3059_v60 }
0x12f6   :  { %v3061_v19 = vmul.f32 %v4748_v57, %v3060_v34 }
0x12f8   :  { %v3065_v54 = vsel %vm3064_vm13, %v4748_v57, %v3061_v19 }
0x12f9   :  { %v3076_v4 = vmul.f32 %v3065_v54, %v3042_v18 }
0x12fb   :  { %v3081_v39 = vmul.f32 %v4621_v35, %v3076_v4 }
0x12fd   :  { %v6098_v40 = vadd.f32 %v4622_v38, %v3081_v39 }
0x12ff   :  { %v3088_v44 = vadd.f32 %v5821_v37, %v6098_v40 }
0x1301   :  { %4399 = vmatmul.msk.f32.vlgmr.msra.gmra.mxu2 %vm252_vm0, %v3088_v44 }
0x1303   :  { %v3051_v46 = vpop.xlane.xlu1 %3050 }
0x1304   :  { %v3053_v47 = vmul.f32 %v3051_v46, %v5514_v17 }
0x1306   :  { %v3055_v49 = vadd.f32 1e-05, %v3053_v47 }
0x1308   :  { %4749 = vrsqrt.f32 %v3055_v49  ;;  %vm3072_vm15 = vweird.f32 %v3055_v49 }
0x130e   :  { %v4750_v51 = vpop.eup %4749 }
0x130f   :  { %v3067_v29 = vmul.f32 %v4750_v51, %v3055_v49  ;;  %vm3073_vm14 = vweird.f32 %v4750_v51 }
0x1310   :  { %vm3074_vm2 = vmor %vm3072_vm15, %vm3073_vm14 }
0x1311   :  { %v3068_v42 = vmul.f32 %v4750_v51, %v3067_v29 }
0x1313   :  { %v3069_v53 = vmul.f32 0.5, %v3068_v42 }
0x1315   :  { %v3070_v9 = vsub.f32 1.5, %v3069_v53 }
0x1317   :  { %v3071_v56 = vmul.f32 %v4750_v51, %v3070_v9 }
0x1319   :  { %v3075_v58 = vsel %vm3074_vm2, %v4750_v51, %v3071_v56 }
0x131a   :  { %v3077_v52 = vmul.f32 %v3075_v58, %v3043_v10  ;;  %v4802_v10 = vld [vmem:[#allocation5 + $0x8] sm:$0xff] }
0x131b   :  { %v3139_v0 = vpop.permute.xlu1 %3138  ;;  %4406 = vmatmul.msk.f32.gmra.mxu0 %vm252_vm0, %v4802_v10 }
0x131c   :  { %v3082_v6 = vmul.f32 %v4621_v35, %v3077_v52 }
0x131e   :  { %v6104_v37 = vadd.f32 %v4622_v38, %v3082_v6 }
0x1320   :  { %v3089_v3 = vadd.f32 %v5828_v55, %v6104_v37 }
0x1322   :  { %4400 = vmatmul.msk.f32.gmra.mxu2 %vm252_vm0, %v3089_v3 }
0x1323   :  { %4407 = vmatmul.msk.f32.gmra.mxu0 %vm252_vm0, %v4803_v22 }
0x1324   :  { %v3158_v61 = vpop.f32.mrf.mxu3 }
0x1325   :  { %v3159_v1 = vadd.f32 %v3158_v61, %v3139_v0 }
0x132a   :  { %v3202_v56 = vpop.f32.mrf.mxu0 }
0x132b   :  { %4408 = vmatmul.msk.f32.gmra.mxu0 %vm252_vm0, %v4804_v25 }
0x132c   :  { %v3161_v62 = vpop.f32.mrf.mxu3 }
0x132d   :  { %v3162_v13 = vadd.f32 %v3161_v62, %v3139_v0 }
0x132f   :  { %3241 = vrot.lane.b32.xlu0 %v3162_v13, %s5096_s10  ;;  %4410 = vmatpush.xpose.msk.msra.mxu1 %vm371_vm1, %v3162_v13 }
0x1333   :  { %4411 = vmatpush.xpose.msk.msra.mxu1 %vm371_vm1, %v3159_v1 }
0x1334   :  { %v3164_v63 = vpop.f32.mrf.mxu3 }
0x1335   :  { %v3165_v2 = vadd.f32 %v3164_v63, %v3139_v0 }
0x1337   :  { %3243 = vrot.lane.b32.xlu1 %v3165_v2, %s5096_s10  ;;  %3257 = vrot.lane.b32.xlu0 %v3162_v13, %s5099_s7 }
0x133c   :  { %v3167_v50 = vpop.f32.mrf.mxu3 }
0x133d   :  { %v3168_v55 = vadd.f32 %v3167_v50, %v3139_v0 }
0x133f   :  { %3245 = vrot.lane.b32.xlu2 %v3168_v55, %s5096_s10  ;;  %4413 = vmatpush.xpose.msk.msrb.mxu2 %vm371_vm1, %v3168_v55 }
0x1340   :  { %3255 = vrot.lane.b32.xlu0 %v3159_v1, %s5099_s7 }
0x1343   :  { %4414 = vmatpush.xpose.msk.msrb.mxu2 %vm371_vm1, %v3165_v2 }
0x1347   :  { %3239 = vrot.lane.b32.xlu2 %v3159_v1, %s5096_s10 }
0x134f   :  { %3253 = vrot.lane.b32.xlu2 %v3168_v55, %s5097_s27 }
0x1384   :  { %v3116_v30 = vpop.f32.mrf.mxu2 }
0x1385   :  { %v3117_v41 = vadd.f32 %v6090_v5, %v3116_v30 }
0x1387   :  { %3231 = vrot.lane.b32.xlu0 %v3117_v41, %s5099_s7  ;;  %3223 = vrot.lane.b32.xlu2 %v3117_v41, %s5096_s10 }
0x1388   :  { %4412 = vmatmul.msk.f32.vlgmr.msra.gmra.mxu1 %vm371_vm1, %v3117_v41 }
0x138f   :  { %3251 = vrot.lane.b32.xlu0 %v3165_v2, %s5097_s27 }
0x1397   :  { %3227 = vrot.lane.b32.xlu0 %v3117_v41, %s5097_s27 }
0x1398   :  { %v3205_v58 = vpop.f32.mrf.mxu0 }
0x1399   :  { %v3246_v33 = vpop.permute.xlu2 %3245 }
0x139a   :  { %4419 = vmatpush.xpose.msk.msra.mxu2 %vm371_vm1, %v3246_v33 }
0x13a0   :  { %v3208_v3 = vpop.f32.mrf.mxu0 }
0x13a1   :  { %v3240_v12 = vpop.permute.xlu2 %3239  ;;  %v3242_v23 = vpop.permute.xlu0 %3241 }
0x13a2   :  { %4416 = vmatpush.xpose.msk.msrb.mxu1 %vm371_vm1, %v3242_v23 }
0x13a5   :  { %v3119_v18 = vpop.f32.mrf.mxu2 }
0x13a6   :  { %v3120_v16 = vadd.f32 %v6090_v5, %v3119_v18  ;;  %4417 = vmatpush.xpose.msk.msrb.mxu1 %vm371_vm1, %v3240_v12 }
0x13a8   :  { %3225 = vrot.lane.b32.xlu1 %v3120_v16, %s5096_s10  ;;  %4415 = vmatmul.msk.f32.vlgmr.msrb.gmra.mxu2 %vm371_vm1, %v3120_v16  ;;  %v3211_v62 = vpop.f32.mrf.mxu0 }
0x13a9   :  { %3233 = vrot.lane.b32.xlu0 %v3120_v16, %s5099_s7  ;;  %3229 = vrot.lane.b32.xlu2 %v3120_v16, %s5097_s27  ;;  %v3244_v28 = vpop.permute.xlu1 %3243  ;;  %v3254_v24 = vpop.permute.xlu2 %3253 }
0x13aa   :  { %4420 = vmatpush.xpose.msk.msra.mxu2 %vm371_vm1, %v3244_v28  ;;  %v3258_v59 = vpop.permute.xlu0 %3257 }
0x13ab   :  { %4428 = vmatpush.xpose.msk.msrb.mxu3 %vm371_vm1, %v3258_v59 }
0x13ae   :  { %4425 = vmatpush.xpose.msk.msrb.mxu2 %vm371_vm1, %v3254_v24 }
0x13b0   :  { %3249 = vrot.lane.b32.xlu1 %v3162_v13, %s5097_s27 }
0x13b1   :  { %3261 = vrot.lane.b32.xlu2 %v3168_v55, %s5099_s7 }
0x13b2   :  { %v3256_v26 = vpop.permute.xlu0 %3255 }
0x13b3   :  { %4429 = vmatpush.xpose.msk.msrb.mxu3 %vm371_vm1, %v3256_v26 }
0x13b8   :  { %3247 = vrot.lane.b32.xlu1 %v3159_v1, %s5097_s27 }
0x13c0   :  { %3259 = vrot.lane.b32.xlu1 %v3165_v2, %s5099_s7 }
0x13e1   :  { %v3224_v27 = vpop.permute.xlu2 %3223 }
0x13e2   :  { %4418 = vmatmul.msk.f32.vlgmr.msrb.gmra.mxu1 %vm371_vm1, %v3224_v27 }
0x13f9   :  { %v3232_v45 = vpop.permute.xlu0 %3231 }
0x13fa   :  { %4430 = vmatmul.msk.f32.vlgmr.msrb.gmra.mxu3 %vm371_vm1, %v3232_v45 }
0x1401   :  { %v3252_v11 = vpop.permute.xlu0 %3251 }
0x1402   :  { %4426 = vmatpush.xpose.msk.msrb.mxu2 %vm371_vm1, %v3252_v11 }
0x1403   :  { %v3230_v57 = vpop.permute.xlu2 %3229 }
0x1405   :  { %v3326_v32 = vpop.f32.mrf.mxu1 }
0x1406   :  { %v3511_v31 = vmul.f32 0.35355338, %v3326_v32 }
0x1408   :  { %v3519_v60 = vsel %vm988_vm6, %v3511_v31, -inf }
0x1409   :  { %3520 = vmax.xlane.f32.xlu1 %v3519_v60  ;;  %v3228_v39 = vpop.permute.xlu0 %3227 }
0x140b   :  { %v3262_v34 = vpop.permute.xlu2 %3261 }
0x140c   :  { %4431 = vmatpush.xpose.msk.msrb.mxu0 %vm371_vm1, %v3262_v34 }
0x141a   :  { %v3226_v19 = vpop.permute.xlu1 %3225 }
0x141b   :  { %4421 = vmatmul.msk.f32.vlgmr.msra.gmra.mxu2 %vm371_vm1, %v3226_v19  ;;  %v3234_v47 = vpop.permute.xlu0 %3233 }
0x1422   :  { %v3250_v35 = vpop.permute.xlu1 %3249 }
0x1423   :  { %4422 = vmatpush.xpose.msk.msra.mxu1 %vm371_vm1, %v3250_v35  ;;  %4427 = vmatmul.msk.f32.vlgmr.msrb.gmra.mxu2 %vm371_vm1, %v3230_v57 }
0x142a   :  { %v3248_v54 = vpop.permute.xlu1 %3247 }
0x142b   :  { %v3352_v38 = vpop.f32.mrf.mxu2  ;;  %4423 = vmatpush.xpose.msk.msra.mxu1 %vm371_vm1, %v3248_v54 }
0x142c   :  { %v6159_v4 = vmul.f32 0.35355338, %v3352_v38 }
0x142e   :  { %4424 = vmatmul.msk.f32.vlgmr.msra.gmra.mxu1 %vm371_vm1, %v3228_v39  ;;  %v3522_v44 = vsel %vm988_vm6, %v6159_v4, -inf }
0x142f   :  { %3523 = vmax.xlane.f32.xlu0 %v3522_v44 }
0x1432   :  { %v3260_v46 = vpop.permute.xlu1 %3259 }
0x1433   :  { %4432 = vmatpush.xpose.msk.msrb.mxu0 %vm371_vm1, %v3260_v46 }
0x1436   :  { %4433 = vmatmul.msk.f32.vlgmr.msrb.gmra.mxu0 %vm371_vm1, %v3234_v47 }
0x145f   :  { %v3378_v49 = vpop.f32.mrf.mxu1 }
0x1460   :  { %v6166_v51 = vmul.f32 0.35355338, %v3378_v49 }
0x1462   :  { %v3525_v29 = vsel %vm988_vm6, %v6166_v51, -inf }
0x1463   :  { %3526 = vmax.xlane.f32.xlu2 %v3525_v29 }
0x147c   :  { %v3521_v63 = vpop.xlane.xlu1 %3520 }
0x147d   :  { %v3482_v42 = vpop.f32.mrf.mxu3  ;;  %v3543_v2 = vsub.f32 %v3511_v31, %v3521_v63 }
0x147e   :  { %v6170_v53 = vmul.f32 0.35355338, %v3482_v42 }
0x147f   :  { %v3551_v50 = vmul.f32 1.442695, %v3543_v2 }
0x1480   :  { %v3537_v9 = vsel %vm988_vm6, %v6170_v53, -inf }
0x1481   :  { %3538 = vmax.xlane.f32.xlu2 %v3537_v9  ;;  %4751 = vpow2.f32 %v3551_v50 }
0x1487   :  { %v4752_v7 = vpop.eup %4751 }
0x1488   :  { %v3567_v15 = vsel %vm988_vm6, %v4752_v7, 0.0 }
0x149e   :  { %v3404_v52 = vpop.f32.mrf.mxu2 }
0x149f   :  { %v3514_v6 = vmul.f32 0.35355338, %v3404_v52 }
0x14a1   :  { %v3528_v61 = vsel %vm988_vm6, %v3514_v6, -inf }
0x14a2   :  { %3529 = vmax.xlane.f32.xlu0 %v3528_v61  ;;  %v6183_v8 = vpop.xlane.xlu0 %3523 }
0x14a6   :  { %v3456_v46 = vpop.f32.mrf.mxu2 }
0x14a7   :  { %v3516_v47 = vmul.f32 0.35355338, %v3456_v46 }
0x14a9   :  { %v3534_v42 = vsel %vm988_vm6, %v3516_v47, -inf }
0x14ab   :  { %v3430_v0 = vpop.f32.mrf.mxu1 }
0x14ac   :  { %v6175_v13 = vmul.f32 0.35355338, %v3430_v0 }
0x14ae   :  { %v3531_v1 = vsel %vm988_vm6, %v6175_v13, -inf }
0x14af   :  { %3532 = vmax.xlane.f32.xlu1 %v3531_v1 }
0x14b3   :  { %v3508_v55 = vpop.f32.mrf.mxu0 }
0x14b4   :  { %v3518_v30 = vmul.f32 0.35355338, %v3508_v55 }
0x14b6   :  { %3182 = vrot.lane.b32.xlu0 %v6090_v5, %s5100_s14  ;;  %v3540_v41 = vsel %vm988_vm6, %v3518_v30, -inf }
0x14b7   :  { %3541 = vmax.xlane.f32.xlu1 %v3540_v41 }
0x14bf   :  { %3568 = vadd.xlane.f32.xlu1 %v3567_v15 }
0x14d6   :  { %v3527_v27 = vpop.xlane.xlu2 %3526 }
0x14f4   :  { %v3539_v19 = vpop.xlane.xlu2 %3538 }
0x14f5   :  { %v3549_v38 = vsub.f32 %v6170_v53, %v3539_v19 }
0x14f7   :  { %v3563_v39 = vmul.f32 1.442695, %v3549_v38 }
0x1515   :  { %v3530_v14 = vpop.xlane.xlu0 %3529 }
0x1516   :  { %v3546_v36 = vsub.f32 %v3514_v6, %v3530_v14 }
0x1518   :  { %v3557_v18 = vmul.f32 1.442695, %v3546_v36 }
0x151a   :  { %4753 = vpow2.f32 %v3557_v18 }
0x1520   :  { %v6185_v16 = vpop.eup %4753 }
0x1521   :  { %v3576_v20 = vsel %vm988_vm6, %v6185_v16, 0.0 }
0x1522   :  { %3577 = vadd.xlane.f32.xlu0 %v3576_v20  ;;  %v6189_v5 = vpop.xlane.xlu1 %3532 }
0x1523   :  { %v3547_v2 = vsub.f32 %v6175_v13, %v6189_v5 }
0x1528   :  { %v3183_v33 = vpop.permute.xlu0 %3182 }
0x1529   :  { %v3203_v48 = vadd.f32 %v3202_v56, %v3183_v33  ;;  %v3206_v10 = vadd.f32 %v3205_v58, %v3183_v33  ;;  %v3209_v12 = vadd.f32 %v3208_v3, %v3183_v33  ;;  %v3212_v22 = vadd.f32 %v3211_v62, %v3183_v33 }
0x152a   :  { %v3542_v23 = vpop.xlane.xlu1 %3541  ;;  %v3544_v58 = vsub.f32 %v6159_v4, %v6183_v8  ;;  %v3545_v62 = vsub.f32 %v6166_v51, %v3527_v27  ;;  %v3559_v4 = vmul.f32 1.442695, %v3547_v2 }
0x152b   :  { %3728 = vmatpush.msrb.mxu1 %v3206_v10  ;;  %3751 = vmatpush.msra.mxu2 %v3212_v22  ;;  %v4577_v28 = vpack.i.bf16 %v3203_v48, %v3206_v10  ;;  %v6191_v24 = vpack.i.bf16 %v3209_v12, %v3212_v22  ;;  %v3550_v44 = vsub.f32 %v3518_v30, %v3542_v23 }
0x152c   :  { %v3553_v3 = vmul.f32 1.442695, %v3544_v58  ;;  %v3555_v63 = vmul.f32 1.442695, %v3545_v62 }
0x152d   :  { %3729 = vmatpush.msrb.mxu1 %v3203_v48  ;;  %3752 = vmatpush.msra.mxu2 %v3209_v12  ;;  %v3565_v49 = vmul.f32 1.442695, %v3550_v44 }
0x152e   :  { %4578 = vrot.lane.b32.xlu2 %v4577_v28, %s5096_s10  ;;  %4583 = vrot.lane.b32.xlu1 %v4577_v28, %s5099_s7 }
0x1532   :  { %v3569_v25 = vpop.xlane.xlu1 %3568 }
0x1533   :  { %4755 = vrcp.f32 %v3569_v25  ;;  %v3602_v11 = vand.u32 2147483648, %v3569_v25  ;;  %v3600_v32 = vand.u32 2147483647, %v3569_v25  ;;  %vm3596_vm5 = vweird.f32 %v3569_v25 }
0x1534   :  { %4757 = vpow2.f32 %v3563_v39 }
0x1535   :  { %v3603_v60 = vor.u32 1.1754944e-38, %v3602_v11  ;;  %vm3601_vm9 = vcmp.eq.f32.partialorder %v3600_v32, 8.507059e+37  ;;  %4759 = vpow2.f32 %v3565_v49 }
0x1536   :  { %4603 = vrot.lane.b32.xlu0 %v6191_v24, %s5099_s7  ;;  %4761 = vpow2.f32 %v3553_v3 }
0x1537   :  { %4763 = vpow2.f32 %v3555_v63 }
0x1538   :  { %4765 = vpow2.f32 %v3559_v4 }
0x1539   :  { %v4756_v59 = vpop.eup %4755 }
0x153a   :  { %v3592_v26 = vmul.f32 %v4756_v59, %v3569_v25  ;;  %vm3597_vm4 = vweird.f32 %v4756_v59  ;;  %v6199_v29 = vpop.eup %4757 }
0x153b   :  { %vm3598_vm8 = vmor %vm3596_vm5, %vm3597_vm4  ;;  %v3585_v9 = vsel %vm988_vm6, %v6199_v29, 0.0  ;;  %v6204_v56 = vpop.eup %4759 }
0x153c   :  { %v3593_v45 = vsub.f32 1.0, %v3592_v26  ;;  %v3588_v53 = vsel %vm988_vm6, %v6204_v56, 0.0  ;;  %v6212_v0 = vpop.eup %4761 }
0x153d   :  { %v3570_v1 = vsel %vm988_vm6, %v6212_v0, 0.0  ;;  %v6218_v50 = vpop.eup %4763 }
0x153e   :  { %v3594_v57 = vmul.f32 %v4756_v59, %v3593_v45  ;;  %v3573_v55 = vsel %vm988_vm6, %v6218_v50, 0.0 }
0x1540   :  { %v3595_v31 = vadd.f32 %v4756_v59, %v3594_v57 }
0x1542   :  { %v3599_v34 = vsel %vm3598_vm8, %v4756_v59, %v3595_v31 }
0x1543   :  { %v3604_v35 = vsel %vm3601_vm9, %v3603_v60, %v3599_v34 }
0x1544   :  { %v3605_v54 = vmul.f32 %v4752_v7, %v3604_v35  ;;  %v6222_v7 = vpop.eup %4765 }
0x1545   :  { %v3579_v13 = vsel %vm988_vm6, %v6222_v7, 0.0 }
0x1546   :  { %4434 = vmatmul.msk.f32.vlgmr.msrb.gmra.mxu1 %vm988_vm6, %v3605_v54 }
0x1557   :  { %3535 = vmax.xlane.f32.xlu2 %v3534_v42 }
0x1558   :  { %3586 = vadd.xlane.f32.xlu1 %v3585_v9 }
0x1560   :  { %3589 = vadd.xlane.f32.xlu1 %v3588_v53 }
0x156f   :  { %4588 = vrot.lane.b32.xlu2 %v4577_v28, %s5097_s27 }
0x1588   :  { %v4579_v52 = vpop.permute.xlu2 %4578 }
0x1589   :  { %v4580_v6 = vunpack.i.l.bf16 %v4579_v52  ;;  %v4581_v61 = vunpack.i.h.bf16 %v4579_v52 }
0x158b   :  { %3774 = vmatpush.msra.mxu3 %v4580_v6 }
0x158d   :  { %3775 = vmatpush.msra.mxu3 %v4581_v61 }
0x1595   :  { %v3578_v48 = vpop.xlane.xlu0 %3577 }
0x1596   :  { %vm3641_vm12 = vweird.f32 %v3578_v48  ;;  %v3647_v35 = vand.u32 2147483648, %v3578_v48  ;;  %v3645_v38 = vand.u32 2147483647, %v3578_v48 }
0x1598   :  { %3571 = vadd.xlane.f32.xlu2 %v3570_v1  ;;  %v3648_v52 = vor.u32 1.1754944e-38, %v3647_v35  ;;  %vm3646_vm4 = vcmp.eq.f32.partialorder %v3645_v38, 8.507059e+37 }
0x15a0   :  { %3574 = vadd.xlane.f32.xlu2 %v3573_v55  ;;  %v4584_v51 = vpop.permute.xlu1 %4583 }
0x15a1   :  { %v4585_v30 = vunpack.i.l.bf16 %v4584_v51  ;;  %v4586_v41 = vunpack.i.h.bf16 %v4584_v51 }
0x15a3   :  { %3866 = vmatpush.msrb.mxu3 %v4585_v30 }
0x15a5   :  { %3867 = vmatpush.msrb.mxu3 %v4586_v41 }
0x15a8   :  { %3580 = vadd.xlane.f32.xlu2 %v3579_v13 }
0x15c0   :  { %4593 = vrot.lane.b32.xlu2 %v6191_v24, %s5096_s10 }
0x15ca   :  { %v3536_v15 = vpop.xlane.xlu2 %3535 }
0x15cb   :  { %v3548_v8 = vsub.f32 %v3516_v47, %v3536_v15  ;;  %v6234_v10 = vpop.xlane.xlu1 %3586 }
0x15cc   :  { %vm3686_vm9 = vweird.f32 %v6234_v10 }
0x15cd   :  { %v3561_v14 = vmul.f32 1.442695, %v3548_v8 }
0x15cf   :  { %4767 = vpow2.f32 %v3561_v14 }
0x15d0   :  { %4769 = vrcp.f32 %v3578_v48 }
0x15d2   :  { %v4589_v36 = vpop.permute.xlu2 %4588 }
0x15d3   :  { %v4590_v18 = vunpack.i.l.bf16 %v4589_v36  ;;  %v4591_v5 = vunpack.i.h.bf16 %v4589_v36  ;;  %v6236_v28 = vpop.xlane.xlu1 %3589 }
0x15d5   :  { %v6228_v20 = vpop.eup %4767  ;;  %3820 = vmatpush.msra.mxu1 %v4590_v18  ;;  %v3692_v18 = vand.u32 2147483648, %v6234_v10 }
0x15d6   :  { %v3582_v33 = vsel %vm988_vm6, %v6228_v20, 0.0  ;;  %v4770_v12 = vpop.eup %4769 }
0x15d7   :  { %3821 = vmatpush.msra.mxu1 %v4591_v5  ;;  %3583 = vadd.xlane.f32.xlu1 %v3582_v33  ;;  %v3637_v22 = vmul.f32 %v4770_v12, %v3578_v48  ;;  %vm3642_vm10 = vweird.f32 %v4770_v12  ;;  %v4604_v48 = vpop.permute.xlu0 %4603 }
0x15d8   :  { %vm6246_vm13 = vmor %vm3641_vm12, %vm3642_vm10 }
0x15d9   :  { %v3638_v25 = vsub.f32 1.0, %v3637_v22 }
0x15db   :  { %v3639_v26 = vmul.f32 %v4770_v12, %v3638_v25 }
0x15dd   :  { %v3640_v32 = vadd.f32 %v4770_v12, %v3639_v26  ;;  %v3707_v26 = vand.u32 2147483648, %v6236_v28 }
0x15df   :  { %v3644_v47 = vsel %vm6246_vm13, %v4770_v12, %v3640_v32  ;;  %vm3701_vm13 = vweird.f32 %v6236_v28  ;;  %v4605_v32 = vunpack.i.l.bf16 %v4604_v48  ;;  %v3708_v54 = vor.u32 1.1754944e-38, %v3707_v26 }
0x15e0   :  { %v3649_v63 = vsel %vm3646_vm4, %v3648_v52, %v3644_v47 }
0x15e1   :  { %v3650_v51 = vmul.f32 %v6185_v16, %v3649_v63 }
0x15f0   :  { %4598 = vrot.lane.b32.xlu1 %v6191_v24, %s5097_s27 }
0x160b   :  { %v3572_v23 = vpop.xlane.xlu2 %3571 }
0x160c   :  { %4771 = vrcp.f32 %v3572_v23  ;;  %v3617_v31 = vand.u32 2147483648, %v3572_v23  ;;  %v3615_v19 = vand.u32 2147483647, %v3572_v23  ;;  %vm3611_vm14 = vweird.f32 %v3572_v23 }
0x160d   :  { %4773 = vrcp.f32 %v6234_v10 }
0x160e   :  { %4775 = vrcp.f32 %v6236_v28  ;;  %v3618_v49 = vor.u32 1.1754944e-38, %v3617_v31  ;;  %vm3616_vm2 = vcmp.eq.f32.partialorder %v3615_v19, 8.507059e+37  ;;  %v3693_v31 = vor.u32 1.1754944e-38, %v3692_v18 }
0x160f   :  { %v4606_v19 = vunpack.i.h.bf16 %v4604_v48 }
0x1612   :  { %v4772_v59 = vpop.eup %4771 }
0x1613   :  { %v3607_v27 = vmul.f32 %v4772_v59, %v3572_v23  ;;  %v3575_v45 = vpop.xlane.xlu2 %3574  ;;  %v6240_v24 = vpop.eup %4773  ;;  %vm3612_vm11 = vweird.f32 %v4772_v59 }
0x1614   :  { %4777 = vrcp.f32 %v3575_v45  ;;  %v6242_v57 = vpop.eup %4775  ;;  %v3682_v60 = vmul.f32 %v6240_v24, %v6234_v10  ;;  %vm3613_vm15 = vmor %vm3611_vm14, %vm3612_vm11  ;;  %v3632_v2 = vand.u32 2147483648, %v3575_v45  ;;  %v3630_v55 = vand.u32 2147483647, %v3575_v45 }
0x1615   :  { %v3608_v11 = vsub.f32 1.0, %v3607_v27  ;;  %v3697_v39 = vmul.f32 %v6242_v57, %v6236_v28  ;;  %vm3626_vm8 = vweird.f32 %v3575_v45  ;;  %vm3687_vm10 = vweird.f32 %v6240_v24 }
0x1616   :  { %v3683_v42 = vsub.f32 1.0, %v3682_v60  ;;  %v3633_v15 = vor.u32 1.1754944e-38, %v3632_v2  ;;  %vm3631_vm12 = vcmp.eq.f32.partialorder %v3630_v55, 8.507059e+37  ;;  %vm3702_vm14 = vweird.f32 %v6242_v57 }
0x1617   :  { %v3609_v34 = vmul.f32 %v4772_v59, %v3608_v11  ;;  %v3698_v3 = vsub.f32 1.0, %v3697_v39  ;;  %vm6292_vm4 = vmor %vm3701_vm13, %vm3702_vm14 }
0x1618   :  { %v3684_v1 = vmul.f32 %v6240_v24, %v3683_v42 }
0x1619   :  { %v3610_v44 = vadd.f32 %v4772_v59, %v3609_v34  ;;  %v3699_v30 = vmul.f32 %v6242_v57, %v3698_v3 }
0x161a   :  { %v4778_v46 = vpop.eup %4777  ;;  %v3685_v8 = vadd.f32 %v6240_v24, %v3684_v1  ;;  %v3731_v1 = vpop.f32.mrf.mxu1 }
0x161b   :  { %v3614_v9 = vsel %vm3613_vm15, %v4772_v59, %v3610_v44  ;;  %v3622_v53 = vmul.f32 %v4778_v46, %v3575_v45  ;;  %v6254_v58 = vpop.xlane.xlu2 %3580  ;;  %vm3627_vm5 = vweird.f32 %v4778_v46  ;;  %v3700_v12 = vadd.f32 %v6242_v57, %v3699_v30  ;;  %vm6276_vm15 = vmor %vm3686_vm9, %vm3687_vm10 }
0x161c   :  { %v3619_v6 = vsel %vm3616_vm2, %v3618_v49, %v3614_v9  ;;  %4779 = vrcp.f32 %v6254_v58  ;;  %vm3628_vm11 = vmor %vm3626_vm8, %vm3627_vm5  ;;  %v3705_v59 = vand.u32 2147483647, %v6236_v28  ;;  %v3662_v27 = vand.u32 2147483648, %v6254_v58 }
0x161d   :  { %v3620_v61 = vmul.f32 %v6212_v0, %v3619_v6  ;;  %v3623_v62 = vsub.f32 1.0, %v3622_v53  ;;  %v3690_v0 = vand.u32 2147483647, %v6234_v10  ;;  %v3660_v10 = vand.u32 2147483647, %v6254_v58 }
0x161e   :  { %vm3656_vm8 = vweird.f32 %v6254_v58  ;;  %v3663_v28 = vor.u32 1.1754944e-38, %v3662_v27  ;;  %vm3706_vm10 = vcmp.eq.f32.partialorder %v3705_v59, 8.507059e+37  ;;  %v4624_v27 = vld [vmem:[%s6462_s11 + $0x1] ss:$0 sm:$0xff] }
0x161f   :  { %v3624_v4 = vmul.f32 %v4778_v46, %v3623_v62  ;;  %4435 = vmatmul.msk.f32.vlgmr.msra.gmra.mxu2 %vm988_vm6, %v3620_v61  ;;  %vm3691_vm5 = vcmp.eq.f32.partialorder %v3690_v0, 8.507059e+37  ;;  %v3218_v0 = vld [vmem:[#allocation10 + $0x38] sm:$0xff] }
0x1620   :  { %3946 = vmatpush.msrb.mxu1 %v3218_v0  ;;  %v4451_v0 = vld [vmem:[%s6471_s20 + $0x58] sm:$0xff] }
0x1621   :  { %v3625_v41 = vadd.f32 %v4778_v46, %v3624_v4 }
0x1622   :  { %v4780_v13 = vpop.eup %4779 }
0x1623   :  { %v3629_v14 = vsel %vm3628_vm11, %v4778_v46, %v3625_v41  ;;  %v3652_v36 = vmul.f32 %v4780_v13, %v6254_v58  ;;  %v4594_v16 = vpop.permute.xlu2 %4593  ;;  %vm3657_vm2 = vweird.f32 %v4780_v13  ;;  %vm3661_vm11 = vcmp.eq.f32.partialorder %v3660_v10, 8.507059e+37 }
0x1624   :  { %v3634_v5 = vsel %vm3631_vm12, %v3633_v15, %v3629_v14  ;;  %v4595_v33 = vunpack.i.l.bf16 %v4594_v16  ;;  %v4596_v45 = vunpack.i.h.bf16 %v4594_v16  ;;  %vm3658_vm9 = vmor %vm3656_vm8, %vm3657_vm2  ;;  %v3217_v15 = vld [vmem:[#allocation10 + $0x30] sm:$0xff]  ;;  %v3215_v14 = vld [vmem:[#allocation10 + $0x20] sm:$0xff] }
0x1625   :  { %v3653_v22 = vsub.f32 1.0, %v3652_v36  ;;  %v3635_v23 = vmul.f32 %v6218_v50, %v3634_v5  ;;  %v3689_v50 = vsel %vm6276_vm15, %v6240_v24, %v3685_v8  ;;  %v3704_v24 = vsel %vm6292_vm4, %v6242_v57, %v3700_v12  ;;  %v3216_v8 = vld [vmem:[#allocation10 + $0x28] sm:$0xff]  ;;  %3947 = vmatpush.msrb.mxu1 %v3217_v15 }
0x1626   :  { %3797 = vmatpush.msra.mxu0 %v4595_v33  ;;  %v3694_v35 = vsel %vm3691_vm5, %v3693_v31, %v3689_v50  ;;  %v3709_v39 = vsel %vm3706_vm10, %v3708_v54, %v3704_v24 }
0x1627   :  { %v3654_v11 = vmul.f32 %v4780_v13, %v3653_v22  ;;  %4436 = vmatmul.msk.f32.vlgmr.msra.gmra.mxu3 %vm988_vm6, %v3635_v23  ;;  %v3695_v46 = vmul.f32 %v6199_v29, %v3694_v35  ;;  %v3710_v47 = vmul.f32 %v6204_v56, %v3709_v39  ;;  %3948 = vmatpush.msrb.mxu1 %v3216_v8 }
0x1628   :  { %3798 = vmatpush.msra.mxu0 %v4596_v45 }
0x1629   :  { %v3655_v34 = vadd.f32 %v4780_v13, %v3654_v11  ;;  %4437 = vmatmul.msk.f32.vlgmr.msra.gmra.mxu0 %vm988_vm6, %v3650_v51  ;;  %3949 = vmatpush.msrb.mxu1 %v3215_v14 }
0x162a   :  { %3889 = vmatpush.msrb.mxu0 %v4605_v32 }
0x162b   :  { %v3659_v38 = vsel %vm3658_vm9, %v4780_v13, %v3655_v34 }
0x162c   :  { %v3664_v44 = vsel %vm3661_vm11, %v3663_v28, %v3659_v38  ;;  %3890 = vmatpush.msrb.mxu0 %v4606_v19 }
0x162d   :  { %v3665_v57 = vmul.f32 %v6222_v7, %v3664_v44 }
0x162f   :  { %4438 = vmatmul.msk.f32.vlgmr.msra.gmra.mxu1 %vm988_vm6, %v3665_v57  ;;  %4440 = vmatmul.msk.f32.vlgmr.msrb.gmra.mxu3 %vm988_vm6, %v3695_v46  ;;  %v4020_v46 = vld [vmem:[#allocation16 + $0x30] sm:$0xff] }
0x1631   :  { %4441 = vmatmul.msk.f32.vlgmr.msrb.gmra.mxu0 %vm988_vm6, %v3710_v47  ;;  %v4019_v47 = vld [vmem:[#allocation16 + $0x28] sm:$0xff] }
0x164a   :  { %v3584_v49 = vpop.xlane.xlu1 %3583 }
0x164b   :  { %4781 = vrcp.f32 %v3584_v49  ;;  %v3677_v6 = vand.u32 2147483648, %v3584_v49  ;;  %vm3671_vm13 = vweird.f32 %v3584_v49  ;;  %v3675_v7 = vand.u32 2147483647, %v3584_v49 }
0x164d   :  { %v3678_v56 = vor.u32 1.1754944e-38, %v3677_v6  ;;  %vm3676_vm15 = vcmp.eq.f32.partialorder %v3675_v7, 8.507059e+37 }
0x1651   :  { %v4782_v42 = vpop.eup %4781 }
0x1652   :  { %v3667_v9 = vmul.f32 %v4782_v42, %v3584_v49  ;;  %vm3672_vm12 = vweird.f32 %v4782_v42  ;;  %v4018_v49 = vld [vmem:[#allocation16 + $0x20] sm:$0xff] }
0x1653   :  { %vm3673_vm14 = vmor %vm3671_vm13, %vm3672_vm12 }
0x1654   :  { %v3668_v53 = vsub.f32 1.0, %v3667_v9 }
0x1656   :  { %v3669_v58 = vmul.f32 %v4782_v42, %v3668_v53 }
0x1658   :  { %v3670_v52 = vadd.f32 %v4782_v42, %v3669_v58 }
0x165a   :  { %v3674_v29 = vsel %vm3673_vm14, %v4782_v42, %v3670_v52 }
0x165b   :  { %v3679_v61 = vsel %vm3676_vm15, %v3678_v56, %v3674_v29 }
0x165c   :  { %v3680_v2 = vmul.f32 %v6228_v20, %v3679_v61 }
0x1662   :  { %v4599_v3 = vpop.permute.xlu1 %4598 }
0x1663   :  { %v4600_v62 = vunpack.i.l.bf16 %v4599_v3  ;;  %v4601_v63 = vunpack.i.h.bf16 %v4599_v3  ;;  %v4625_v3 = vld [vmem:[#allocation13 + $0x1] ss:$0 sm:$0xff] }
0x1665   :  { %3843 = vmatpush.msrb.mxu2 %v4600_v62  ;;  %v4626_v62 = vld [vmem:[%s6466_s15 + $0x1] ss:$0 sm:$0xff] }
0x1667   :  { %3844 = vmatpush.msrb.mxu2 %v4601_v63 }
0x1668   :  { %4439 = vmatmul.msk.f32.vlgmr.msrb.gmra.mxu2 %vm988_vm6, %v3680_v2 }
0x16a2   :  { %v3754_v20 = vpop.f32.mrf.mxu2 }
0x16a6   :  { %v3800_v4 = vpop.f32.mrf.mxu0 }
0x16aa   :  { %v3777_v55 = vpop.f32.mrf.mxu3 }
0x16ab   :  { %3897 = vrot.lane.b32.xlu2 %v3777_v55, %s5085_s28  ;;  %v4454_v55 = vld [vmem:[%s6471_s20 + $0x70] sm:$0xff] }
0x16ac   :  { %v3823_v51 = vpop.f32.mrf.mxu1 }
0x16ad   :  { %3905 = vrot.lane.b32.xlu1 %v3823_v51, %s6519_s4  ;;  %v4453_v51 = vld [vmem:[%s6471_s20 + $0x68] sm:$0xff] }
0x16ae   :  { %v3892_v30 = vpop.f32.mrf.mxu0 }
0x16af   :  { %3915 = vrot.lane.b32.xlu0 %v3892_v30, %s6520_s9 }
0x16b2   :  { %v3869_v41 = vpop.f32.mrf.mxu3 }
0x16b3   :  { %3913 = vrot.lane.b32.xlu2 %v3869_v41, %s6520_s9 }
0x16b5   :  { %3899 = vrot.lane.b32.xlu1 %v3800_v4, %s5085_s28  ;;  %v4455_v4 = vld [vmem:[%s6471_s20 + $0x78] sm:$0xff] }
0x16b6   :  { %4086 = vmatpush.msra.mxu3 %v4455_v4 }
0x16b8   :  { %4087 = vmatpush.msra.mxu3 %v4454_v55 }
0x16ba   :  { %4088 = vmatpush.msra.mxu3 %v4453_v51 }
0x16eb   :  { %v3846_v13 = vpop.f32.mrf.mxu2 }
0x16ec   :  { %3907 = vrot.lane.b32.xlu2 %v3846_v13, %s6519_s4 }
0x1705   :  { %v3898_v36 = vpop.permute.xlu2 %3897 }
0x1706   :  { %v3919_v16 = vsel %vm371_vm1, %v3731_v1, %v3898_v36 }
0x170d   :  { %v3914_v5 = vpop.permute.xlu2 %3913 }
0x171f   :  { %v3906_v18 = vpop.permute.xlu1 %3905 }
0x1720   :  { %v3921_v33 = vsel %vm988_vm6, %v3919_v16, %v3906_v18 }
0x1721   :  { %v3923_v48 = vsel %vm991_vm7, %v3921_v33, %v3914_v5  ;;  %v3916_v25 = vpop.permute.xlu0 %3915 }
0x1722   :  { %4442 = vmatmul.msk.f32.vlgmr.msrb.gmra.mxu1 %vm252_vm0, %v3923_v48 }
0x1727   :  { %v3900_v12 = vpop.permute.xlu1 %3899 }
0x1728   :  { %v3920_v22 = vsel %vm371_vm1, %v3754_v20, %v3900_v12  ;;  %v4452_v20 = vld [vmem:[%s6471_s20 + $0x60] sm:$0xff] }
0x1729   :  { %4089 = vmatpush.msra.mxu3 %v4452_v20  ;;  %v4630_v20 = vld [vmem:[#allocation14 + $0x1] ss:$0 sm:$0xff] }
0x172b   :  { %4090 = vmatpush.msra.mxu3 %v4451_v0 }
0x1746   :  { %v3908_v23 = vpop.permute.xlu2 %3907 }
0x1747   :  { %v3922_v59 = vsel %vm988_vm6, %v3920_v22, %v3908_v23  ;;  %v4450_v22 = vld [vmem:[%s6471_s20 + $0x50] sm:$0xff]  ;;  %v4449_v23 = vld [vmem:[%s6471_s20 + $0x48] sm:$0xff] }
0x1748   :  { %v3924_v26 = vsel %vm991_vm7, %v3922_v59, %v3916_v25  ;;  %4091 = vmatpush.msra.mxu3 %v4450_v22  ;;  %v4448_v25 = vld [vmem:[%s6471_s20 + $0x40] sm:$0xff] }
0x1749   :  { %4443 = vmatmul.msk.f32.gmra.mxu1 %vm252_vm0, %v3924_v26  ;;  %v4627_v59 = vld [vmem:[%s6470_s19 + $0x1] ss:$0 sm:$0xff] }
0x174a   :  { %4092 = vmatpush.msra.mxu3 %v4449_v23 }
0x174c   :  { %4093 = vmatpush.msra.mxu3 %v4448_v25 }
0x179f   :  { %v3951_v45 = vpop.f32.mrf.mxu1 }
0x17a0   :  { %v3952_v50 = vadd.f32 %v4624_v27, %v3951_v45 }
0x17a2   :  { %v3957_v11 = vadd.f32 %v3952_v50, %v6098_v40 }
0x17a4   :  { %v3963_v10 = vsel %vm252_vm0, %v3957_v11, 0.0 }
0x17a5   :  { %3964 = vadd.xlane.f32.xlu1 %v3963_v10 }
0x17c6   :  { %v3954_v32 = vpop.f32.mrf.mxu1 }
0x17c7   :  { %v3955_v31 = vadd.f32 %v4624_v27, %v3954_v32  ;;  %v4628_v32 = vld [vmem:[%s6472_s21 + $0x1] ss:$0 sm:$0xff] }
0x17c9   :  { %v3958_v60 = vadd.f32 %v3955_v31, %v6104_v37  ;;  %v4021_v37 = vld [vmem:[#allocation16 + $0x38] sm:$0xff] }
0x17ca   :  { %4045 = vmatpush.msra.mxu2 %v4021_v37 }
0x17cb   :  { %v3966_v24 = vsel %vm252_vm0, %v3958_v60, 0.0 }
0x17cc   :  { %3967 = vadd.xlane.f32.xlu2 %v3966_v24  ;;  %4046 = vmatpush.msra.mxu2 %v4020_v46  ;;  %v2184_v46 = vsel %vm252_vm0, %v5826_v43, 0.0 }
0x17ce   :  { %4047 = vmatpush.msra.mxu2 %v4019_v47 }
0x17d0   :  { %4048 = vmatpush.msra.mxu2 %v4018_v49 }
0x1818   :  { %v3965_v34 = vpop.xlane.xlu1 %3964 }
0x1819   :  { %v3969_v19 = vmul.f32 %v3965_v34, %v5514_v17 }
0x181b   :  { %v3971_v35 = vsub.f32 %v3957_v11, %v3969_v19 }
0x181d   :  { %v3973_v54 = vmul.f32 %v3971_v35, %v3971_v35 }
0x181f   :  { %v3975_v28 = vsel %vm252_vm0, %v3973_v54, 0.0 }
0x1820   :  { %3976 = vadd.xlane.f32.xlu0 %v3975_v28 }
0x183f   :  { %v3968_v38 = vpop.xlane.xlu2 %3967 }
0x1840   :  { %v3970_v40 = vmul.f32 %v3968_v38, %v5514_v17  ;;  %v2181_v38 = vsel %vm252_vm0, %v5819_v21, 0.0 }
0x1842   :  { %v3972_v39 = vsub.f32 %v3958_v60, %v3970_v40 }
0x1844   :  { %v3974_v44 = vmul.f32 %v3972_v39, %v3972_v39 }
0x1846   :  { %v3978_v57 = vsel %vm252_vm0, %v3974_v44, 0.0 }
0x1847   :  { %3979 = vadd.xlane.f32.xlu1 %v3978_v57 }
0x1893   :  { %v3977_v42 = vpop.xlane.xlu0 %3976 }
0x1894   :  { %v3981_v9 = vmul.f32 %v3977_v42, %v5514_v17 }
0x1896   :  { %v3983_v53 = vadd.f32 1e-05, %v3981_v9 }
0x1898   :  { %4783 = vrsqrt.f32 %v3983_v53  ;;  %vm3991_vm6 = vweird.f32 %v3983_v53 }
0x189e   :  { %v4784_v58 = vpop.eup %4783 }
0x189f   :  { %v3986_v52 = vmul.f32 %v4784_v58, %v3983_v53  ;;  %vm3992_vm1 = vweird.f32 %v4784_v58 }
0x18a0   :  { %vm3993_vm7 = vmor %vm3991_vm6, %vm3992_vm1 }
0x18a1   :  { %v3987_v6 = vmul.f32 %v4784_v58, %v3986_v52 }
0x18a3   :  { %v3988_v7 = vmul.f32 0.5, %v3987_v6 }
0x18a5   :  { %v3989_v29 = vsub.f32 1.5, %v3988_v7 }
0x18a7   :  { %v3990_v56 = vmul.f32 %v4784_v58, %v3989_v29 }
0x18a9   :  { %v3994_v61 = vsel %vm3993_vm7, %v4784_v58, %v3990_v56 }
0x18aa   :  { %v4005_v63 = vmul.f32 %v3994_v61, %v3971_v35 }
0x18ac   :  { %v4010_v2 = vmul.f32 %v4625_v3, %v4005_v63 }
0x18ae   :  { %v4015_v1 = vadd.f32 %v4626_v62, %v4010_v2 }
0x18b0   :  { %4446 = vmatmul.msk.f32.vlgmr.msra.gmra.mxu2 %vm252_vm0, %v4015_v1 }
0x18ba   :  { %v3980_v30 = vpop.xlane.xlu1 %3979 }
0x18bb   :  { %v3982_v41 = vmul.f32 %v3980_v30, %v5514_v17 }
0x18bd   :  { %v3984_v13 = vadd.f32 1e-05, %v3982_v41 }
0x18bf   :  { %4785 = vrsqrt.f32 %v3984_v13  ;;  %vm4001_vm4 = vweird.f32 %v3984_v13 }
0x18c5   :  { %v4786_v15 = vpop.eup %4785 }
0x18c6   :  { %v3996_v8 = vmul.f32 %v4786_v15, %v3984_v13  ;;  %vm4002_vm2 = vweird.f32 %v4786_v15 }
0x18c7   :  { %vm4003_vm5 = vmor %vm4001_vm4, %vm4002_vm2 }
0x18c8   :  { %v3997_v14 = vmul.f32 %v4786_v15, %v3996_v8 }
0x18ca   :  { %v3998_v36 = vmul.f32 0.5, %v3997_v14 }
0x18cc   :  { %v3999_v16 = vsub.f32 1.5, %v3998_v36 }
0x18ce   :  { %v4000_v18 = vmul.f32 %v4786_v15, %v3999_v16 }
0x18d0   :  { %v4004_v5 = vsel %vm4003_vm5, %v4786_v15, %v4000_v18 }
0x18d1   :  { %v4006_v33 = vmul.f32 %v4004_v5, %v3972_v39 }
0x18d3   :  { %v4011_v48 = vmul.f32 %v4625_v3, %v4006_v33 }
0x18d5   :  { %v4016_v12 = vadd.f32 %v4626_v62, %v4011_v48 }
0x18d7   :  { %4447 = vmatmul.msk.f32.gmra.mxu2 %vm252_vm0, %v4016_v12 }
0x1933   :  { %v4050_v26 = vpop.f32.mrf.mxu2 }
0x1934   :  { %v4051_v27 = vadd.f32 %v4627_v59, %v4050_v26 }
0x1936   :  { %v4056_v45 = vmax.f32 %v4051_v27, 0.0 }
0x1938   :  { %4457 = vmatmul.msk.f32.vlgmr.msra.gmra.mxu3 %vm2091_vm3, %v4056_v45 }
0x195a   :  { %v4053_v50 = vpop.f32.mrf.mxu2 }
0x195b   :  { %v4054_v11 = vadd.f32 %v4627_v59, %v4053_v50 }
0x195d   :  { %v4057_v10 = vmax.f32 %v4054_v11, 0.0 }
0x195f   :  { %4458 = vmatmul.msk.f32.gmra.mxu3 %vm2091_vm3, %v4057_v10 }
0x19bb   :  { %v4095_v31 = vpop.f32.mrf.mxu3 }
0x19bc   :  { %v4096_v60 = vadd.f32 %v4628_v32, %v4095_v31 }
0x19be   :  { %v4101_v24 = vadd.f32 %v4096_v60, %v4015_v1 }
0x19c0   :  { %v4107_v34 = vsel %vm252_vm0, %v4101_v24, 0.0 }
0x19c1   :  { %4108 = vadd.xlane.f32.xlu2 %v4107_v34 }
0x19e2   :  { %v4098_v19 = vpop.f32.mrf.mxu3 }
0x19e3   :  { %v4099_v35 = vadd.f32 %v4628_v32, %v4098_v19 }
0x19e5   :  { %v4102_v54 = vadd.f32 %v4099_v35, %v4016_v12  ;;  %v4631_v35 = vld [vmem:[%s6473_s22] ss:$0 sm:$0xff] }
0x19e7   :  { %v4110_v28 = vsel %vm252_vm0, %v4102_v54, 0.0 }
0x19e8   :  { %4111 = vadd.xlane.f32.xlu0 %v4110_v28 }
0x19f0   :  { %2182 = vadd.xlane.f32.xlu0 %v2181_v38  ;;  %v4632_v38 = vld [vmem:[%s6474_s23] ss:$0 sm:$0xff] }
0x1a34   :  { %v4109_v40 = vpop.xlane.xlu2 %4108 }
0x1a35   :  { %v4113_v39 = vmul.f32 %v4109_v40, %v5514_v17 }
0x1a37   :  { %v4115_v44 = vsub.f32 %v4101_v24, %v4113_v39 }
0x1a39   :  { %v4117_v57 = vmul.f32 %v4115_v44, %v4115_v44 }
0x1a3b   :  { %v4119_v37 = vsel %vm252_vm0, %v4117_v57, 0.0 }
0x1a3c   :  { %4120 = vadd.xlane.f32.xlu1 %v4119_v37 }
0x1a44   :  { %2185 = vadd.xlane.f32.xlu1 %v2184_v46 }
0x1a5b   :  { %v4112_v47 = vpop.xlane.xlu0 %4111 }
0x1a5c   :  { %v4114_v49 = vmul.f32 %v4112_v47, %v5514_v17 }
0x1a5e   :  { %v4116_v42 = vsub.f32 %v4102_v54, %v4114_v49 }
0x1a60   :  { %v4118_v9 = vmul.f32 %v4116_v42, %v4116_v42 }
0x1a62   :  { %v4122_v53 = vsel %vm252_vm0, %v4118_v9, 0.0 }
0x1a63   :  { %4123 = vadd.xlane.f32.xlu2 %v4122_v53  ;;  %v2183_v58 = vpop.xlane.xlu0 %2182 }
0x1a64   :  { %v2187_v52 = vmul.f32 %v2183_v58, %v5514_v17 }
0x1a66   :  { %v6386_v6 = vsub.f32 %v5819_v21, %v2187_v52  ;;  %v4629_v21 = vld [vmem:[%s6467_s16 + $0x1] ss:$0 sm:$0xff] }
0x1a68   :  { %v2191_v7 = vmul.f32 %v6386_v6, %v6386_v6 }
0x1a6a   :  { %v2193_v29 = vsel %vm252_vm0, %v2191_v7, 0.0 }
0x1a6b   :  { %2194 = vadd.xlane.f32.xlu1 %v2193_v29 }
0x1aaf   :  { %v4121_v56 = vpop.xlane.xlu1 %4120 }
0x1ab0   :  { %v4125_v3 = vmul.f32 %v4121_v56, %v5514_v17 }
0x1ab2   :  { %v4127_v61 = vadd.f32 1e-05, %v4125_v3 }
0x1ab4   :  { %4787 = vrsqrt.f32 %v4127_v61  ;;  %vm4135_vm8 = vweird.f32 %v4127_v61 }
0x1ab7   :  { %v2186_v51 = vpop.xlane.xlu1 %2185 }
0x1ab8   :  { %v2188_v13 = vmul.f32 %v2186_v51, %v5514_v17 }
0x1aba   :  { %v4788_v62 = vpop.eup %4787  ;;  %v6397_v8 = vsub.f32 %v5826_v43, %v2188_v13 }
0x1abb   :  { %v4130_v63 = vmul.f32 %v4788_v62, %v4127_v61  ;;  %vm4136_vm3 = vweird.f32 %v4788_v62 }
0x1abc   :  { %vm4137_vm9 = vmor %vm4135_vm8, %vm4136_vm3  ;;  %v2192_v36 = vmul.f32 %v6397_v8, %v6397_v8 }
0x1abd   :  { %v4131_v2 = vmul.f32 %v4788_v62, %v4130_v63 }
0x1abe   :  { %v2196_v16 = vsel %vm252_vm0, %v2192_v36, 0.0  ;;  %v4633_v36 = vld [vmem:[%s6473_s22] ss:$0 sm:$0xff] }
0x1abf   :  { %v4132_v1 = vmul.f32 0.5, %v4131_v2 }
0x1ac1   :  { %v4133_v4 = vsub.f32 1.5, %v4132_v1 }
0x1ac3   :  { %v4134_v55 = vmul.f32 %v4788_v62, %v4133_v4 }
0x1ac5   :  { %v4138_v30 = vsel %vm4137_vm9, %v4788_v62, %v4134_v55 }
0x1ac6   :  { %v4149_v41 = vmul.f32 %v4138_v30, %v4115_v44 }
0x1ac8   :  { %v4154_v0 = vmul.f32 %v4629_v21, %v4149_v41 }
0x1aca   :  { %v4159_v15 = vadd.f32 %v4630_v20, %v4154_v0 }
0x1acc   :  { %v4163_v14 = vsel %vm252_vm0, %v4159_v15, 0.0 }
0x1acd   :  { %4164 = vadd.xlane.f32.xlu2 %v4163_v14 }
0x1ad5   :  { %2197 = vadd.xlane.f32.xlu2 %v2196_v16  ;;  %v4635_v16 = vld [vmem:[%s6473_s22] ss:$0 sm:$0xff]  ;;  %s5103_s22 = smov [#allocation17]  }
0x1ad6   :  { %v4124_v18 = vpop.xlane.xlu2 %4123 }
0x1ad7   :  { %v4126_v5 = vmul.f32 %v4124_v18, %v5514_v17 }
0x1ad9   :  { %v4128_v33 = vadd.f32 1e-05, %v4126_v5  ;;  %v4634_v5 = vld [vmem:[%s6474_s23] ss:$0 sm:$0xff] }
0x1adb   :  { %4789 = vrsqrt.f32 %v4128_v33  ;;  %vm4145_vm11 = vweird.f32 %v4128_v33 }
0x1ade   :  { %v2195_v48 = vpop.xlane.xlu1 %2194 }
0x1adf   :  { %v2199_v12 = vmul.f32 %v2195_v48, %v5514_v17  ;;  %v4636_v48 = vld [vmem:[%s6474_s23] ss:$0 sm:$0xff]  ;;  %s4238_s23 = sshll.u32 %s5103_s22, 4  ;;  %s4239_s23 = int_to_ptr.vmem [resolvable:$true] %s4238_s23 }
0x1ae1   :  { %v4790_v22 = vpop.eup %4789  ;;  %v2201_v43 = vadd.f32 1e-05, %v2199_v12 }
0x1ae2   :  { %v4140_v23 = vmul.f32 %v4790_v22, %v4128_v33  ;;  %vm4146_vm10 = vweird.f32 %v4790_v22 }
0x1ae3   :  { %4791 = vrsqrt.f32 %v2201_v43  ;;  %vm4147_vm12 = vmor %vm4145_vm11, %vm4146_vm10  ;;  %vm2209_vm14 = vweird.f32 %v2201_v43 }
0x1ae4   :  { %v4141_v25 = vmul.f32 %v4790_v22, %v4140_v23 }
0x1ae6   :  { %v4142_v59 = vmul.f32 0.5, %v4141_v25 }
0x1ae8   :  { %v4143_v26 = vsub.f32 1.5, %v4142_v59 }
0x1ae9   :  { %v4792_v27 = vpop.eup %4791 }
0x1aea   :  { %v4144_v45 = vmul.f32 %v4790_v22, %v4143_v26  ;;  %v2204_v50 = vmul.f32 %v4792_v27, %v2201_v43  ;;  %vm2210_vm13 = vweird.f32 %v4792_v27 }
0x1aeb   :  { %vm2211_vm15 = vmor %vm2209_vm14, %vm2210_vm13 }
0x1aec   :  { %v2205_v11 = vmul.f32 %v4792_v27, %v2204_v50  ;;  %v4148_v10 = vsel %vm4147_vm12, %v4790_v22, %v4144_v45 }
0x1aed   :  { %v4150_v32 = vmul.f32 %v4148_v10, %v4116_v42 }
0x1aee   :  { %v2206_v31 = vmul.f32 0.5, %v2205_v11 }
0x1aef   :  { %v4155_v60 = vmul.f32 %v4629_v21, %v4150_v32 }
0x1af0   :  { %v2207_v24 = vsub.f32 1.5, %v2206_v31 }
0x1af1   :  { %v4160_v34 = vadd.f32 %v4630_v20, %v4155_v60 }
0x1af2   :  { %v2208_v19 = vmul.f32 %v4792_v27, %v2207_v24 }
0x1af3   :  { %v4166_v54 = vsel %vm252_vm0, %v4160_v34, 0.0 }
0x1af4   :  { %v2212_v28 = vsel %vm2211_vm15, %v4792_v27, %v2208_v19  ;;  %4167 = vadd.xlane.f32.xlu0 %v4166_v54 }
0x1af5   :  { %v2223_v40 = vmul.f32 %v2212_v28, %v6386_v6 }
0x1af7   :  { %v2228_v39 = vmul.f32 %v4631_v35, %v2223_v40 }
0x1af9   :  { %v2233_v44 = vadd.f32 %v4632_v38, %v2228_v39 }
0x1afb   :  { %2235 = vst.msk [vmem:[#allocation17] sm:$0xff] %vm252_vm0, %v2233_v44 }
0x1b40   :  { %v4165_v57 = vpop.xlane.xlu2 %4164 }
0x1b41   :  { %v4169_v37 = vmul.f32 %v4165_v57, %v5514_v17 }
0x1b43   :  { %v4171_v46 = vsub.f32 %v4159_v15, %v4169_v37 }
0x1b45   :  { %v4173_v47 = vmul.f32 %v4171_v46, %v4171_v46 }
0x1b47   :  { %v4175_v49 = vsel %vm252_vm0, %v4173_v47, 0.0 }
0x1b48   :  { %v2198_v42 = vpop.xlane.xlu2 %2197  ;;  %4176 = vadd.xlane.f32.xlu0 %v4175_v49 }
0x1b49   :  { %v2200_v9 = vmul.f32 %v2198_v42, %v5514_v17 }
0x1b4b   :  { %v2202_v53 = vadd.f32 1e-05, %v2200_v9 }
0x1b4d   :  { %4793 = vrsqrt.f32 %v2202_v53  ;;  %vm2219_vm6 = vweird.f32 %v2202_v53 }
0x1b53   :  { %v4794_v58 = vpop.eup %4793 }
0x1b54   :  { %v2214_v52 = vmul.f32 %v4794_v58, %v2202_v53  ;;  %vm2220_vm1 = vweird.f32 %v4794_v58 }
0x1b55   :  { %vm2221_vm7 = vmor %vm2219_vm6, %vm2220_vm1 }
0x1b56   :  { %v2215_v6 = vmul.f32 %v4794_v58, %v2214_v52 }
0x1b58   :  { %v2216_v7 = vmul.f32 0.5, %v2215_v6 }
0x1b5a   :  { %v2217_v29 = vsub.f32 1.5, %v2216_v7 }
0x1b5c   :  { %v2218_v56 = vmul.f32 %v4794_v58, %v2217_v29 }
0x1b5e   :  { %v2222_v3 = vsel %vm2221_vm7, %v4794_v58, %v2218_v56 }
0x1b5f   :  { %v2224_v61 = vmul.f32 %v2222_v3, %v6397_v8 }
0x1b61   :  { %v2229_v62 = vmul.f32 %v4631_v35, %v2224_v61 }
0x1b63   :  { %v2234_v63 = vadd.f32 %v4632_v38, %v2229_v62 }
0x1b65   :  { %2236 = vst.msk [vmem:[#allocation17 + $0x8] sm:$0xff] %vm252_vm0, %v2234_v63 }
0x1b67   :  { %v4168_v2 = vpop.xlane.xlu0 %4167 }
0x1b68   :  { %v4170_v1 = vmul.f32 %v4168_v2, %v5514_v17 }
0x1b6a   :  { %v4172_v4 = vsub.f32 %v4160_v34, %v4170_v1 }
0x1b6c   :  { %v4174_v55 = vmul.f32 %v4172_v4, %v4172_v4 }
0x1b6e   :  { %v4178_v21 = vsel %vm252_vm0, %v4174_v55, 0.0 }
0x1b6f   :  { %4179 = vadd.xlane.f32.xlu1 %v4178_v21 }
0x1bbb   :  { %v4177_v51 = vpop.xlane.xlu0 %4176 }
0x1bbc   :  { %v4181_v30 = vmul.f32 %v4177_v51, %v5514_v17 }
0x1bbe   :  { %v4183_v41 = vadd.f32 1e-05, %v4181_v30 }
0x1bc0   :  { %4795 = vrsqrt.f32 %v4183_v41  ;;  %vm4191_vm4 = vweird.f32 %v4183_v41 }
0x1bc6   :  { %v4796_v20 = vpop.eup %4795 }
0x1bc7   :  { %v4186_v13 = vmul.f32 %v4796_v20, %v4183_v41  ;;  %vm4192_vm2 = vweird.f32 %v4796_v20 }
0x1bc8   :  { %vm4193_vm5 = vmor %vm4191_vm4, %vm4192_vm2 }
0x1bc9   :  { %v4187_v0 = vmul.f32 %v4796_v20, %v4186_v13 }
0x1bcb   :  { %v4188_v15 = vmul.f32 0.5, %v4187_v0 }
0x1bcd   :  { %v4189_v8 = vsub.f32 1.5, %v4188_v15 }
0x1bcf   :  { %v4190_v14 = vmul.f32 %v4796_v20, %v4189_v8 }
0x1bd1   :  { %v4194_v18 = vsel %vm4193_vm5, %v4796_v20, %v4190_v14 }
0x1bd2   :  { %v4205_v33 = vmul.f32 %v4194_v18, %v4171_v46 }
0x1bd4   :  { %v4210_v12 = vmul.f32 %v4633_v36, %v4205_v33  ;;  %v4225_v22 = vmul.f32 %v4635_v16, %v4205_v33 }
0x1bd6   :  { %v4215_v43 = vadd.f32 %v4634_v5, %v4210_v12  ;;  %v4230_v23 = vadd.f32 %v4636_v48, %v4225_v22 }
0x1bd8   :  { %4218 = vst.msk [vmem:[#allocation17 + $0x10] sm:$0xff] %vm252_vm0, %v4215_v43 }
0x1bd9   :  { %4232 = vst.msk [vmem:[#allocation18] sm:$0xff] %vm252_vm0, %v4230_v23 }
0x1be2   :  { %v4180_v25 = vpop.xlane.xlu1 %4179 }
0x1be3   :  { %v4182_v59 = vmul.f32 %v4180_v25, %v5514_v17 }
0x1be5   :  { %v4184_v26 = vadd.f32 1e-05, %v4182_v59 }
0x1be7   :  { %4797 = vrsqrt.f32 %v4184_v26  ;;  %vm4201_vm8 = vweird.f32 %v4184_v26 }
0x1bed   :  { %v4798_v27 = vpop.eup %4797 }
0x1bee   :  { %v4196_v45 = vmul.f32 %v4798_v27, %v4184_v26  ;;  %vm4202_vm3 = vweird.f32 %v4798_v27 }
0x1bef   :  { %vm4203_vm9 = vmor %vm4201_vm8, %vm4202_vm3 }
0x1bf0   :  { %v4197_v50 = vmul.f32 %v4798_v27, %v4196_v45 }
0x1bf2   :  { %v4198_v11 = vmul.f32 0.5, %v4197_v50 }
0x1bf4   :  { %v4199_v10 = vsub.f32 1.5, %v4198_v11 }
0x1bf6   :  { %v4200_v32 = vmul.f32 %v4798_v27, %v4199_v10 }
0x1bf8   :  { %v4204_v31 = vsel %vm4203_vm9, %v4798_v27, %v4200_v32 }
0x1bf9   :  { %v4206_v60 = vmul.f32 %v4204_v31, %v4172_v4 }
0x1bfb   :  { %v4211_v17 = vmul.f32 %v4633_v36, %v4206_v60  ;;  %v4226_v24 = vmul.f32 %v4635_v16, %v4206_v60 }
0x1bfd   :  { %v4216_v34 = vadd.f32 %v4634_v5, %v4211_v17  ;;  %v4231_v19 = vadd.f32 %v4636_v48, %v4226_v24 }
0x1bff   :  { %4219 = vst.msk [vmem:[#allocation17 + $0x18] sm:$0xff] %vm252_vm0, %v4216_v34 }
0x1c00   :  { %4246 = dma.vmem_to_hbm [thread:$0]  %s4239_s23, 512, %s4241_s25, [#allocation4], %s6504_s2, %s6504_s2, %s5085_s28   ;;  %4233 = vst.msk [vmem:[#allocation18 + $0x8] sm:$0xff] %vm252_vm0, %v4231_v19 }
0x1c01   :  { %4259 = dma.vmem_to_hbm [thread:$0]  %s4252_s0, 256, %s4254_s3, [#allocation19], %s6504_s2, %s6504_s2, %s5085_s28  }
0x1c02   :  { %5079 = dma.done.wait [#allocation4], 512  }
0x1c03   :  { %5080 = vsyncadd [#allocation4], 4294966784 }
0x1c04   :  { %5081 = dma.done.wait [#allocation19], 256  }
0x1c05   :  { %5082 = vsyncadd [#allocation19], 4294967040 }
0x1c06   :  { %4268 = vsyncpa [#allocation3], 1 }
0x1c07   :  { %4269 = vsyncpa [#allocation6], 1 }
0x1c08   :  { %4270 = vsyncpa [#allocation9], 1 }
0x1c09   :  { %4271 = vsyncpa [#allocation12], 1 }
0x1c0a   :  { %4272 = vsyncpa [#allocation15], 1 }
0x1c0b   :  { %4273 = vsyncpa [#allocation4], 1 }
0x1c0c   :  { %4274 = vsyncpa [#allocation19], 1 }

</bundles_post_ra>
